<compile_context>
chip_gen: v5e
topology: v5e:2x2
jax: 0.10.0
libtpu: 0.0.40
codegen_flags: <defaults>
</compile_context>

<pallas_src>
import functools

import jax
import jax.numpy as jnp
from jax import lax
from jax.experimental import pallas as pl
from jax.experimental.pallas import tpu as pltpu


# ----------------------------- Pallas kernels -------------------------------


def _conv1_stats_kernel(xph_ref, w_ref, o_ref, s_ref, q_ref, *, mxu_dtype):
    """Conv1 (4x4, s=2, p=1, no bias) as a 2x2 implicit GEMM over the
    phase-stacked input, plus per-image BN1 partial statistics.

    xph_ref : (4*Cin, Hh, Wh)     phase-stacked padded input, one image
    w_ref   : (2, 2, Cout, 4*Cin) conv1 weight (mxu_dtype)
    o_ref   : (Cout, Ho*Wo)       f32 pre-BN conv1 output (channel-major)
    s_ref   : (Cout, 1)           per-image sum
    q_ref   : (Cout, 1)           per-image centered sum of squares
    """
    c4, hh, wh = xph_ref.shape
    ho, wo = hh - 1, wh - 1
    m = ho * wo

    o_ref[...] = jnp.zeros_like(o_ref)
    for a0 in range(2):
        for b0 in range(2):
            # 4 taps (the 2x2 phase group) are already stacked on the channel
            # axis -> one dot with K = 4*Cin per (a0, b0) offset.
            patch = xph_ref[:, a0:a0 + ho, b0:b0 + wo]          # (4Cin,Ho,Wo)
            patch = patch.reshape(c4, m).astype(mxu_dtype)
            o_ref[...] += jnp.dot(w_ref[a0, b0], patch,
                                  preferred_element_type=jnp.float32)

    acc = o_ref[...]
    s = jnp.sum(acc, axis=1, keepdims=True)                     # (Cout, 1)
    mean = s * (1.0 / m)
    d = acc - mean
    s_ref[...] = s
    q_ref[...] = jnp.sum(d * d, axis=1, keepdims=True)


def _bn1_conv2_stats_kernel(y_ref, sc_ref, sh_ref, w_ref, b_ref,
                            o_ref, s_ref, q_ref, apad_ref, *, mxu_dtype):
    """BN1-apply + LeakyReLU(0.1) fused into conv2 (3x3, s=1, p=1) + bias,
    plus per-image BN2 partial statistics.  Padding is done in a zero-ringed
    VMEM scratch (no HBM pad pass, no iota masking).

    y_ref   : (C, Ho, Wo)     pre-BN conv1 output, one image (channel-major)
    sc_ref  : (C, 1)          BN1 scale            sh_ref : (C, 1) BN1 shift
    w_ref   : (3, Cout, 3*C)  conv2 weight, kw taps stacked on K (mxu_dtype)
    b_ref   : (Cout, 1)       conv2 bias
    o_ref   : (Cout, Ho*Wo)   f32 pre-BN conv2 output
    s_ref/q_ref : (Cout, 1)
    apad_ref: VMEM scratch (C, Ho+2, Wo+2)
    """
    c, ho, wo = y_ref.shape
    cout = o_ref.shape[0]
    m = ho * wo

    a = y_ref[...] * sc_ref[...].reshape(c, 1, 1) + sh_ref[...].reshape(c, 1, 1)
    a = jnp.where(a >= 0, a, 0.1 * a)                            # LeakyReLU

    # Zero the scratch every step (keeps the halo ring zero and stays correct
    # under megacore grid sharding), then write the interior.
    apad_ref[...] = jnp.zeros_like(apad_ref)
    apad_ref[:, 1:ho + 1, 1:wo + 1] = a

    o_ref[...] = jnp.broadcast_to(b_ref[...], (cout, m))         # bias init
    for ki in range(3):
        # Stack the 3 kw taps of this kernel row along K -> one dot, K = 3*C.
        taps = [apad_ref[:, ki:ki + ho, kj:kj + wo] for kj in range(3)]
        strip = jnp.concatenate(taps, axis=0)                    # (3C,Ho,Wo)
        strip = strip.reshape(3 * c, m).astype(mxu_dtype)
        o_ref[...] += jnp.dot(w_ref[ki], strip,
                              preferred_element_type=jnp.float32)

    acc = o_ref[...]
    s = jnp.sum(acc, axis=1, keepdims=True)
    mean = s * (1.0 / m)
    d = acc - mean
    s_ref[...] = s
    q_ref[...] = jnp.sum(d * d, axis=1, keepdims=True)


def _bn2_act_kernel(y_ref, sc_ref, sh_ref, o_ref):
    """BN2-apply + LeakyReLU(0.1).  Channel-major in, channel-major out (the
    result IS the NCHW output, flattened over spatial) -> no transpose at all.

    y_ref : (Cout, Ho*Wo)   sc_ref/sh_ref : (Cout, 1)   o_ref : (Cout, Ho*Wo)
    """
    a = y_ref[...] * sc_ref[...] + sh_ref[...]
    o_ref[...] = jnp.where(a >= 0, a, 0.1 * a)


# ----------------------------- wrapper ---------------------------------------


def _combine_moments(s, q, m_per_image, gamma, beta, eps):
    """Per-image (sum, centered sum-of-squares) chunks -> BN scale/shift
    (training-mode batch statistics, biased variance, numerically stable)."""
    n_img = s.shape[0]
    count = n_img * m_per_image
    sums = s[:, :, 0]                                            # (N, C)
    mean_i = sums / m_per_image
    mean = jnp.sum(sums, axis=0) / count                         # (C,)
    m2 = jnp.sum(q[:, :, 0], axis=0) + m_per_image * jnp.sum(
        (mean_i - mean[None, :]) ** 2, axis=0)
    var = m2 / count                                             # biased var
    scale = gamma / jnp.sqrt(var + eps)
    shift = beta - mean * scale
    return scale.reshape(-1, 1), shift.reshape(-1, 1)


@functools.partial(jax.jit, static_argnames=("mxu_dtype",))
def down_forward(x_nchw, params, mxu_dtype=jnp.bfloat16):
    x = x_nchw.astype(jnp.float32)                               # NCHW
    n, cin, h, w = x.shape
    cout = params["w1"].shape[0]
    assert h % 2 == 0 and w % 2 == 0, "down() expects even spatial dims"
    ho, wo = h // 2, w // 2
    m = ho * wo
    hh, wh = ho + 1, wo + 1                                      # phase extents

    cparams = pltpu.CompilerParams(
        dimension_semantics=("parallel",),
        vmem_limit_bytes=32 * 1024 * 1024)

    # ---- fused pad + space-to-depth: one array with phases on the channel ---
    xp = jnp.pad(x, ((0, 0), (0, 0), (1, 1), (1, 1)))            # (N,Cin,H+2,W+2)
    xph = xp.reshape(n, cin, hh, 2, wh, 2)
    xph = jnp.transpose(xph, (0, 3, 5, 1, 2, 4)).reshape(n, 4 * cin, hh, wh)

    # conv1 weight -> (a0, b0, Cout, (p,q,c)) matching the phase-channel order
    w1 = params["w1"]                                            # (O,Cin,4,4)
    w1s = w1.reshape(cout, cin, 2, 2, 2, 2)
    w1s = jnp.transpose(w1s, (2, 4, 0, 3, 5, 1)).reshape(2, 2, cout, 4 * cin)
    w1s = w1s.astype(mxu_dtype)

    # ---- K1: conv1 + fused BN1 partial stats --------------------------------
    y1, s1, q1 = pl.pallas_call(
        functools.partial(_conv1_stats_kernel, mxu_dtype=mxu_dtype),
        out_shape=(jax.ShapeDtypeStruct((n, cout, m), jnp.float32),
                   jax.ShapeDtypeStruct((n, cout, 1), jnp.float32),
                   jax.ShapeDtypeStruct((n, cout, 1), jnp.float32)),
        grid=(n,),
        in_specs=[pl.BlockSpec((None, 4 * cin, hh, wh), lambda i: (i, 0, 0, 0)),
                  pl.BlockSpec((2, 2, cout, 4 * cin), lambda i: (0, 0, 0, 0))],
        out_specs=(pl.BlockSpec((None, cout, m), lambda i: (i, 0, 0)),
                   pl.BlockSpec((None, cout, 1), lambda i: (i, 0, 0)),
                   pl.BlockSpec((None, cout, 1), lambda i: (i, 0, 0))),
        compiler_params=cparams,
    )(xph, w1s)

    scale1, shift1 = _combine_moments(s1, q1, m, params["g1"], params["b1"], 1e-5)

    # conv2 weight -> (ki, Cout, kj*C + c): kw taps stacked along K
    w2 = params["w2"]                                            # (O,C,3,3)
    w2s = jnp.transpose(w2, (2, 0, 3, 1)).reshape(3, cout, 3 * cout)
    w2s = w2s.astype(mxu_dtype)

    # ---- K2: BN1+LeakyReLU fused into conv2 + bias + BN2 partial stats ------
    y2, s2, q2 = pl.pallas_call(
        functools.partial(_bn1_conv2_stats_kernel, mxu_dtype=mxu_dtype),
        out_shape=(jax.ShapeDtypeStruct((n, cout, m), jnp.float32),
                   jax.ShapeDtypeStruct((n, cout, 1), jnp.float32),
                   jax.ShapeDtypeStruct((n, cout, 1), jnp.float32)),
        grid=(n,),
        in_specs=[pl.BlockSpec((None, cout, ho, wo), lambda i: (i, 0, 0, 0)),
                  pl.BlockSpec((cout, 1), lambda i: (0, 0)),
                  pl.BlockSpec((cout, 1), lambda i: (0, 0)),
                  pl.BlockSpec((3, cout, 3 * cout), lambda i: (0, 0, 0)),
                  pl.BlockSpec((cout, 1), lambda i: (0, 0))],
        out_specs=(pl.BlockSpec((None, cout, m), lambda i: (i, 0, 0)),
                   pl.BlockSpec((None, cout, 1), lambda i: (i, 0, 0)),
                   pl.BlockSpec((None, cout, 1), lambda i: (i, 0, 0))),
        scratch_shapes=[pltpu.VMEM((cout, ho + 2, wo + 2), jnp.float32)],
        compiler_params=cparams,
    )(y1.reshape(n, cout, ho, wo),                               # free reshape
      scale1, shift1, w2s, params["bias2"].reshape(cout, 1))

    scale2, shift2 = _combine_moments(s2, q2, m, params["g2"], params["b2"], 0.8)

    # ---- K3: BN2 + LeakyReLU (already channel-major -> NCHW for free) -------
    out = pl.pallas_call(
        _bn2_act_kernel,
        out_shape=jax.ShapeDtypeStruct((n, cout, m), jnp.float32),
        grid=(n,),
        in_specs=[pl.BlockSpec((None, cout, m), lambda i: (i, 0, 0)),
                  pl.BlockSpec((cout, 1), lambda i: (0, 0)),
                  pl.BlockSpec((cout, 1), lambda i: (0, 0))],
        out_specs=pl.BlockSpec((None, cout, m), lambda i: (i, 0, 0)),
        compiler_params=cparams,
    )(y2, scale2, shift2)

    return out.reshape(n, cout, ho, wo)                          # NCHW, no copy


# ----------------------------- pure-JAX reference ----------------------------


def _ref_forward(x, p):
    def conv(x, w, stride, pad, bias=None):
        out = lax.conv_general_dilated(
            x, w, (stride, stride), [(pad, pad), (pad, pad)],
            dimension_numbers=("NCHW", "OIHW", "NCHW"))
        if bias is not None:
            out = out + bias[None, :, None, None]
        return out

    def bn_act(x, g, b, eps):
        mean = x.mean(axis=(0, 2, 3), keepdims=True)
        var = x.var(axis=(0, 2, 3), keepdims=True)
        y = (x - mean) / jnp.sqrt(var + eps)
        y = y * g[None, :, None, None] + b[None, :, None, None]
        return jnp.where(y >= 0, y, 0.1 * y)

    h = conv(x, p["w1"], 2, 1)
    h = bn_act(h, p["g1"], p["b1"], 1e-5)
    h = conv(h, p["w2"], 1, 1, p["bias2"])
    h = bn_act(h, p["g2"], p["b2"], 0.8)
    return h


# ----------------------------- main ------------------------------------------

if __name__ == "__main__":
    in_ch, out_ch = 4, 8
    N, H, W = 2, 16, 16

    key = jax.random.PRNGKey(0)
    ks = jax.random.split(key, 8)
    params = {
        "w1": 0.1 * jax.random.normal(ks[0], (out_ch, in_ch, 4, 4), jnp.float32),
        "g1": 1.0 + 0.1 * jax.random.normal(ks[1], (out_ch,), jnp.float32),
        "b1": 0.1 * jax.random.normal(ks[2], (out_ch,), jnp.float32),
        "w2": 0.1 * jax.random.normal(ks[3], (out_ch, out_ch, 3, 3), jnp.float32),
        "bias2": 0.1 * jax.random.normal(ks[4], (out_ch,), jnp.float32),
        "g2": 1.0 + 0.1 * jax.random.normal(ks[5], (out_ch,), jnp.float32),
        "b2": 0.1 * jax.random.normal(ks[6], (out_ch,), jnp.float32),
    }
    x = jax.random.normal(ks[7], (N, in_ch, H, W), jnp.float32)

    ref = jax.block_until_ready(_ref_forward(x, params))

    # Exact-semantics mode (f32 MXU operands): tight tolerance.
    out_f32 = jax.block_until_ready(
        down_forward(x, params, mxu_dtype=jnp.float32))
    assert out_f32.shape == (N, out_ch, H // 2, W // 2), out_f32.shape
    assert jnp.allclose(out_f32, ref, rtol=1e-3, atol=1e-3), float(
        jnp.max(jnp.abs(out_f32 - ref)))

    # Default fast mode (bf16 MXU operands, f32 accumulate): loose tolerance
    # (this is a documented numerics mode, not bit-exact vs. the f32 reference).
    out_bf16 = jax.block_until_ready(down_forward(x, params))
    assert out_bf16.shape == (N, out_ch, H // 2, W // 2), out_bf16.shape
    assert jnp.allclose(out_bf16, ref, rtol=5e-2, atol=5e-2), float(
        jnp.max(jnp.abs(out_bf16 - ref)))

    print("KERNEL_OK")
</pallas_src>

<mosaic_0001>
module attributes {stable_mosaic.version = 11 : i64} {
  func.func @_conv1_stats_kernel(%arg0: i32, %arg1: memref<1x16x9x9xf32, #tpu.memory_space<vmem>>, %arg2: memref<2x2x8x16xf32, #tpu.memory_space<vmem>>, %arg3: memref<1x8x64xf32, #tpu.memory_space<vmem>>, %arg4: memref<1x8x1xf32, #tpu.memory_space<vmem>>, %arg5: memref<1x8x1xf32, #tpu.memory_space<vmem>>) attributes {dimension_semantics = [#tpu.dimension_semantics<parallel>], iteration_bounds = array<i64: 2>, scalar_prefetch = 0 : i64, scratch_operands = 0 : i64, tpu.core_type = #tpu.core_type<tc>, window_params = [{transform_indices = @transform_0, window_bounds = array<i64: 1, 16, 9, 9>}, {pipeline_mode = #tpu.pipeline_mode<synchronous>, transform_indices = @transform_1, window_bounds = array<i64: 2, 2, 8, 16>}, {transform_indices = @transform_2, window_bounds = array<i64: 1, 8, 64>}, {transform_indices = @transform_3, window_bounds = array<i64: 1, 8, 1>}, {transform_indices = @transform_4, window_bounds = array<i64: 1, 8, 1>}]} {
    %cst = arith.constant 0.000000e+00 : f32
    %0 = vector.broadcast %cst : f32 to vector<8x64xf32>
    %c0 = arith.constant 0 : index
    %c0_0 = arith.constant 0 : index
    %c0_1 = arith.constant 0 : index
    %1 = vector.load %arg3[%c0, %c0_0, %c0_1] : memref<1x8x64xf32, #tpu.memory_space<vmem>>, vector<1x8x64xf32>
    %2 = vector.shape_cast %1 : vector<1x8x64xf32> to vector<8x64xf32>
    %3 = vector.shape_cast %0 : vector<8x64xf32> to vector<1x8x64xf32>
    tpu.vector_store %arg3[%c0, %c0_0, %c0_1], %3 {strides = array<i32>} : memref<1x8x64xf32, #tpu.memory_space<vmem>>, vector<1x8x64xf32>,
    %c0_2 = arith.constant 0 : index
    %c0_3 = arith.constant 0 : index
    %c0_4 = arith.constant 0 : index
    %c0_5 = arith.constant 0 : index
    %4 = vector.load %arg1[%c0_2, %c0_3, %c0_4, %c0_5] : memref<1x16x9x9xf32, #tpu.memory_space<vmem>>, vector<1x16x8x8xf32>
    %5 = vector.shape_cast %4 : vector<1x16x8x8xf32> to vector<16x8x8xf32>
    %6 = vector.shape_cast %5 : vector<16x8x8xf32> to vector<16x64xf32>
    %c0_6 = arith.constant 0 : index
    %c0_7 = arith.constant 0 : index
    %c0_8 = arith.constant 0 : index
    %7 = vector.load %arg3[%c0_6, %c0_7, %c0_8] : memref<1x8x64xf32, #tpu.memory_space<vmem>>, vector<1x8x64xf32>
    %8 = vector.shape_cast %7 : vector<1x8x64xf32> to vector<8x64xf32>
    %c0_9 = arith.constant 0 : index
    %c0_10 = arith.constant 0 : index
    %c0_11 = arith.constant 0 : index
    %c0_12 = arith.constant 0 : index
    %9 = vector.load %arg2[%c0_9, %c0_10, %c0_11, %c0_12] : memref<2x2x8x16xf32, #tpu.memory_space<vmem>>, vector<1x1x8x16xf32>
    %10 = vector.shape_cast %9 : vector<1x1x8x16xf32> to vector<8x16xf32>
    %cst_13 = arith.constant dense<0.000000e+00> : vector<8x64xf32>
    %11 = tpu.matmul %10, %6, %cst_13 {dimension_numbers = #tpu.dot_dimension_numbers<[1], [0], [0], [1], [0, 0, 1, 1], [], []>} : vector<8x16xf32>, vector<16x64xf32>, vector<8x64xf32> -> vector<8x64xf32>
    %12 = arith.addf %8, %11 : vector<8x64xf32>
    %c0_14 = arith.constant 0 : index
    %c0_15 = arith.constant 0 : index
    %c0_16 = arith.constant 0 : index
    %13 = vector.load %arg3[%c0_14, %c0_15, %c0_16] : memref<1x8x64xf32, #tpu.memory_space<vmem>>, vector<1x8x64xf32>
    %14 = vector.shape_cast %13 : vector<1x8x64xf32> to vector<8x64xf32>
    %15 = vector.shape_cast %12 : vector<8x64xf32> to vector<1x8x64xf32>
    tpu.vector_store %arg3[%c0_14, %c0_15, %c0_16], %15 {strides = array<i32>} : memref<1x8x64xf32, #tpu.memory_space<vmem>>, vector<1x8x64xf32>,
    %c0_17 = arith.constant 0 : index
    %c0_18 = arith.constant 0 : index
    %c0_19 = arith.constant 0 : index
    %c1 = arith.constant 1 : index
    %16 = vector.load %arg1[%c0_17, %c0_18, %c0_19, %c1] : memref<1x16x9x9xf32, #tpu.memory_space<vmem>>, vector<1x16x8x8xf32>
    %17 = vector.shape_cast %16 : vector<1x16x8x8xf32> to vector<16x8x8xf32>
    %18 = vector.shape_cast %17 : vector<16x8x8xf32> to vector<16x64xf32>
    %c0_20 = arith.constant 0 : index
    %c0_21 = arith.constant 0 : index
    %c0_22 = arith.constant 0 : index
    %19 = vector.load %arg3[%c0_20, %c0_21, %c0_22] : memref<1x8x64xf32, #tpu.memory_space<vmem>>, vector<1x8x64xf32>
    %20 = vector.shape_cast %19 : vector<1x8x64xf32> to vector<8x64xf32>
    %c0_23 = arith.constant 0 : index
    %c1_24 = arith.constant 1 : index
    %c0_25 = arith.constant 0 : index
    %c0_26 = arith.constant 0 : index
    %21 = vector.load %arg2[%c0_23, %c1_24, %c0_25, %c0_26] : memref<2x2x8x16xf32, #tpu.memory_space<vmem>>, vector<1x1x8x16xf32>
    %22 = vector.shape_cast %21 : vector<1x1x8x16xf32> to vector<8x16xf32>
    %cst_27 = arith.constant dense<0.000000e+00> : vector<8x64xf32>
    %23 = tpu.matmul %22, %18, %cst_27 {dimension_numbers = #tpu.dot_dimension_numbers<[1], [0], [0], [1], [0, 0, 1, 1], [], []>} : vector<8x16xf32>, vector<16x64xf32>, vector<8x64xf32> -> vector<8x64xf32>
    %24 = arith.addf %20, %23 : vector<8x64xf32>
    %c0_28 = arith.constant 0 : index
    %c0_29 = arith.constant 0 : index
    %c0_30 = arith.constant 0 : index
    %25 = vector.load %arg3[%c0_28, %c0_29, %c0_30] : memref<1x8x64xf32, #tpu.memory_space<vmem>>, vector<1x8x64xf32>
    %26 = vector.shape_cast %25 : vector<1x8x64xf32> to vector<8x64xf32>
    %27 = vector.shape_cast %24 : vector<8x64xf32> to vector<1x8x64xf32>
    tpu.vector_store %arg3[%c0_28, %c0_29, %c0_30], %27 {strides = array<i32>} : memref<1x8x64xf32, #tpu.memory_space<vmem>>, vector<1x8x64xf32>,
    %c0_31 = arith.constant 0 : index
    %c0_32 = arith.constant 0 : index
    %c1_33 = arith.constant 1 : index
    %c0_34 = arith.constant 0 : index
    %28 = vector.load %arg1[%c0_31, %c0_32, %c1_33, %c0_34] : memref<1x16x9x9xf32, #tpu.memory_space<vmem>>, vector<1x16x8x8xf32>
    %29 = vector.shape_cast %28 : vector<1x16x8x8xf32> to vector<16x8x8xf32>
    %30 = vector.shape_cast %29 : vector<16x8x8xf32> to vector<16x64xf32>
    %c0_35 = arith.constant 0 : index
    %c0_36 = arith.constant 0 : index
    %c0_37 = arith.constant 0 : index
    %31 = vector.load %arg3[%c0_35, %c0_36, %c0_37] : memref<1x8x64xf32, #tpu.memory_space<vmem>>, vector<1x8x64xf32>
    %32 = vector.shape_cast %31 : vector<1x8x64xf32> to vector<8x64xf32>
    %c1_38 = arith.constant 1 : index
    %c0_39 = arith.constant 0 : index
    %c0_40 = arith.constant 0 : index
    %c0_41 = arith.constant 0 : index
    %33 = vector.load %arg2[%c1_38, %c0_39, %c0_40, %c0_41] : memref<2x2x8x16xf32, #tpu.memory_space<vmem>>, vector<1x1x8x16xf32>
    %34 = vector.shape_cast %33 : vector<1x1x8x16xf32> to vector<8x16xf32>
    %cst_42 = arith.constant dense<0.000000e+00> : vector<8x64xf32>
    %35 = tpu.matmul %34, %30, %cst_42 {dimension_numbers = #tpu.dot_dimension_numbers<[1], [0], [0], [1], [0, 0, 1, 1], [], []>} : vector<8x16xf32>, vector<16x64xf32>, vector<8x64xf32> -> vector<8x64xf32>
    %36 = arith.addf %32, %35 : vector<8x64xf32>
    %c0_43 = arith.constant 0 : index
    %c0_44 = arith.constant 0 : index
    %c0_45 = arith.constant 0 : index
    %37 = vector.load %arg3[%c0_43, %c0_44, %c0_45] : memref<1x8x64xf32, #tpu.memory_space<vmem>>, vector<1x8x64xf32>
    %38 = vector.shape_cast %37 : vector<1x8x64xf32> to vector<8x64xf32>
    %39 = vector.shape_cast %36 : vector<8x64xf32> to vector<1x8x64xf32>
    tpu.vector_store %arg3[%c0_43, %c0_44, %c0_45], %39 {strides = array<i32>} : memref<1x8x64xf32, #tpu.memory_space<vmem>>, vector<1x8x64xf32>,
    %c0_46 = arith.constant 0 : index
    %c0_47 = arith.constant 0 : index
    %c1_48 = arith.constant 1 : index
    %c1_49 = arith.constant 1 : index
    %40 = vector.load %arg1[%c0_46, %c0_47, %c1_48, %c1_49] : memref<1x16x9x9xf32, #tpu.memory_space<vmem>>, vector<1x16x8x8xf32>
    %41 = vector.shape_cast %40 : vector<1x16x8x8xf32> to vector<16x8x8xf32>
    %42 = vector.shape_cast %41 : vector<16x8x8xf32> to vector<16x64xf32>
    %c0_50 = arith.constant 0 : index
    %c0_51 = arith.constant 0 : index
    %c0_52 = arith.constant 0 : index
    %43 = vector.load %arg3[%c0_50, %c0_51, %c0_52] : memref<1x8x64xf32, #tpu.memory_space<vmem>>, vector<1x8x64xf32>
    %44 = vector.shape_cast %43 : vector<1x8x64xf32> to vector<8x64xf32>
    %c1_53 = arith.constant 1 : index
    %c1_54 = arith.constant 1 : index
    %c0_55 = arith.constant 0 : index
    %c0_56 = arith.constant 0 : index
    %45 = vector.load %arg2[%c1_53, %c1_54, %c0_55, %c0_56] : memref<2x2x8x16xf32, #tpu.memory_space<vmem>>, vector<1x1x8x16xf32>
    %46 = vector.shape_cast %45 : vector<1x1x8x16xf32> to vector<8x16xf32>
    %cst_57 = arith.constant dense<0.000000e+00> : vector<8x64xf32>
    %47 = tpu.matmul %46, %42, %cst_57 {dimension_numbers = #tpu.dot_dimension_numbers<[1], [0], [0], [1], [0, 0, 1, 1], [], []>} : vector<8x16xf32>, vector<16x64xf32>, vector<8x64xf32> -> vector<8x64xf32>
    %48 = arith.addf %44, %47 : vector<8x64xf32>
    %c0_58 = arith.constant 0 : index
    %c0_59 = arith.constant 0 : index
    %c0_60 = arith.constant 0 : index
    %49 = vector.load %arg3[%c0_58, %c0_59, %c0_60] : memref<1x8x64xf32, #tpu.memory_space<vmem>>, vector<1x8x64xf32>
    %50 = vector.shape_cast %49 : vector<1x8x64xf32> to vector<8x64xf32>
    %51 = vector.shape_cast %48 : vector<8x64xf32> to vector<1x8x64xf32>
    tpu.vector_store %arg3[%c0_58, %c0_59, %c0_60], %51 {strides = array<i32>} : memref<1x8x64xf32, #tpu.memory_space<vmem>>, vector<1x8x64xf32>,
    %c0_61 = arith.constant 0 : index
    %c0_62 = arith.constant 0 : index
    %c0_63 = arith.constant 0 : index
    %52 = vector.load %arg3[%c0_61, %c0_62, %c0_63] : memref<1x8x64xf32, #tpu.memory_space<vmem>>, vector<1x8x64xf32>
    %53 = vector.shape_cast %52 : vector<1x8x64xf32> to vector<8x64xf32>
    %cst_64 = arith.constant dense<0.000000e+00> : vector<8xf32>
    %54 = vector.multi_reduction <add>, %53, %cst_64 [1] : vector<8x64xf32> to vector<8xf32>
    %55 = vector.shape_cast %54 : vector<8xf32> to vector<8x1xf32>
    %cst_65 = arith.constant 1.562500e-02 : f32
    %56 = vector.broadcast %cst_65 : f32 to vector<8x1xf32>
    %57 = arith.mulf %55, %56 : vector<8x1xf32>
    %58 = vector.broadcast %57 : vector<8x1xf32> to vector<8x64xf32>
    %59 = arith.subf %53, %58 : vector<8x64xf32>
    %c0_66 = arith.constant 0 : index
    %c0_67 = arith.constant 0 : index
    %c0_68 = arith.constant 0 : index
    %60 = vector.load %arg4[%c0_66, %c0_67, %c0_68] : memref<1x8x1xf32, #tpu.memory_space<vmem>>, vector<1x8x1xf32>
    %61 = vector.shape_cast %60 : vector<1x8x1xf32> to vector<8x1xf32>
    %62 = vector.shape_cast %55 : vector<8x1xf32> to vector<1x8x1xf32>
    tpu.vector_store %arg4[%c0_66, %c0_67, %c0_68], %62 {strides = array<i32>} : memref<1x8x1xf32, #tpu.memory_space<vmem>>, vector<1x8x1xf32>,
    %63 = arith.mulf %59, %59 : vector<8x64xf32>
    %cst_69 = arith.constant dense<0.000000e+00> : vector<8xf32>
    %64 = vector.multi_reduction <add>, %63, %cst_69 [1] : vector<8x64xf32> to vector<8xf32>
    %65 = vector.shape_cast %64 : vector<8xf32> to vector<8x1xf32>
    %c0_70 = arith.constant 0 : index
    %c0_71 = arith.constant 0 : index
    %c0_72 = arith.constant 0 : index
    %66 = vector.load %arg5[%c0_70, %c0_71, %c0_72] : memref<1x8x1xf32, #tpu.memory_space<vmem>>, vector<1x8x1xf32>
    %67 = vector.shape_cast %66 : vector<1x8x1xf32> to vector<8x1xf32>
    %68 = vector.shape_cast %65 : vector<8x1xf32> to vector<1x8x1xf32>
    tpu.vector_store %arg5[%c0_70, %c0_71, %c0_72], %68 {strides = array<i32>} : memref<1x8x1xf32, #tpu.memory_space<vmem>>, vector<1x8x1xf32>,
    return
  }
  func.func @transform_0(%arg0: i32) -> (i32, i32, i32, i32) {
    %c0_i32 = arith.constant 0 : i32
    %c0_i32_0 = arith.constant 0 : i32
    %c0_i32_1 = arith.constant 0 : i32
    %c0_i32_2 = arith.constant 0 : i32
    return %arg0, %c0_i32, %c0_i32_0, %c0_i32_1 : i32, i32, i32, i32
  }
  func.func @transform_1(%arg0: i32) -> (i32, i32, i32, i32) {
    %c0_i32 = arith.constant 0 : i32
    %c0_i32_0 = arith.constant 0 : i32
    %c0_i32_1 = arith.constant 0 : i32
    %c0_i32_2 = arith.constant 0 : i32
    %c0_i32_3 = arith.constant 0 : i32
    return %c0_i32, %c0_i32_0, %c0_i32_1, %c0_i32_2 : i32, i32, i32, i32
  }
  func.func @transform_2(%arg0: i32) -> (i32, i32, i32) {
    %c0_i32 = arith.constant 0 : i32
    %c0_i32_0 = arith.constant 0 : i32
    %c0_i32_1 = arith.constant 0 : i32
    return %arg0, %c0_i32, %c0_i32_0 : i32, i32, i32
  }
  func.func @transform_3(%arg0: i32) -> (i32, i32, i32) {
    %c0_i32 = arith.constant 0 : i32
    %c0_i32_0 = arith.constant 0 : i32
    %c0_i32_1 = arith.constant 0 : i32
    return %arg0, %c0_i32, %c0_i32_0 : i32, i32, i32
  }
  func.func @transform_4(%arg0: i32) -> (i32, i32, i32) {
    %c0_i32 = arith.constant 0 : i32
    %c0_i32_0 = arith.constant 0 : i32
    %c0_i32_1 = arith.constant 0 : i32
    return %arg0, %c0_i32, %c0_i32_0 : i32, i32, i32
  }
}

module attributes {stable_mosaic.version = 11 : i64} {
  func.func @_bn1_conv2_stats_kernel(%arg0: i32, %arg1: memref<1x8x8x8xf32, #tpu.memory_space<vmem>>, %arg2: memref<8x1xf32, #tpu.memory_space<vmem>>, %arg3: memref<8x1xf32, #tpu.memory_space<vmem>>, %arg4: memref<3x8x24xf32, #tpu.memory_space<vmem>>, %arg5: memref<8x1xf32, #tpu.memory_space<vmem>>, %arg6: memref<1x8x64xf32, #tpu.memory_space<vmem>>, %arg7: memref<1x8x1xf32, #tpu.memory_space<vmem>>, %arg8: memref<1x8x1xf32, #tpu.memory_space<vmem>>, %arg9: memref<8x10x10xf32, #tpu.memory_space<vmem>>) attributes {dimension_semantics = [#tpu.dimension_semantics<parallel>], iteration_bounds = array<i64: 2>, scalar_prefetch = 0 : i64, scratch_operands = 1 : i64, tpu.core_type = #tpu.core_type<tc>, window_params = [{transform_indices = @transform_0, window_bounds = array<i64: 1, 8, 8, 8>}, {pipeline_mode = #tpu.pipeline_mode<synchronous>, transform_indices = @transform_1, window_bounds = array<i64: 8, 1>}, {pipeline_mode = #tpu.pipeline_mode<synchronous>, transform_indices = @transform_2, window_bounds = array<i64: 8, 1>}, {pipeline_mode = #tpu.pipeline_mode<synchronous>, transform_indices = @transform_3, window_bounds = array<i64: 3, 8, 24>}, {pipeline_mode = #tpu.pipeline_mode<synchronous>, transform_indices = @transform_4, window_bounds = array<i64: 8, 1>}, {transform_indices = @transform_5, window_bounds = array<i64: 1, 8, 64>}, {transform_indices = @transform_6, window_bounds = array<i64: 1, 8, 1>}, {transform_indices = @transform_7, window_bounds = array<i64: 1, 8, 1>}]} {
    %c0 = arith.constant 0 : index
    %c0_0 = arith.constant 0 : index
    %c0_1 = arith.constant 0 : index
    %c0_2 = arith.constant 0 : index
    %0 = vector.load %arg1[%c0, %c0_0, %c0_1, %c0_2] : memref<1x8x8x8xf32, #tpu.memory_space<vmem>>, vector<1x8x8x8xf32>
    %1 = vector.shape_cast %0 : vector<1x8x8x8xf32> to vector<8x8x8xf32>
    %c0_3 = arith.constant 0 : index
    %c0_4 = arith.constant 0 : index
    %2 = vector.load %arg2[%c0_3, %c0_4] : memref<8x1xf32, #tpu.memory_space<vmem>>, vector<8x1xf32>
    %3 = vector.shape_cast %2 : vector<8x1xf32> to vector<8x1x1xf32>
    %4 = vector.broadcast %3 : vector<8x1x1xf32> to vector<8x8x8xf32>
    %5 = arith.mulf %1, %4 : vector<8x8x8xf32>
    %c0_5 = arith.constant 0 : index
    %c0_6 = arith.constant 0 : index
    %6 = vector.load %arg3[%c0_5, %c0_6] : memref<8x1xf32, #tpu.memory_space<vmem>>, vector<8x1xf32>
    %7 = vector.shape_cast %6 : vector<8x1xf32> to vector<8x1x1xf32>
    %8 = vector.broadcast %7 : vector<8x1x1xf32> to vector<8x8x8xf32>
    %9 = arith.addf %5, %8 : vector<8x8x8xf32>
    %cst = arith.constant 0.000000e+00 : f32
    %10 = vector.broadcast %cst : f32 to vector<8x8x8xf32>
    %11 = arith.cmpf oge, %9, %10 : vector<8x8x8xf32>
    %cst_7 = arith.constant 1.000000e-01 : f32
    %12 = vector.broadcast %cst_7 : f32 to vector<8x8x8xf32>
    %13 = arith.mulf %12, %9 : vector<8x8x8xf32>
    %14 = arith.select %11, %9, %13 : vector<8x8x8xi1>, vector<8x8x8xf32>
    %cst_8 = arith.constant 0.000000e+00 : f32
    %15 = vector.broadcast %cst_8 : f32 to vector<8x10x10xf32>
    %c0_9 = arith.constant 0 : index
    %c0_10 = arith.constant 0 : index
    %c0_11 = arith.constant 0 : index
    %16 = vector.load %arg9[%c0_9, %c0_10, %c0_11] : memref<8x10x10xf32, #tpu.memory_space<vmem>>, vector<8x10x10xf32>
    tpu.vector_store %arg9[%c0_9, %c0_10, %c0_11], %15 {strides = array<i32>} : memref<8x10x10xf32, #tpu.memory_space<vmem>>, vector<8x10x10xf32>,
    %c0_12 = arith.constant 0 : index
    %c1 = arith.constant 1 : index
    %c1_13 = arith.constant 1 : index
    %17 = vector.load %arg9[%c0_12, %c1, %c1_13] : memref<8x10x10xf32, #tpu.memory_space<vmem>>, vector<8x8x8xf32>
    tpu.vector_store %arg9[%c0_12, %c1, %c1_13], %14 {strides = array<i32>} : memref<8x10x10xf32, #tpu.memory_space<vmem>>, vector<8x8x8xf32>,
    %c0_14 = arith.constant 0 : index
    %c0_15 = arith.constant 0 : index
    %18 = vector.load %arg5[%c0_14, %c0_15] : memref<8x1xf32, #tpu.memory_space<vmem>>, vector<8x1xf32>
    %19 = vector.shape_cast %18 : vector<8x1xf32> to vector<8x1xf32>
    %20 = vector.broadcast %19 : vector<8x1xf32> to vector<8x64xf32>
    %c0_16 = arith.constant 0 : index
    %c0_17 = arith.constant 0 : index
    %c0_18 = arith.constant 0 : index
    %21 = vector.load %arg6[%c0_16, %c0_17, %c0_18] : memref<1x8x64xf32, #tpu.memory_space<vmem>>, vector<1x8x64xf32>
    %22 = vector.shape_cast %21 : vector<1x8x64xf32> to vector<8x64xf32>
    %23 = vector.shape_cast %20 : vector<8x64xf32> to vector<1x8x64xf32>
    tpu.vector_store %arg6[%c0_16, %c0_17, %c0_18], %23 {strides = array<i32>} : memref<1x8x64xf32, #tpu.memory_space<vmem>>, vector<1x8x64xf32>,
    %c0_19 = arith.constant 0 : index
    %c0_20 = arith.constant 0 : index
    %c0_21 = arith.constant 0 : index
    %24 = vector.load %arg9[%c0_19, %c0_20, %c0_21] : memref<8x10x10xf32, #tpu.memory_space<vmem>>, vector<8x8x8xf32>
    %c0_22 = arith.constant 0 : index
    %c0_23 = arith.constant 0 : index
    %c1_24 = arith.constant 1 : index
    %25 = vector.load %arg9[%c0_22, %c0_23, %c1_24] : memref<8x10x10xf32, #tpu.memory_space<vmem>>, vector<8x8x8xf32>
    %c0_25 = arith.constant 0 : index
    %c0_26 = arith.constant 0 : index
    %c2 = arith.constant 2 : index
    %26 = vector.load %arg9[%c0_25, %c0_26, %c2] : memref<8x10x10xf32, #tpu.memory_space<vmem>>, vector<8x8x8xf32>
    %27 = tpu.concatenate %24, %25, %26 in 0 : vector<8x8x8xf32>, vector<8x8x8xf32>, vector<8x8x8xf32> -> vector<24x8x8xf32>
    %28 = vector.shape_cast %27 : vector<24x8x8xf32> to vector<24x64xf32>
    %c0_27 = arith.constant 0 : index
    %c0_28 = arith.constant 0 : index
    %c0_29 = arith.constant 0 : index
    %29 = vector.load %arg6[%c0_27, %c0_28, %c0_29] : memref<1x8x64xf32, #tpu.memory_space<vmem>>, vector<1x8x64xf32>
    %30 = vector.shape_cast %29 : vector<1x8x64xf32> to vector<8x64xf32>
    %c0_30 = arith.constant 0 : index
    %c0_31 = arith.constant 0 : index
    %c0_32 = arith.constant 0 : index
    %31 = vector.load %arg4[%c0_30, %c0_31, %c0_32] : memref<3x8x24xf32, #tpu.memory_space<vmem>>, vector<1x8x24xf32>
    %32 = vector.shape_cast %31 : vector<1x8x24xf32> to vector<8x24xf32>
    %cst_33 = arith.constant dense<0.000000e+00> : vector<8x64xf32>
    %33 = tpu.matmul %32, %28, %cst_33 {dimension_numbers = #tpu.dot_dimension_numbers<[1], [0], [0], [1], [0, 0, 1, 1], [], []>} : vector<8x24xf32>, vector<24x64xf32>, vector<8x64xf32> -> vector<8x64xf32>
    %34 = arith.addf %30, %33 : vector<8x64xf32>
    %c0_34 = arith.constant 0 : index
    %c0_35 = arith.constant 0 : index
    %c0_36 = arith.constant 0 : index
    %35 = vector.load %arg6[%c0_34, %c0_35, %c0_36] : memref<1x8x64xf32, #tpu.memory_space<vmem>>, vector<1x8x64xf32>
    %36 = vector.shape_cast %35 : vector<1x8x64xf32> to vector<8x64xf32>
    %37 = vector.shape_cast %34 : vector<8x64xf32> to vector<1x8x64xf32>
    tpu.vector_store %arg6[%c0_34, %c0_35, %c0_36], %37 {strides = array<i32>} : memref<1x8x64xf32, #tpu.memory_space<vmem>>, vector<1x8x64xf32>,
    %c0_37 = arith.constant 0 : index
    %c1_38 = arith.constant 1 : index
    %c0_39 = arith.constant 0 : index
    %38 = vector.load %arg9[%c0_37, %c1_38, %c0_39] : memref<8x10x10xf32, #tpu.memory_space<vmem>>, vector<8x8x8xf32>
    %c0_40 = arith.constant 0 : index
    %c1_41 = arith.constant 1 : index
    %c1_42 = arith.constant 1 : index
    %39 = vector.load %arg9[%c0_40, %c1_41, %c1_42] : memref<8x10x10xf32, #tpu.memory_space<vmem>>, vector<8x8x8xf32>
    %c0_43 = arith.constant 0 : index
    %c1_44 = arith.constant 1 : index
    %c2_45 = arith.constant 2 : index
    %40 = vector.load %arg9[%c0_43, %c1_44, %c2_45] : memref<8x10x10xf32, #tpu.memory_space<vmem>>, vector<8x8x8xf32>
    %41 = tpu.concatenate %38, %39, %40 in 0 : vector<8x8x8xf32>, vector<8x8x8xf32>, vector<8x8x8xf32> -> vector<24x8x8xf32>
    %42 = vector.shape_cast %41 : vector<24x8x8xf32> to vector<24x64xf32>
    %c0_46 = arith.constant 0 : index
    %c0_47 = arith.constant 0 : index
    %c0_48 = arith.constant 0 : index
    %43 = vector.load %arg6[%c0_46, %c0_47, %c0_48] : memref<1x8x64xf32, #tpu.memory_space<vmem>>, vector<1x8x64xf32>
    %44 = vector.shape_cast %43 : vector<1x8x64xf32> to vector<8x64xf32>
    %c1_49 = arith.constant 1 : index
    %c0_50 = arith.constant 0 : index
    %c0_51 = arith.constant 0 : index
    %45 = vector.load %arg4[%c1_49, %c0_50, %c0_51] : memref<3x8x24xf32, #tpu.memory_space<vmem>>, vector<1x8x24xf32>
    %46 = vector.shape_cast %45 : vector<1x8x24xf32> to vector<8x24xf32>
    %cst_52 = arith.constant dense<0.000000e+00> : vector<8x64xf32>
    %47 = tpu.matmul %46, %42, %cst_52 {dimension_numbers = #tpu.dot_dimension_numbers<[1], [0], [0], [1], [0, 0, 1, 1], [], []>} : vector<8x24xf32>, vector<24x64xf32>, vector<8x64xf32> -> vector<8x64xf32>
    %48 = arith.addf %44, %47 : vector<8x64xf32>
    %c0_53 = arith.constant 0 : index
    %c0_54 = arith.constant 0 : index
    %c0_55 = arith.constant 0 : index
    %49 = vector.load %arg6[%c0_53, %c0_54, %c0_55] : memref<1x8x64xf32, #tpu.memory_space<vmem>>, vector<1x8x64xf32>
    %50 = vector.shape_cast %49 : vector<1x8x64xf32> to vector<8x64xf32>
    %51 = vector.shape_cast %48 : vector<8x64xf32> to vector<1x8x64xf32>
    tpu.vector_store %arg6[%c0_53, %c0_54, %c0_55], %51 {strides = array<i32>} : memref<1x8x64xf32, #tpu.memory_space<vmem>>, vector<1x8x64xf32>,
    %c0_56 = arith.constant 0 : index
    %c2_57 = arith.constant 2 : index
    %c0_58 = arith.constant 0 : index
    %52 = vector.load %arg9[%c0_56, %c2_57, %c0_58] : memref<8x10x10xf32, #tpu.memory_space<vmem>>, vector<8x8x8xf32>
    %c0_59 = arith.constant 0 : index
    %c2_60 = arith.constant 2 : index
    %c1_61 = arith.constant 1 : index
    %53 = vector.load %arg9[%c0_59, %c2_60, %c1_61] : memref<8x10x10xf32, #tpu.memory_space<vmem>>, vector<8x8x8xf32>
    %c0_62 = arith.constant 0 : index
    %c2_63 = arith.constant 2 : index
    %c2_64 = arith.constant 2 : index
    %54 = vector.load %arg9[%c0_62, %c2_63, %c2_64] : memref<8x10x10xf32, #tpu.memory_space<vmem>>, vector<8x8x8xf32>
    %55 = tpu.concatenate %52, %53, %54 in 0 : vector<8x8x8xf32>, vector<8x8x8xf32>, vector<8x8x8xf32> -> vector<24x8x8xf32>
    %56 = vector.shape_cast %55 : vector<24x8x8xf32> to vector<24x64xf32>
    %c0_65 = arith.constant 0 : index
    %c0_66 = arith.constant 0 : index
    %c0_67 = arith.constant 0 : index
    %57 = vector.load %arg6[%c0_65, %c0_66, %c0_67] : memref<1x8x64xf32, #tpu.memory_space<vmem>>, vector<1x8x64xf32>
    %58 = vector.shape_cast %57 : vector<1x8x64xf32> to vector<8x64xf32>
    %c2_68 = arith.constant 2 : index
    %c0_69 = arith.constant 0 : index
    %c0_70 = arith.constant 0 : index
    %59 = vector.load %arg4[%c2_68, %c0_69, %c0_70] : memref<3x8x24xf32, #tpu.memory_space<vmem>>, vector<1x8x24xf32>
    %60 = vector.shape_cast %59 : vector<1x8x24xf32> to vector<8x24xf32>
    %cst_71 = arith.constant dense<0.000000e+00> : vector<8x64xf32>
    %61 = tpu.matmul %60, %56, %cst_71 {dimension_numbers = #tpu.dot_dimension_numbers<[1], [0], [0], [1], [0, 0, 1, 1], [], []>} : vector<8x24xf32>, vector<24x64xf32>, vector<8x64xf32> -> vector<8x64xf32>
    %62 = arith.addf %58, %61 : vector<8x64xf32>
    %c0_72 = arith.constant 0 : index
    %c0_73 = arith.constant 0 : index
    %c0_74 = arith.constant 0 : index
    %63 = vector.load %arg6[%c0_72, %c0_73, %c0_74] : memref<1x8x64xf32, #tpu.memory_space<vmem>>, vector<1x8x64xf32>
    %64 = vector.shape_cast %63 : vector<1x8x64xf32> to vector<8x64xf32>
    %65 = vector.shape_cast %62 : vector<8x64xf32> to vector<1x8x64xf32>
    tpu.vector_store %arg6[%c0_72, %c0_73, %c0_74], %65 {strides = array<i32>} : memref<1x8x64xf32, #tpu.memory_space<vmem>>, vector<1x8x64xf32>,
    %c0_75 = arith.constant 0 : index
    %c0_76 = arith.constant 0 : index
    %c0_77 = arith.constant 0 : index
    %66 = vector.load %arg6[%c0_75, %c0_76, %c0_77] : memref<1x8x64xf32, #tpu.memory_space<vmem>>, vector<1x8x64xf32>
    %67 = vector.shape_cast %66 : vector<1x8x64xf32> to vector<8x64xf32>
    %cst_78 = arith.constant dense<0.000000e+00> : vector<8xf32>
    %68 = vector.multi_reduction <add>, %67, %cst_78 [1] : vector<8x64xf32> to vector<8xf32>
    %69 = vector.shape_cast %68 : vector<8xf32> to vector<8x1xf32>
    %cst_79 = arith.constant 1.562500e-02 : f32
    %70 = vector.broadcast %cst_79 : f32 to vector<8x1xf32>
    %71 = arith.mulf %69, %70 : vector<8x1xf32>
    %72 = vector.broadcast %71 : vector<8x1xf32> to vector<8x64xf32>
    %73 = arith.subf %67, %72 : vector<8x64xf32>
    %c0_80 = arith.constant 0 : index
    %c0_81 = arith.constant 0 : index
    %c0_82 = arith.constant 0 : index
    %74 = vector.load %arg7[%c0_80, %c0_81, %c0_82] : memref<1x8x1xf32, #tpu.memory_space<vmem>>, vector<1x8x1xf32>
    %75 = vector.shape_cast %74 : vector<1x8x1xf32> to vector<8x1xf32>
    %76 = vector.shape_cast %69 : vector<8x1xf32> to vector<1x8x1xf32>
    tpu.vector_store %arg7[%c0_80, %c0_81, %c0_82], %76 {strides = array<i32>} : memref<1x8x1xf32, #tpu.memory_space<vmem>>, vector<1x8x1xf32>,
    %77 = arith.mulf %73, %73 : vector<8x64xf32>
    %cst_83 = arith.constant dense<0.000000e+00> : vector<8xf32>
    %78 = vector.multi_reduction <add>, %77, %cst_83 [1] : vector<8x64xf32> to vector<8xf32>
    %79 = vector.shape_cast %78 : vector<8xf32> to vector<8x1xf32>
    %c0_84 = arith.constant 0 : index
    %c0_85 = arith.constant 0 : index
    %c0_86 = arith.constant 0 : index
    %80 = vector.load %arg8[%c0_84, %c0_85, %c0_86] : memref<1x8x1xf32, #tpu.memory_space<vmem>>, vector<1x8x1xf32>
    %81 = vector.shape_cast %80 : vector<1x8x1xf32> to vector<8x1xf32>
    %82 = vector.shape_cast %79 : vector<8x1xf32> to vector<1x8x1xf32>
    tpu.vector_store %arg8[%c0_84, %c0_85, %c0_86], %82 {strides = array<i32>} : memref<1x8x1xf32, #tpu.memory_space<vmem>>, vector<1x8x1xf32>,
    return
  }
  func.func @transform_0(%arg0: i32) -> (i32, i32, i32, i32) {
    %c0_i32 = arith.constant 0 : i32
    %c0_i32_0 = arith.constant 0 : i32
    %c0_i32_1 = arith.constant 0 : i32
    %c0_i32_2 = arith.constant 0 : i32
    return %arg0, %c0_i32, %c0_i32_0, %c0_i32_1 : i32, i32, i32, i32
  }
  func.func @transform_1(%arg0: i32) -> (i32, i32) {
    %c0_i32 = arith.constant 0 : i32
    %c0_i32_0 = arith.constant 0 : i32
    %c0_i32_1 = arith.constant 0 : i32
    return %c0_i32, %c0_i32_0 : i32, i32
  }
  func.func @transform_2(%arg0: i32) -> (i32, i32) {
    %c0_i32 = arith.constant 0 : i32
    %c0_i32_0 = arith.constant 0 : i32
    %c0_i32_1 = arith.constant 0 : i32
    return %c0_i32, %c0_i32_0 : i32, i32
  }
  func.func @transform_3(%arg0: i32) -> (i32, i32, i32) {
    %c0_i32 = arith.constant 0 : i32
    %c0_i32_0 = arith.constant 0 : i32
    %c0_i32_1 = arith.constant 0 : i32
    %c0_i32_2 = arith.constant 0 : i32
    return %c0_i32, %c0_i32_0, %c0_i32_1 : i32, i32, i32
  }
  func.func @transform_4(%arg0: i32) -> (i32, i32) {
    %c0_i32 = arith.constant 0 : i32
    %c0_i32_0 = arith.constant 0 : i32
    %c0_i32_1 = arith.constant 0 : i32
    return %c0_i32, %c0_i32_0 : i32, i32
  }
  func.func @transform_5(%arg0: i32) -> (i32, i32, i32) {
    %c0_i32 = arith.constant 0 : i32
    %c0_i32_0 = arith.constant 0 : i32
    %c0_i32_1 = arith.constant 0 : i32
    return %arg0, %c0_i32, %c0_i32_0 : i32, i32, i32
  }
  func.func @transform_6(%arg0: i32) -> (i32, i32, i32) {
    %c0_i32 = arith.constant 0 : i32
    %c0_i32_0 = arith.constant 0 : i32
    %c0_i32_1 = arith.constant 0 : i32
    return %arg0, %c0_i32, %c0_i32_0 : i32, i32, i32
  }
  func.func @transform_7(%arg0: i32) -> (i32, i32, i32) {
    %c0_i32 = arith.constant 0 : i32
    %c0_i32_0 = arith.constant 0 : i32
    %c0_i32_1 = arith.constant 0 : i32
    return %arg0, %c0_i32, %c0_i32_0 : i32, i32, i32
  }
}

module attributes {stable_mosaic.version = 11 : i64} {
  func.func @_bn2_act_kernel(%arg0: i32, %arg1: memref<1x8x64xf32, #tpu.memory_space<vmem>>, %arg2: memref<8x1xf32, #tpu.memory_space<vmem>>, %arg3: memref<8x1xf32, #tpu.memory_space<vmem>>, %arg4: memref<1x8x64xf32, #tpu.memory_space<vmem>>) attributes {dimension_semantics = [#tpu.dimension_semantics<parallel>], iteration_bounds = array<i64: 2>, scalar_prefetch = 0 : i64, scratch_operands = 0 : i64, tpu.core_type = #tpu.core_type<tc>, window_params = [{transform_indices = @transform_0, window_bounds = array<i64: 1, 8, 64>}, {pipeline_mode = #tpu.pipeline_mode<synchronous>, transform_indices = @transform_1, window_bounds = array<i64: 8, 1>}, {pipeline_mode = #tpu.pipeline_mode<synchronous>, transform_indices = @transform_2, window_bounds = array<i64: 8, 1>}, {transform_indices = @transform_3, window_bounds = array<i64: 1, 8, 64>}]} {
    %c0 = arith.constant 0 : index
    %c0_0 = arith.constant 0 : index
    %c0_1 = arith.constant 0 : index
    %0 = vector.load %arg1[%c0, %c0_0, %c0_1] : memref<1x8x64xf32, #tpu.memory_space<vmem>>, vector<1x8x64xf32>
    %1 = vector.shape_cast %0 : vector<1x8x64xf32> to vector<8x64xf32>
    %c0_2 = arith.constant 0 : index
    %c0_3 = arith.constant 0 : index
    %2 = vector.load %arg2[%c0_2, %c0_3] : memref<8x1xf32, #tpu.memory_space<vmem>>, vector<8x1xf32>
    %3 = vector.broadcast %2 : vector<8x1xf32> to vector<8x64xf32>
    %4 = arith.mulf %1, %3 : vector<8x64xf32>
    %c0_4 = arith.constant 0 : index
    %c0_5 = arith.constant 0 : index
    %5 = vector.load %arg3[%c0_4, %c0_5] : memref<8x1xf32, #tpu.memory_space<vmem>>, vector<8x1xf32>
    %6 = vector.broadcast %5 : vector<8x1xf32> to vector<8x64xf32>
    %7 = arith.addf %4, %6 : vector<8x64xf32>
    %cst = arith.constant 0.000000e+00 : f32
    %8 = vector.broadcast %cst : f32 to vector<8x64xf32>
    %9 = arith.cmpf oge, %7, %8 : vector<8x64xf32>
    %cst_6 = arith.constant 1.000000e-01 : f32
    %10 = vector.broadcast %cst_6 : f32 to vector<8x64xf32>
    %11 = arith.mulf %10, %7 : vector<8x64xf32>
    %12 = arith.select %9, %7, %11 : vector<8x64xi1>, vector<8x64xf32>
    %c0_7 = arith.constant 0 : index
    %c0_8 = arith.constant 0 : index
    %c0_9 = arith.constant 0 : index
    %13 = vector.load %arg4[%c0_7, %c0_8, %c0_9] : memref<1x8x64xf32, #tpu.memory_space<vmem>>, vector<1x8x64xf32>
    %14 = vector.shape_cast %13 : vector<1x8x64xf32> to vector<8x64xf32>
    %15 = vector.shape_cast %12 : vector<8x64xf32> to vector<1x8x64xf32>
    tpu.vector_store %arg4[%c0_7, %c0_8, %c0_9], %15 {strides = array<i32>} : memref<1x8x64xf32, #tpu.memory_space<vmem>>, vector<1x8x64xf32>,
    return
  }
  func.func @transform_0(%arg0: i32) -> (i32, i32, i32) {
    %c0_i32 = arith.constant 0 : i32
    %c0_i32_0 = arith.constant 0 : i32
    %c0_i32_1 = arith.constant 0 : i32
    return %arg0, %c0_i32, %c0_i32_0 : i32, i32, i32
  }
  func.func @transform_1(%arg0: i32) -> (i32, i32) {
    %c0_i32 = arith.constant 0 : i32
    %c0_i32_0 = arith.constant 0 : i32
    %c0_i32_1 = arith.constant 0 : i32
    return %c0_i32, %c0_i32_0 : i32, i32
  }
  func.func @transform_2(%arg0: i32) -> (i32, i32) {
    %c0_i32 = arith.constant 0 : i32
    %c0_i32_0 = arith.constant 0 : i32
    %c0_i32_1 = arith.constant 0 : i32
    return %c0_i32, %c0_i32_0 : i32, i32
  }
  func.func @transform_3(%arg0: i32) -> (i32, i32, i32) {
    %c0_i32 = arith.constant 0 : i32
    %c0_i32_0 = arith.constant 0 : i32
    %c0_i32_1 = arith.constant 0 : i32
    return %arg0, %c0_i32, %c0_i32_0 : i32, i32, i32
  }
}

</mosaic_0001>

<bundles_post_ra>
// kernel: down_forward.3
= control target key start
LH: loop header
LB: loop body
LE: loop exit
PB: predicated region body
PF: predicated region fallthrough
CT: control target
= control target key end

     0   :  { %s2137_s15 = smov 0   ;;  %s3217_s0 = inlined_call_operand.vmem [shape: f32[2,16,9,9], index: 0, kind: input, shape index: {}]   ;;  %s3218_s1 = inlined_call_operand.vmem [shape: f32[2,2,8,16], index: 1, kind: input, shape index: {}]   ;;  %s3219_s2 = inlined_call_operand.vmem [shape: f32[2,8,64], index: 2, kind: output, shape index: {0}]   ;;  %s3220_s3 = inlined_call_operand.vmem [shape: f32[2,8,1], index: 3, kind: output, shape index: {1}]   ;;  %s3221_s4 = inlined_call_operand.vmem [shape: f32[2,8,1], index: 4, kind: output, shape index: {2}]  }
   0x1 LB: > { %s1834_s16 = sadd.s32 4294967295, %s2099_s15   ;;  %p1838_p0 = scmp.ge.s32.totalorder %s2099_s15, 1  ;;  %s2099_s15 = sphi %s2137_s15, %s15_s15  }
   0x2   : > { %p167_p1 = scmp.lt.s32.totalorder %s2099_s15, 3 }
   0x4   : > { %p168_p2 = pnand %p1838_p0, %p167_p1 }
   0x5   : > { %p200_p3 = scmp.lt.s32.totalorder (!%p168_p2), %s1834_s16, 1  ;;  %s2101_s21 = smov (!%p168_p2), 127  }
   0x6   : > { %171 = sbr.rel (%p168_p2) target bundleno = 726 (0x2d6), region = 28  ;;  %s2104_s22 = smov (!%p168_p2), 8  }
   0x7   : > { %s2105_s23 = smov (!%p168_p2), 24   ;;  %s2106_s24 = smov (!%p168_p2), 16  }
   0x8   : > { %s2107_s25 = smov (!%p168_p2), 32   ;;  %s2108_s26 = smov (!%p168_p2), 48  }
   0x9   : > { %s2109_s27 = smov (!%p168_p2), 56   ;;  %s2110_s28 = smov (!%p168_p2), 40  }
   0xb   : > { %s3236_s16 = smov (!%p200_p3, %s1834_s16), 1  ;;  %vm236_vm0 = vcmask 1047556   ;;  %v2102_v20 = vmov 1983009808   ;;  %v2103_v52 = vmov 1934713408  }
   0xc   : > { %s1853_s17 = sshll.u32 %s3236_s16, 8  ;;  %v241_v21 = vunpack.c.l.s4 %v2102_v20  ;;  %v289_v53 = vunpack.c.l.s4 %v2103_v52  ;;  %vm516_vm1 = vcmask 64512   ;;  %vm519_vm2 = vcmask 130048   ;;  %s3148_s7 = sshll.u32 %s3236_s16, 3 }
   0xd   : > { %s2151_s20 = scalar_lea.vmem %s3217_s0, %s1853_s17  ;;  %vm522_vm3 = vcmask 195584   ;;  %vm525_vm4 = vcmask 261120   ;;  %vm528_vm5 = vcmask 326656   ;;  %vm531_vm6 = vcmask 392192   ;;  %s3157_s10 = scalar_lea.vmem %s3219_s2, %s3148_s7 }
   0xe   : > { %v2154_v0 = vld [vmem:[%s2151_s20 + $0xb0] sm:$0xff]  ;;  %v2157_v1 = vld [vmem:[%s2151_s20 + $0xe0] sm:$0xff]  ;;  %v2227_v28 = vunpack.c.0.s8 %v241_v21  ;;  %vm534_vm7 = vcmask 457728   ;;  %vm217_vm8 = vcmask 523264   ;;  %s212_s18 = scalar_lea.vmem %s3220_s3, %s3148_s7  ;;  %vm1712_vm9 = vcmask 7168  }
   0xf   : > { %v2160_v2 = vld [vmem:[%s2151_s20 + $0xa0] sm:$0xff]  ;;  %v1873_v3 = vpack.i.bf16 %v2157_v1, %v2154_v0  ;;  %v2165_v4 = vld [vmem:[%s2151_s20 + $0xf0] sm:$0xff]  ;;  %v360_v33 = vrot.slane %v2154_v0, 4  ;;  %v372_v43 = vrot.slane %v2157_v1, 4 }
  0x10   : > { %v1883_v5 = vpack.i.bf16 %v2165_v4, %v2160_v2  ;;  %v2170_v6 = vld [vmem:[%s2151_s20 + $0x10] sm:$0xff]  ;;  %v2186_v11 = vld [vmem:[%s2151_s20 + $0x60] sm:$0xff]  ;;  %v348_v32 = vrot.slane %v2160_v2, 4  ;;  %v384_v44 = vrot.slane %v2165_v4, 4 }
  0x11   : > { %1874 = vrot.lane.b32.xlu0 %v1873_v3, %s2101_s21  ;;  %v2174_v7 = vld [vmem:[%s2151_s20 + $0xd0] sm:$0xff]  ;;  %v2189_v12 = vld [vmem:[%s2151_s20 + $0xc0] sm:$0xff]  ;;  %v260_v35 = vrot.slane %v2186_v11, 4 }
  0x12   : > { %1884 = vrot.lane.b32.xlu1 %v1883_v5, %s2101_s21  ;;  %v2178_v8 = vld [vmem:[%s2151_s20 + $0x30] sm:$0xff]  ;;  %v1893_v10 = vpack.i.bf16 %v2170_v6, %v2174_v7  ;;  %v2195_v14 = vld [vmem:[%s2151_s20 + $0x20] sm:$0xff]  ;;  %v1888_v16 = vpack.i.bf16 %v2189_v12, %v2186_v11  ;;  %v385_v54 = vsel %vm236_vm0, %v384_v44, %v2174_v7  ;;  %v373_v62 = vsel %vm236_vm0, %v372_v43, %v2189_v12 }
  0x13   : > { %v2181_v9 = vld [vmem:[%s2151_s20 + $0x90] sm:$0xff]  ;;  %v2207_v18 = vld [vmem:[%s2151_s20 + $0x40] sm:$0xff]  ;;  %v248_v22 = vrot.slane %v2178_v8, 4  ;;  %v235_v25 = vrot.slane %v2195_v14, 4  ;;  %v2291_v59 = vperm.slane %v385_v54, %v2227_v28 }
  0x14   : > { %1894 = vrot.lane.b32.xlu2 %v1893_v10, %s2101_s21  ;;  %v1878_v13 = vpack.i.bf16 %v2181_v9, %v2178_v8  ;;  %v2198_v15 = vld [vmem:[%s2151_s20 + $0x70] sm:$0xff]  ;;  %v2210_v19 = vld [vmem:[%s2151_s20 + $0x80] sm:$0xff]  ;;  %v361_v38 = vsel %vm236_vm0, %v360_v33, %v2181_v9  ;;  %v261_v47 = vsel %vm236_vm0, %v260_v35, %v2207_v18  ;;  %v2303_v10 = vunpack.c.0.s8 %v289_v53 }
  0x15   : > { %v1898_v17 = vpack.i.bf16 %v2198_v15, %v2195_v14  ;;  %v2214_v23 = vld [vmem:[%s2151_s20] sm:$0xff]  ;;  %v2217_v24 = vld [vmem:[%s2151_s20 + $0x50] sm:$0xff]  ;;  %v272_v29 = vrot.slane %v2198_v15, 4  ;;  %v1903_v30 = vpack.i.bf16 %v2207_v18, %v2210_v19  ;;  %v249_v31 = vsel %vm236_vm0, %v248_v22, %v2170_v6 }
  0x16   : > { %v2222_v26 = vld [vmem:[%s2151_s20 + $0xb1] sm:$0xff]  ;;  %v2225_v27 = vld [vmem:[%s2151_s20 + $0xe1] sm:$0xff]  ;;  %v1908_v34 = vpack.i.bf16 %v2214_v23, %v2217_v24  ;;  %v237_v37 = vsel %vm236_vm0, %v235_v25, %v2214_v23  ;;  %v2246_v39 = vperm.slane %v249_v31, %v2227_v28  ;;  %v2251_v41 = vperm.slane %v361_v38, %v2227_v28 }
  0x17   : > { %v1913_v36 = vpack.i.bf16 %v2225_v27, %v2222_v26  ;;  %v273_v40 = vsel %vm236_vm0, %v272_v29, %v2217_v24  ;;  %v349_v42 = vsel %vm236_vm0, %v348_v32, %v2210_v19  ;;  %v2260_v45 = vld [vmem:[%s2151_s20 + $0x31] sm:$0xff]  ;;  %v2268_v48 = vld [vmem:[%s2151_s20 + $0xa1] sm:$0xff]  ;;  %v2274_v50 = vperm.slane %v237_v37, %v2227_v28 }
  0x18   : > { %v2263_v46 = vld [vmem:[%s2151_s20 + $0x91] sm:$0xff]  ;;  %v2277_v51 = vperm.slane %v273_v40, %v2227_v28  ;;  %v2283_v55 = vld [vmem:[%s2151_s20 + $0x61] sm:$0xff]  ;;  %v284_v57 = vrot.slane %v2246_v39, 4  ;;  %v355_v58 = vperm.slane %v349_v42, %v2227_v28  ;;  %v396_v60 = vrot.slane %v2251_v41, 4 }
  0x19   : > { %1879 = vrot.lane.b32.xlu0 %v1878_v13, %s2101_s21  ;;  %v2271_v49 = vld [vmem:[%s2151_s20 + $0xf1] sm:$0xff]  ;;  %v2286_v56 = vld [vmem:[%s2151_s20 + $0xc1] sm:$0xff]  ;;  %v1918_v61 = vpack.i.bf16 %v2263_v46, %v2260_v45  ;;  %v267_v5 = vperm.slane %v261_v47, %v2227_v28  ;;  %v420_v21 = vrot.slane %v2291_v59, 4 }
  0x1a   : > { %1889 = vrot.lane.b32.xlu1 %v1888_v16, %s2101_s21  ;;  %v1923_v63 = vpack.i.bf16 %v2271_v49, %v2268_v48  ;;  %v1928_v3 = vpack.i.bf16 %v2286_v56, %v2283_v55  ;;  %v308_v13 = vrot.slane %v2277_v51, 4  ;;  %v285_v16 = vsel %vm236_vm0, %v284_v57, %v2274_v50  ;;  %v2314_v22 = vld [vmem:[%s2151_s20 + $0x11] sm:$0xff]  ;;  %v2320_v29 = vld [vmem:[%s2151_s20 + $0x21] sm:$0xff] }
  0x1b   : > { %v397_v20 = vsel %vm236_vm0, %v396_v60, %v355_v58  ;;  %v2317_v25 = vld [vmem:[%s2151_s20 + $0xd1] sm:$0xff]  ;;  %v2326_v31 = vperm.slane %v285_v16, %v2303_v10  ;;  %v2340_v37 = vld [vmem:[%s2151_s20 + $0x81] sm:$0xff]  ;;  %v286_v16 = vrot.slane %v2274_v50, 4 }
  0x1c   : > { %1899 = vrot.lane.b32.xlu2 %v1898_v17, %s2101_s21  ;;  %v379_v17 = vperm.slane %v373_v62, %v2227_v28  ;;  %v2329_v32 = vperm.slane %v397_v20, %v2303_v10  ;;  %v309_v33 = vsel %vm236_vm0, %v308_v13, %v267_v5  ;;  %v1933_v35 = vpack.i.bf16 %v2314_v22, %v2317_v25  ;;  %v2357_v52 = vld [vmem:[%s2151_s20 + $0x1] sm:$0xff]  ;;  %v2360_v53 = vld [vmem:[%s2151_s20 + $0x51] sm:$0xff] }
  0x1d   : > { %v2345_v40 = vperm.slane %v309_v33, %v2303_v10  ;;  %v334_v42 = vrot.slane %v2326_v31, 4  ;;  %v1948_v60 = vpack.i.bf16 %v2357_v52, %v2360_v53  ;;  %v262_v62 = vrot.slane %v2207_v18, 4 }
  0x1e   : > { %v446_v44 = vrot.slane %v2329_v32, 4  ;;  %v386_v13 = vrot.slane %v2174_v7, 4  ;;  %v398_v20 = vrot.slane %v355_v58, 4  ;;  %v422_v33 = vrot.slane %v379_v17, 4 }
  0x1f   : > { %v335_v54 = vsel %vm236_vm0, %v2345_v40, %v334_v42 }
  0x20   : > { %v399_v18 = vsel %vm236_vm0, %v2251_v41, %v398_v20 }
  0x21   : > { %1904 = vrot.lane.b32.xlu0 %v1903_v30, %s2101_s21  ;;  %v2323_v30 = vld [vmem:[%s2151_s20 + $0x71] sm:$0xff] }
  0x22   : > { %1909 = vrot.lane.b32.xlu1 %v1908_v34, %s2101_s21  ;;  %v421_v34 = vsel %vm236_vm0, %v420_v21, %v379_v17  ;;  %v1938_v38 = vpack.i.bf16 %v2323_v30, %v2320_v29  ;;  %v310_v21 = vrot.slane %v267_v5, 4 }
  0x23   : > { %v2349_v43 = vperm.slane %v421_v34, %v2303_v10  ;;  %v238_v34 = vrot.slane %v2214_v23, 4  ;;  %v2390_v23 = vperm.slane %v399_v18, %v2303_v10 }
  0x24   : > { %1914 = vrot.lane.b32.xlu2 %v1913_v36, %s2101_s21  ;;  %v2337_v36 = vld [vmem:[%s2151_s20 + $0x41] sm:$0xff]  ;;  %v311_v50 = vsel %vm236_vm0, %v2277_v51, %v310_v21 }
  0x25   : > { %v1943_v47 = vpack.i.bf16 %v2337_v36, %v2340_v37  ;;  %v447_v57 = vsel %vm236_vm0, %v2349_v43, %v446_v44  ;;  %v450_v5 = vrot.slane %v2390_v23, 4  ;;  %v350_v44 = vrot.slane %v2210_v19, 4 }
  0x29   : > { %1919 = vrot.lane.b32.xlu0 %v1918_v61, %s2101_s21  ;;  %v1953_v61 = vpack.i.bf16 %v335_v54, %v447_v57 }
  0x2a   : > { %1924 = vrot.lane.b32.xlu1 %v1923_v63, %s2101_s21  ;;  %v274_v63 = vrot.slane %v2217_v24, 4 }
  0x2c   : > { %1929 = vrot.lane.b32.xlu2 %v1928_v3, %s2101_s21  ;;  %v374_v3 = vrot.slane %v2189_v12, 4  ;;  %v263_v12 = vsel %vm236_vm0, %v2186_v11, %v262_v62  ;;  %v275_v7 = vsel %vm236_vm0, %v2198_v15, %v274_v63  ;;  %v239_v11 = vsel %vm236_vm0, %v2195_v14, %v238_v34 }
  0x2d   : > { %v247_v51 = vperm.slane %v239_v11, %v2227_v28  ;;  %v271_v42 = vperm.slane %v263_v12, %v2227_v28  ;;  %v351_v62 = vsel %vm236_vm0, %v2160_v2, %v350_v44  ;;  %v387_v2 = vsel %vm236_vm0, %v2165_v4, %v386_v13 }
  0x2e   : > { %v375_v57 = vsel %vm236_vm0, %v2157_v1, %v374_v3 }
  0x2f   : > { %v383_v20 = vperm.slane %v375_v57, %v2227_v28 }
  0x31   : > { %1934 = vrot.lane.b32.xlu0 %v1933_v35, %s2101_s21  ;;  %v250_v35 = vrot.slane %v2170_v6, 4  ;;  %v423_v6 = vsel %vm236_vm0, %v2291_v59, %v422_v33  ;;  %v283_v59 = vperm.slane %v275_v7, %v2227_v28  ;;  %v395_v33 = vperm.slane %v387_v2, %v2227_v28 }
  0x32   : > { %1939 = vrot.lane.b32.xlu1 %v1938_v38, %s2101_s21  ;;  %v287_v38 = vsel %vm236_vm0, %v2246_v39, %v286_v16  ;;  %v319_v39 = vperm.slane %v311_v50, %v2303_v10  ;;  %v431_v41 = vperm.slane %v423_v6, %v2303_v10  ;;  %v434_v12 = vrot.slane %v383_v20, 4 }
  0x33   : > { %v295_v24 = vperm.slane %v287_v38, %v2303_v10  ;;  %v251_v15 = vsel %vm236_vm0, %v2178_v8, %v250_v35  ;;  %v322_v35 = vrot.slane %v271_v42, 4  ;;  %v432_v11 = vrot.slane %v395_v33, 4 }
  0x34   : > { %1944 = vrot.lane.b32.xlu2 %v1943_v47, %s2101_s21  ;;  %v259_v17 = vperm.slane %v251_v15, %v2227_v28  ;;  %v362_v47 = vrot.slane %v2181_v9, 4  ;;  %v451_v54 = vsel %vm236_vm0, %v431_v41, %v450_v5  ;;  %v359_v9 = vperm.slane %v351_v62, %v2227_v28 }
  0x35   : > { %v338_v58 = vrot.slane %v295_v24, 4  ;;  %v336_v7 = vrot.slane %v319_v39, 4  ;;  %v323_v15 = vsel %vm236_vm0, %v283_v59, %v322_v35  ;;  %v435_v5 = vsel %vm236_vm0, %v395_v33, %v434_v12 }
  0x36   : > { %v296_v8 = vrot.slane %v259_v17, 4  ;;  %v363_v63 = vsel %vm236_vm0, %v2154_v0, %v362_v47  ;;  %v298_v0 = vrot.slane %v247_v51, 4  ;;  %v410_v18 = vrot.slane %v359_v9, 4 }
  0x37   : > { %v339_v14 = vsel %vm236_vm0, %v319_v39, %v338_v58  ;;  %v371_v16 = vperm.slane %v363_v63, %v2227_v28  ;;  %v433_v39 = vsel %vm236_vm0, %v432_v11, %v383_v20  ;;  %v443_v47 = vperm.slane %v435_v5, %v2303_v10 }
  0x38   : > { %v297_v19 = vsel %vm236_vm0, %v296_v8, %v247_v51  ;;  %v299_v38 = vsel %vm236_vm0, %v259_v17, %v298_v0  ;;  %v331_v17 = vperm.slane %v323_v15, %v2303_v10  ;;  %v2446_v44 = vperm.slane %v433_v39, %v2303_v10 }
  0x39   : > { %1949 = vrot.lane.b32.xlu0 %v1948_v60, %s2101_s21  ;;  %v1963_v60 = vpack.i.bf16 %v339_v14, %v451_v54  ;;  %v2421_v1 = vperm.slane %v297_v19, %v2303_v10  ;;  %v408_v34 = vrot.slane %v371_v16, 4  ;;  %v307_v4 = vperm.slane %v299_v38, %v2303_v10  ;;  %s216_s21 = scalar_lea.vmem %s3221_s4, %s3148_s7 }
  0x3a   : > { %1954 = vrot.lane.b32.xlu1 %v1953_v61, %s2104_s22  ;;  %v320_v61 = vrot.slane %v283_v59, 4  ;;  %v411_v58 = vsel %vm236_vm0, %v371_v16, %v410_v18  ;;  %v337_v59 = vsel %vm236_vm0, %v336_v7, %v295_v24  ;;  %v448_v14 = vrot.slane %v431_v41, 4 }
  0x3b   : > { %v409_v6 = vsel %vm236_vm0, %v408_v34, %v359_v9  ;;  %v344_v54 = vrot.slane %v331_v17, 4  ;;  %v346_v8 = vrot.slane %v307_v4, 4  ;;  %v456_v62 = vrot.slane %v443_v47, 4 }
  0x3c   : > { %v321_v3 = vsel %vm236_vm0, %v320_v61, %v271_v42  ;;  %v2435_v13 = vperm.slane %v409_v6, %v2303_v10  ;;  %v419_v42 = vperm.slane %v411_v58, %v2303_v10  ;;  %v452_v61 = vrot.slane %v2446_v44, 4 }
  0x3d   : > { %v2427_v21 = vperm.slane %v321_v3, %v2303_v10  ;;  %v449_v63 = vsel %vm236_vm0, %v448_v14, %v2390_v23  ;;  %v994_v19 = vrot.slane %v2260_v45, 4  ;;  %v345_v9 = vsel %vm236_vm0, %v344_v54, %v307_v4 }
  0x3e   : > { %v458_v57 = vrot.slane %v419_v42, 4  ;;  %v1958_v16 = vpack.i.bf16 %v337_v59, %v449_v63  ;;  %v347_v20 = vsel %vm236_vm0, %v331_v17, %v346_v8  ;;  %v453_v41 = vsel %vm236_vm0, %v452_v61, %v2435_v13 }
  0x3f   : > { %v340_v50 = vrot.slane %v2427_v21, 4  ;;  %v457_v3 = vsel %vm236_vm0, %v456_v62, %v419_v42  ;;  %v995_v35 = vsel %vm236_vm0, %v994_v19, %v2314_v22  ;;  %v1006_v18 = vrot.slane %v2283_v55, 4 }
  0x40   : > { %v459_v24 = vsel %vm236_vm0, %v443_v47, %v458_v57  ;;  %v1978_v23 = vpack.i.bf16 %v345_v9, %v457_v3  ;;  %1959 = vrot.lane.b32.xlu2 %v1958_v16, %s2106_s24  ;;  %v1001_v38 = vperm.slane %v995_v35, %v2227_v28  ;;  %v1018_v12 = vrot.slane %v2323_v30, 4 }
  0x41   : > { %1964 = vrot.lane.b32.xlu0 %v1963_v60, %s2105_s23  ;;  %v341_v51 = vsel %vm236_vm0, %v340_v50, %v2421_v1  ;;  %v982_v60 = vrot.slane %v2320_v29, 4  ;;  %v1983_v2 = vpack.i.bf16 %v347_v20, %v459_v24  ;;  %v1094_v50 = vrot.slane %v2268_v48, 4 }
  0x42   : > { %v1968_v33 = vpack.i.bf16 %v341_v51, %v453_v41  ;;  %v1106_v6 = vrot.slane %v2222_v26, 4  ;;  %v1007_v11 = vsel %vm236_vm0, %v1006_v18, %v2337_v36  ;;  %v1019_v4 = vsel %vm236_vm0, %v1018_v12, %v2360_v53 }
  0x43   : > { %v983_v0 = vsel %vm236_vm0, %v982_v60, %v2357_v52  ;;  %v1118_v15 = vrot.slane %v2225_v27, 4  ;;  %v1013_v58 = vperm.slane %v1007_v11, %v2227_v28  ;;  %v1025_v5 = vperm.slane %v1019_v4, %v2227_v28 }
  0x44   : > { %v989_v34 = vperm.slane %v983_v0, %v2227_v28  ;;  %1969 = vrot.lane.b32.xlu1 %v1968_v33, %s2107_s25  ;;  %v1095_v39 = vsel %vm236_vm0, %v1094_v50, %v2340_v37  ;;  %v1107_v42 = vsel %vm236_vm0, %v1106_v6, %v2263_v46  ;;  %v1130_v8 = vrot.slane %v2271_v49, 4 }
  0x45   : > { %v1101_v17 = vperm.slane %v1095_v39, %v2227_v28  ;;  %v1119_v47 = vsel %vm236_vm0, %v1118_v15, %v2286_v56  ;;  %v1056_v59 = vrot.slane %v1013_v58, 4  ;;  %v1113_v14 = vperm.slane %v1107_v42, %v2227_v28 }
  0x46   : > { %v1032_v7 = vrot.slane %v989_v34, 4  ;;  %v1125_v54 = vperm.slane %v1119_v47, %v2227_v28  ;;  %v342_v61 = vrot.slane %v2421_v1, 4  ;;  %v454_v62 = vrot.slane %v2435_v13, 4 }
  0x47   : > { %v1144_v60 = vrot.slane %v1101_v17, 4  ;;  %v1057_v63 = vsel %vm236_vm0, %v1025_v5, %v1056_v59  ;;  %v1131_v19 = vsel %vm236_vm0, %v1130_v8, %v2317_v25  ;;  %v1030_v16 = vrot.slane %v1001_v38, 4 }
  0x48   : > { %v1033_v51 = vsel %vm236_vm0, %v1001_v38, %v1032_v7  ;;  %v1168_v9 = vrot.slane %v1125_v54, 4  ;;  %v2503_v24 = vperm.slane %v1057_v63, %v2303_v10  ;;  %v1137_v41 = vperm.slane %v1131_v19, %v2227_v28 }
  0x49   : > { %1979 = vrot.lane.b32.xlu0 %v1978_v23, %s2108_s26  ;;  %v2493_v57 = vperm.slane %v1033_v51, %v2303_v10  ;;  %v1145_v3 = vsel %vm236_vm0, %v1113_v14, %v1144_v60  ;;  %v343_v1 = vsel %vm236_vm0, %v2427_v21, %v342_v61  ;;  %v996_v13 = vrot.slane %v2314_v22, 4 }
  0x4a   : > { %v1020_v0 = vrot.slane %v2360_v53, 4  ;;  %v455_v33 = vsel %vm236_vm0, %v2446_v44, %v454_v62  ;;  %v1082_v23 = vrot.slane %v2503_v24, 4  ;;  %v1169_v35 = vsel %vm236_vm0, %v1137_v41, %v1168_v9 }
  0x4b   : > { %v1973_v38 = vpack.i.bf16 %v343_v1, %v455_v33  ;;  %v1031_v18 = vsel %vm236_vm0, %v1030_v16, %v989_v34  ;;  %v1108_v12 = vrot.slane %v2263_v46, 4  ;;  %v2519_v21 = vperm.slane %v1145_v3, %v2303_v10 }
  0x4c   : > { %1984 = vrot.lane.b32.xlu1 %v1983_v2, %s2109_s27  ;;  %v2522_v2 = vperm.slane %v1169_v35, %v2303_v10  ;;  %v2525_v22 = vperm.slane %v1031_v18, %v2303_v10  ;;  %v1083_v53 = vsel %vm236_vm0, %v1082_v23, %v2493_v57  ;;  %v1054_v44 = vrot.slane %v1025_v5, 4 }
  0x4d   : > { %1974 = vrot.lane.b32.xlu2 %v1973_v38, %s2110_s28  ;;  %v1142_v7 = vrot.slane %v1113_v14, 4  ;;  %v1166_v34 = vrot.slane %v1137_v41, 4  ;;  %v984_v6 = vrot.slane %v2357_v52, 4  ;;  %v997_v11 = vsel %vm236_vm0, %v2260_v45, %v996_v13 }
  0x4e   : > { %v1194_v46 = vrot.slane %v2522_v2, 4  ;;  %v1080_v50 = vrot.slane %v2525_v22, 4  ;;  %v1055_v4 = vsel %vm236_vm0, %v1054_v44, %v1013_v58  ;;  %v2539_v39 = vperm.slane %v997_v11, %v2227_v28 }
  0x4f   : > { %v1143_v15 = vsel %vm236_vm0, %v1142_v7, %v1101_v17  ;;  %v1167_v51 = vsel %vm236_vm0, %v1166_v34, %v1125_v54  ;;  %v2544_v42 = vperm.slane %v1055_v4, %v2303_v10  ;;  %v985_v47 = vsel %vm236_vm0, %v2320_v29, %v984_v6 }
  0x50   : > { %v1195_v5 = vsel %vm236_vm0, %v1194_v46, %v2519_v21  ;;  %v2547_v52 = vperm.slane %v1143_v15, %v2303_v10  ;;  %v2550_v45 = vperm.slane %v1167_v51, %v2303_v10  ;;  %v1008_v59 = vrot.slane %v2337_v36, 4 }
  0x51   : > { %v1993_v17 = vpack.i.bf16 %v1083_v53, %v1195_v5  ;;  %v1021_v14 = vsel %vm236_vm0, %v2323_v30, %v1020_v0  ;;  %v1132_v54 = vrot.slane %v2317_v25, 4  ;;  %v1081_v8 = vsel %vm236_vm0, %v2544_v42, %v1080_v50 }
  0x52   : > { %v1192_v60 = vrot.slane %v2547_v52, 4  ;;  %v2565_v61 = vperm.slane %v985_v47, %v2227_v28  ;;  %v1009_v29 = vsel %vm236_vm0, %v2283_v55, %v1008_v59  ;;  %v2575_v25 = vperm.slane %v1021_v14, %v2227_v28 }
  0x53   : > { %1994 = vrot.lane.b32.xlu0 %v1993_v17, %s2106_s24  ;;  %v2572_v30 = vperm.slane %v1009_v29, %v2227_v28  ;;  %v1042_v19 = vrot.slane %v2539_v39, 4  ;;  %v1096_v9 = vrot.slane %v2340_v37, 4  ;;  %v1109_v55 = vsel %vm236_vm0, %v2222_v26, %v1108_v12 }
  0x54   : > { %v1193_v63 = vsel %vm236_vm0, %v2550_v45, %v1192_v60  ;;  %v1066_v41 = vrot.slane %v2575_v25, 4  ;;  %v2585_v3 = vperm.slane %v1109_v55, %v2227_v28  ;;  %v1120_v1 = vrot.slane %v2286_v56, 4 }
  0x55   : > { %v1988_v16 = vpack.i.bf16 %v1081_v8, %v1193_v63  ;;  %v1043_v13 = vsel %vm236_vm0, %v1042_v19, %v2565_v61  ;;  %v1097_v0 = vsel %vm236_vm0, %v2268_v48, %v1096_v9  ;;  %v1133_v37 = vsel %vm236_vm0, %v2271_v49, %v1132_v54 }
  0x56   : > { %v1084_v33 = vrot.slane %v2493_v57, 4  ;;  %v1049_v26 = vperm.slane %v1043_v13, %v2303_v10  ;;  %v1067_v23 = vsel %vm236_vm0, %v1066_v41, %v2572_v30  ;;  %v2600_v56 = vperm.slane %v1097_v0, %v2227_v28 }
  0x57   : > { %1989 = vrot.lane.b32.xlu1 %v1988_v16, %s2104_s22  ;;  %v1121_v35 = vsel %vm236_vm0, %v2225_v27, %v1120_v1  ;;  %v1073_v48 = vperm.slane %v1067_v23, %v2303_v10  ;;  %v2611_v57 = vperm.slane %v1133_v37, %v2227_v28  ;;  %v1154_v18 = vrot.slane %v2585_v3, 4 }
  0x58   : > { %v2608_v49 = vperm.slane %v1121_v35, %v2227_v28  ;;  %v1085_v44 = vsel %vm236_vm0, %v2503_v24, %v1084_v33  ;;  %v1196_v27 = vrot.slane %v2519_v21, 4  ;;  %v1088_v50 = vrot.slane %v1049_v26, 4 }
  0x59   : > { %v1155_v34 = vsel %vm236_vm0, %v1154_v18, %v2600_v56  ;;  %v1178_v46 = vrot.slane %v2611_v57, 4  ;;  %v1086_v15 = vrot.slane %v1073_v48, 4  ;;  %v1044_v29 = vrot.slane %v2565_v61, 4 }
  0x5a   : > { %v1161_v11 = vperm.slane %v1155_v34, %v2303_v10  ;;  %v1197_v4 = vsel %vm236_vm0, %v2522_v2, %v1196_v27  ;;  %v1089_v59 = vsel %vm236_vm0, %v1073_v48, %v1088_v50 }
  0x5b   : > { %v1179_v21 = vsel %vm236_vm0, %v1178_v46, %v2608_v49  ;;  %v1998_v51 = vpack.i.bf16 %v1085_v44, %v1197_v4  ;;  %v1087_v13 = vsel %vm236_vm0, %v1086_v15, %v1049_v26  ;;  %v1045_v26 = vsel %vm236_vm0, %v2539_v39, %v1044_v29 }
  0x5c   : > { %v1185_v47 = vperm.slane %v1179_v21, %v2303_v10  ;;  %v1200_v14 = vrot.slane %v1161_v11, 4  ;;  %v1068_v46 = vrot.slane %v2572_v30, 4  ;;  %v1156_v15 = vrot.slane %v2600_v56, 4 }
  0x5d   : > { %1999 = vrot.lane.b32.xlu2 %v1998_v51, %s2105_s23 }
  0x5e   : > { %v1198_v9 = vrot.slane %v1185_v47, 4  ;;  %v1201_v55 = vsel %vm236_vm0, %v1185_v47, %v1200_v14 }
  0x5f   : > { %v2008_v0 = vpack.i.bf16 %v1089_v59, %v1201_v55 }
  0x60   : > { %v1199_v18 = vsel %vm236_vm0, %v1198_v9, %v1161_v11  ;;  %v1180_v11 = vrot.slane %v2608_v49, 4 }
  0x61   : > { %2009 = vrot.lane.b32.xlu1 %v2008_v0, %s2110_s28  ;;  %v2003_v34 = vpack.i.bf16 %v1087_v13, %v1199_v18  ;;  %v1069_v18 = vsel %vm236_vm0, %v2575_v25, %v1068_v46  ;;  %v1157_v25 = vsel %vm236_vm0, %v2585_v3, %v1156_v15 }
  0x62   : > { %v1077_v3 = vperm.slane %v1069_v18, %v2303_v10 }
  0x63   : > { %2004 = vrot.lane.b32.xlu0 %v2003_v34, %s2107_s25 }
  0x6e   : > { %v2500_v20 = vpop.permute.xlu2 %1894 }
  0x6f   : > { %v1897_v36 = vunpack.i.h.bf16 %v2500_v20  ;;  %v1896_v62 = vunpack.i.l.bf16 %v2500_v20 }
  0x71   : > { %v658_v24 = vrot.slane %v1897_v36, 4  ;;  %v794_v5 = vrot.slane %v1896_v62, 4 }
  0x76   : > { %v2552_v58 = vpop.permute.xlu2 %1899 }
  0x77   : > { %v1902_v12 = vunpack.i.h.bf16 %v2552_v58  ;;  %v1901_v53 = vunpack.i.l.bf16 %v2552_v58  ;;  %v1181_v58 = vsel %vm236_vm0, %v2611_v57, %v1180_v11 }
  0x79   : > { %v2639_v2 = vrot.slane %v1902_v12, 4  ;;  %v2643_v54 = vrot.slane %v1901_v53, 4 }
  0x7e   : > { %v2604_v38 = vpop.permute.xlu2 %1914 }
  0x7f   : > { %v1917_v7 = vunpack.i.h.bf16 %v2604_v38  ;;  %v1916_v6 = vunpack.i.l.bf16 %v2604_v38 }
  0x81   : > { %v1520_v60 = vrot.slane %v1917_v7, 4  ;;  %v2652_v19 = vrot.slane %v1916_v6, 4 }
  0x83   : > { %v2633_v17 = vpop.permute.xlu0 %1874 }
  0x84   : > { %v2645_v8 = vpop.permute.xlu1 %1884  ;;  %v1877_v16 = vunpack.i.h.bf16 %v2633_v17  ;;  %v1876_v41 = vunpack.i.l.bf16 %v2633_v17 }
  0x85   : > { %v1887_v63 = vunpack.i.h.bf16 %v2645_v8  ;;  %v1886_v61 = vunpack.i.l.bf16 %v2645_v8 }
  0x86   : > { %v2657_v1 = vpop.permute.xlu2 %1929  ;;  %v780_v50 = vrot.slane %v1877_v16, 4  ;;  %v768_v21 = vrot.slane %v1876_v41, 4 }
  0x87   : > { %v792_v37 = vrot.slane %v1887_v63, 4  ;;  %v795_v33 = vsel %vm236_vm0, %v1887_v63, %v794_v5  ;;  %v1932_v23 = vunpack.i.h.bf16 %v2657_v1  ;;  %v1931_v48 = vunpack.i.l.bf16 %v2657_v1 }
  0x88   : > { %v2664_v35 = vperm.slane %v795_v33, %v2227_v28  ;;  %v756_v51 = vrot.slane %v1886_v61, 4 }
  0x89   : > { %v793_v44 = vsel %vm236_vm0, %v792_v37, %v1896_v62  ;;  %v1522_v27 = vrot.slane %v1932_v23, 4  ;;  %v1521_v4 = vsel %vm236_vm0, %v1520_v60, %v1932_v23  ;;  %v2685_v62 = vperm.slane %v1045_v26, %v2303_v10 }
  0x8a   : > { %v2681_v39 = vperm.slane %v793_v44, %v2227_v28  ;;  %v1408_v59 = vrot.slane %v1931_v48, 4  ;;  %v2692_v63 = vperm.slane %v1521_v4, %v2227_v28 }
  0x8b   : > { %v1880_v5 = vpop.permute.xlu0 %1879  ;;  %v1523_v29 = vsel %vm236_vm0, %v1917_v7, %v1522_v27 }
  0x8c   : > { %v1890_v17 = vpop.permute.xlu1 %1889  ;;  %v1882_v47 = vunpack.i.h.bf16 %v1880_v5  ;;  %v1881_v56 = vunpack.i.l.bf16 %v1880_v5  ;;  %v828_v46 = vrot.slane %v2681_v39, 4  ;;  %v2721_v20 = vperm.slane %v1523_v29, %v2227_v28 }
  0x8d   : > { %v1892_v14 = vunpack.i.h.bf16 %v1890_v17  ;;  %v1891_v60 = vunpack.i.l.bf16 %v1890_v17 }
  0x8e   : > { %v769_v9 = vsel %vm236_vm0, %v768_v21, %v1882_v47  ;;  %v770_v55 = vrot.slane %v1882_v47, 4  ;;  %v656_v13 = vrot.slane %v1881_v56, 4  ;;  %v659_v0 = vsel %vm236_vm0, %v1881_v56, %v658_v24  ;;  %v2731_v17 = vpop.permute.xlu2 %1944 }
  0x8f   : > { %v781_v37 = vsel %vm236_vm0, %v780_v50, %v1892_v14  ;;  %v782_v33 = vrot.slane %v1892_v14, 4  ;;  %v2698_v23 = vperm.slane %v769_v9, %v2227_v28  ;;  %v1092_v24 = vrot.slane %v2685_v62, 4 }
  0x90   : > { %v2703_v7 = vperm.slane %v781_v37, %v2227_v28  ;;  %v771_v26 = vsel %vm236_vm0, %v1876_v41, %v770_v55  ;;  %v657_v44 = vsel %vm236_vm0, %v656_v13, %v1897_v36  ;;  %v2715_v50 = vperm.slane %v659_v0, %v2227_v28 }
  0x91   : > { %v783_v27 = vsel %vm236_vm0, %v1877_v16, %v782_v33  ;;  %v2712_v34 = vperm.slane %v771_v26, %v2227_v28  ;;  %v668_v41 = vrot.slane %v1891_v60, 4  ;;  %v804_v16 = vrot.slane %v2698_v23, 4 }
  0x92   : > { %v2725_v4 = vperm.slane %v783_v27, %v2227_v28  ;;  %v2729_v21 = vperm.slane %v657_v44, %v2227_v28  ;;  %v830_v15 = vrot.slane %v2703_v7, 4  ;;  %v1947_v29 = vunpack.i.h.bf16 %v2731_v17 }
  0x93   : > { %v1905_v5 = vpop.permute.xlu0 %1904 }
  0x94   : > { %v1907_v47 = vunpack.i.h.bf16 %v1905_v5  ;;  %v1906_v56 = vunpack.i.l.bf16 %v1905_v5  ;;  %v1910_v14 = vpop.permute.xlu1 %1909 }
  0x95   : > { %v1912_v13 = vunpack.i.h.bf16 %v1910_v14  ;;  %v1911_v0 = vunpack.i.l.bf16 %v1910_v14 }
  0x96   : > { %v669_v37 = vsel %vm236_vm0, %v668_v41, %v1907_v47  ;;  %v670_v33 = vrot.slane %v1907_v47, 4  ;;  %v757_v26 = vsel %vm236_vm0, %v756_v51, %v1906_v56  ;;  %v758_v44 = vrot.slane %v1906_v56, 4 }
  0x97   : > { %v2741_v18 = vperm.slane %v669_v37, %v2227_v28  ;;  %v2744_v27 = vperm.slane %v757_v26, %v2227_v28  ;;  %v645_v5 = vsel %vm236_vm0, %v2643_v54, %v1912_v13  ;;  %v646_v36 = vrot.slane %v1912_v13, 4 }
  0x98   : > { %v671_v30 = vsel %vm236_vm0, %v1891_v60, %v670_v33  ;;  %v759_v41 = vsel %vm236_vm0, %v1886_v61, %v758_v44  ;;  %v2753_v47 = vperm.slane %v645_v5, %v2227_v28  ;;  %v1410_v51 = vrot.slane %v1947_v29, 4 }
  0x99   : > { %v692_v56 = vrot.slane %v2729_v21, 4  ;;  %v2757_v14 = vperm.slane %v671_v30, %v2227_v28  ;;  %v681_v37 = vsel %vm236_vm0, %v2639_v2, %v1911_v0  ;;  %v1946_v54 = vunpack.i.l.bf16 %v2731_v17 }
  0x9a   : > { %v2764_v8 = vperm.slane %v759_v41, %v2227_v28  ;;  %v1409_v61 = vsel %vm236_vm0, %v1408_v59, %v1947_v29  ;;  %v1093_v13 = vsel %vm236_vm0, %v1077_v3, %v1092_v24  ;;  %v718_v33 = vrot.slane %v2741_v18, 4 }
  0x9b   : > { %v805_v30 = vsel %vm236_vm0, %v804_v16, %v2744_v27  ;;  %v647_v2 = vsel %vm236_vm0, %v1901_v53, %v646_v36  ;;  %v682_v26 = vrot.slane %v1911_v0, 4  ;;  %v2774_v17 = vpop.permute.xlu0 %1919  ;;  %v806_v44 = vrot.slane %v2744_v27, 4 }
  0x9c   : > { %v693_v5 = vsel %vm236_vm0, %v692_v56, %v2753_v47  ;;  %v687_v59 = vperm.slane %v681_v37, %v2227_v28  ;;  %v1411_v24 = vsel %vm236_vm0, %v1931_v48, %v1410_v51  ;;  %v694_v29 = vrot.slane %v2753_v47, 4  ;;  %v2796_v48 = vpop.permute.xlu1 %1924 }
  0x9d   : > { %v683_v53 = vsel %vm236_vm0, %v1902_v12, %v682_v26  ;;  %v1165_v36 = vperm.slane %v1157_v25, %v2303_v10  ;;  %v2791_v41 = vperm.slane %v647_v2, %v2227_v28  ;;  %v2794_v56 = vperm.slane %v1409_v61, %v2227_v28 }
  0x9e   : > { %v1498_v1 = vrot.slane %v1946_v54, 4  ;;  %v2799_v51 = vperm.slane %v1411_v24, %v2227_v28  ;;  %v1090_v25 = vrot.slane %v1077_v3, 4  ;;  %v2806_v37 = vperm.slane %v683_v53, %v2227_v28 }
  0x9f   : > { %v1204_v12 = vrot.slane %v1165_v36, 4  ;;  %v716_v2 = vrot.slane %v687_v59, 4  ;;  %v1189_v61 = vperm.slane %v1181_v58, %v2303_v10  ;;  %v1922_v26 = vunpack.i.h.bf16 %v2774_v17 }
  0xa0   : > { %v1091_v60 = vsel %vm236_vm0, %v1090_v25, %v2685_v62  ;;  %v1921_v24 = vunpack.i.l.bf16 %v2774_v17  ;;  %v1927_v49 = vunpack.i.h.bf16 %v2796_v48  ;;  %v1926_v0 = vunpack.i.l.bf16 %v2796_v48 }
  0xa1   : > { %v1205_v57 = vsel %vm236_vm0, %v1189_v61, %v1204_v12  ;;  %v1202_v11 = vrot.slane %v1189_v61, 4  ;;  %v1510_v3 = vrot.slane %v1922_v26, 4  ;;  %v2817_v53 = vperm.slane %v693_v5, %v2303_v10 }
  0xa2   : > { %v706_v58 = vrot.slane %v2791_v41, 4  ;;  %v719_v16 = vsel %vm236_vm0, %v687_v59, %v718_v33  ;;  %v2018_v9 = vpack.i.bf16 %v1093_v13, %v1205_v57  ;;  %v1496_v55 = vrot.slane %v1926_v0, 4 }
  0xa3   : > { %v1458_v62 = vrot.slane %v2794_v56, 4  ;;  %v1203_v25 = vsel %vm236_vm0, %v1202_v11, %v1165_v36  ;;  %v1509_v48 = vsel %vm236_vm0, %v2652_v19, %v1922_v26  ;;  %v728_v12 = vrot.slane %v2806_v37, 4  ;;  %v1935_v33 = vpop.permute.xlu0 %1934 }
  0xa4   : > { %2019 = vrot.lane.b32.xlu0 %v2018_v9, %s2109_s27  ;;  %v2013_v5 = vpack.i.bf16 %v1091_v60, %v1203_v25  ;;  %v1396_v61 = vrot.slane %v1921_v24, 4  ;;  %v1511_v13 = vsel %vm236_vm0, %v1916_v6, %v1510_v3  ;;  %v1532_v59 = vrot.slane %v1927_v49, 4 }
  0xa5   : > { %v1499_v57 = vsel %vm236_vm0, %v1926_v0, %v1498_v1  ;;  %v717_v36 = vsel %vm236_vm0, %v716_v2, %v2741_v18  ;;  %v742_v11 = vrot.slane %v2817_v53, 4  ;;  %v2837_v19 = vperm.slane %v1509_v48, %v2227_v28 }
  0xa6   : > { %2014 = vrot.lane.b32.xlu2 %v2013_v5, %s2108_s26  ;;  %v1497_v9 = vsel %vm236_vm0, %v1496_v55, %v1946_v54  ;;  %v2841_v38 = vperm.slane %v717_v36, %v2303_v10  ;;  %v2844_v6 = vperm.slane %v805_v30, %v2303_v10  ;;  %v2847_v60 = vperm.slane %v1511_v13, %v2227_v28 }
  0xa7   : > { %v829_v18 = vsel %vm236_vm0, %v828_v46, %v2703_v7  ;;  %v1937_v0 = vunpack.i.h.bf16 %v1935_v33  ;;  %v1936_v1 = vunpack.i.l.bf16 %v1935_v33  ;;  %v2854_v2 = vperm.slane %v1499_v57, %v2227_v28 }
  0xa8   : > { %v743_v55 = vsel %vm236_vm0, %v2841_v38, %v742_v11  ;;  %v2859_v54 = vperm.slane %v829_v18, %v2303_v10  ;;  %v854_v30 = vrot.slane %v2844_v6, 4  ;;  %v2863_v26 = vperm.slane %v1497_v9, %v2227_v28 }
  0xa9   : > { %v1398_v3 = vrot.slane %v1937_v0, 4  ;;  %v1397_v25 = vsel %vm236_vm0, %v1396_v61, %v1937_v0  ;;  %v1533_v46 = vsel %vm236_vm0, %v1532_v59, %v1936_v1  ;;  %v1534_v33 = vrot.slane %v1936_v1, 4 }
  0xaa   : > { %v855_v5 = vsel %vm236_vm0, %v2859_v54, %v854_v30  ;;  %v2871_v13 = vperm.slane %v1397_v25, %v2227_v28  ;;  %v2875_v11 = vperm.slane %v1533_v46, %v2227_v28  ;;  %v695_v61 = vsel %vm236_vm0, %v2729_v21, %v694_v29  ;;  %v1940_v30 = vpop.permute.xlu1 %1939 }
  0xab   : > { %v2023_v57 = vpack.i.bf16 %v743_v55, %v855_v5  ;;  %v1399_v36 = vsel %vm236_vm0, %v1921_v24, %v1398_v3  ;;  %v1535_v18 = vsel %vm236_vm0, %v1927_v49, %v1534_v33  ;;  %v703_v0 = vperm.slane %v695_v61, %v2303_v10  ;;  %v1950_v61 = vpop.permute.xlu0 %1949 }
  0xac   : > { %v2887_v24 = vperm.slane %v1399_v36, %v2227_v28  ;;  %v1432_v55 = vrot.slane %v2871_v13, 4  ;;  %v727_v47 = vperm.slane %v719_v16, %v2303_v10  ;;  %v2893_v21 = vperm.slane %v1535_v18, %v2227_v28 }
  0xad   : > { %v807_v29 = vsel %vm236_vm0, %v2698_v23, %v806_v44  ;;  %v831_v49 = vsel %vm236_vm0, %v2681_v39, %v830_v15  ;;  %v746_v3 = vrot.slane %v703_v0, 4  ;;  %v1941_v27 = vunpack.i.l.bf16 %v1940_v30 }
  0xae   : > { %2024 = vrot.lane.b32.xlu2 %v2023_v57, %s2104_s22  ;;  %v744_v16 = vrot.slane %v727_v47, 4  ;;  %v815_v46 = vperm.slane %v807_v29, %v2303_v10  ;;  %v839_v5 = vperm.slane %v831_v49, %v2303_v10  ;;  %v1942_v57 = vunpack.i.h.bf16 %v1940_v30 }
  0xaf   : > { %v747_v33 = vsel %vm236_vm0, %v727_v47, %v746_v3  ;;  %v3222_v23 = vrot.slane %v2715_v50, 4  ;;  %v1384_v29 = vrot.slane %v1941_v27, 4  ;;  %v729_v47 = vsel %vm236_vm0, %v728_v12, %v2757_v14 }
  0xb0   : > { %v745_v44 = vsel %vm236_vm0, %v744_v16, %v703_v0  ;;  %v856_v39 = vrot.slane %v839_v5, 4  ;;  %v858_v15 = vrot.slane %v815_v46, 4  ;;  %v1420_v18 = vrot.slane %v1942_v57, 4 }
  0xb1   : > { %v705_v7 = vsel %vm236_vm0, %v3222_v23, %v2791_v41  ;;  %v3223_v30 = vrot.slane %v2712_v34, 4  ;;  %v735_v16 = vperm.slane %v729_v47, %v2303_v10  ;;  %v3224_v17 = vrot.slane %v2664_v35, 4 }
  0xb2   : > { %v711_v36 = vperm.slane %v705_v7, %v2303_v10  ;;  %v857_v3 = vsel %vm236_vm0, %v856_v39, %v815_v46  ;;  %v859_v0 = vsel %vm236_vm0, %v839_v5, %v858_v15  ;;  %v1952_v59 = vunpack.i.h.bf16 %v1950_v61 }
  0xb3   : > { %v817_v49 = vsel %vm236_vm0, %v3223_v30, %v2764_v8  ;;  %v2028_v7 = vpack.i.bf16 %v745_v44, %v857_v3  ;;  %v2033_v9 = vpack.i.bf16 %v747_v33, %v859_v0  ;;  %v841_v12 = vsel %vm236_vm0, %v3224_v17, %v2725_v4 }
  0xb4   : > { %v823_v23 = vperm.slane %v817_v49, %v2303_v10  ;;  %v748_v25 = vrot.slane %v735_v16, 4  ;;  %v847_v48 = vperm.slane %v841_v12, %v2303_v10  ;;  %v1951_v30 = vunpack.i.l.bf16 %v1950_v61 }
  0xb5   : > { %v750_v1 = vrot.slane %v711_v36, 4  ;;  %v3225_v46 = vrot.slane %v2692_v63, 4  ;;  %2029 = vrot.lane.b32.xlu0 %v2028_v7, %s2106_s24  ;;  %2034 = vrot.lane.b32.xlu1 %v2033_v9, %s2105_s23  ;;  %v1386_v33 = vrot.slane %v1952_v59, 4  ;;  %v1385_v44 = vsel %vm236_vm0, %v1384_v29, %v1952_v59 }
  0xb6   : > { %v862_v39 = vrot.slane %v823_v23, 4  ;;  %v749_v17 = vsel %vm236_vm0, %v748_v25, %v711_v36  ;;  %v860_v15 = vrot.slane %v847_v48, 4  ;;  %v1391_v47 = vperm.slane %v1385_v44, %v2227_v28 }
  0xb7   : > { %v1571_v5 = vsel %vm236_vm0, %v2875_v11, %v3225_v46  ;;  %v1421_v61 = vsel %vm236_vm0, %v1420_v18, %v1951_v30  ;;  %v1387_v49 = vsel %vm236_vm0, %v1941_v27, %v1386_v33  ;;  %v1422_v3 = vrot.slane %v1951_v30, 4 }
  0xb8   : > { %v1427_v0 = vperm.slane %v1421_v61, %v2227_v28  ;;  %v707_v9 = vsel %vm236_vm0, %v2715_v50, %v706_v58  ;;  %v1444_v59 = vrot.slane %v2887_v24, 4  ;;  %v861_v29 = vsel %vm236_vm0, %v860_v15, %v823_v23 }
  0xb9   : > { %v2949_v25 = vperm.slane %v1387_v49, %v2227_v28  ;;  %v751_v36 = vsel %vm236_vm0, %v735_v16, %v750_v1  ;;  %v2038_v18 = vpack.i.bf16 %v749_v17, %v861_v29  ;;  %v1423_v27 = vsel %vm236_vm0, %v1942_v57, %v1422_v3 }
  0xba   : > { %v1433_v7 = vsel %vm236_vm0, %v1432_v55, %v1391_v47  ;;  %v1434_v12 = vrot.slane %v1391_v47, 4  ;;  %v2955_v41 = vperm.slane %v1423_v27, %v2227_v28  ;;  %v1459_v50 = vsel %vm236_vm0, %v1427_v0, %v1458_v62 }
  0xbb   : > { %v863_v58 = vsel %vm236_vm0, %v847_v48, %v862_v39  ;;  %v715_v23 = vperm.slane %v707_v9, %v2303_v10  ;;  %2039 = vrot.lane.b32.xlu2 %v2038_v18, %s2107_s25  ;;  %v3226_v16 = vrot.slane %v2757_v14, 4  ;;  %v3227_v57 = vrot.slane %v2764_v8, 4 }
  0xbc   : > { %v2043_v1 = vpack.i.bf16 %v751_v36, %v863_v58  ;;  %v3228_v30 = vrot.slane %v2725_v4, 4  ;;  %v1456_v48 = vrot.slane %v1427_v0, 4  ;;  %v1468_v14 = vrot.slane %v2955_v41, 4 }
  0xbd   : > { %v731_v55 = vsel %vm236_vm0, %v2806_v37, %v3226_v16  ;;  %v819_v28 = vsel %vm236_vm0, %v2712_v34, %v3227_v57  ;;  %v754_v33 = vrot.slane %v715_v23, 4  ;;  %v1435_v34 = vsel %vm236_vm0, %v2871_v13, %v1434_v12 }
  0xbe   : > { %v843_v62 = vsel %vm236_vm0, %v2664_v35, %v3228_v30  ;;  %v739_v46 = vperm.slane %v731_v55, %v2303_v10  ;;  %v827_v44 = vperm.slane %v819_v28, %v2303_v10  ;;  %2044 = vrot.lane.b32.xlu0 %v2043_v1, %s2110_s28  ;;  %v1467_v4 = vperm.slane %v1459_v50, %v2303_v10 }
  0xbf   : > { %v851_v8 = vperm.slane %v843_v62, %v2303_v10  ;;  %v3229_v17 = vrot.slane %v2863_v26, 4  ;;  %v1443_v61 = vperm.slane %v1435_v34, %v2303_v10  ;;  %v1579_v3 = vperm.slane %v1571_v5, %v2303_v10 }
  0xc0   : > { %v755_v37 = vsel %vm236_vm0, %v739_v46, %v754_v33  ;;  %v866_v35 = vrot.slane %v827_v44, 4  ;;  %v752_v39 = vrot.slane %v739_v46, 4  ;;  %v1484_v49 = vrot.slane %v1467_v4, 4 }
  0xc1   : > { %v1547_v15 = vsel %vm236_vm0, %v2837_v19, %v3229_v17  ;;  %v864_v47 = vrot.slane %v851_v8, 4  ;;  %v2993_v9 = vperm.slane %v1433_v7, %v2303_v10  ;;  %v1457_v29 = vsel %vm236_vm0, %v1456_v48, %v2794_v56 }
  0xc2   : > { %v867_v0 = vsel %vm236_vm0, %v851_v8, %v866_v35  ;;  %v753_v13 = vsel %vm236_vm0, %v752_v39, %v715_v23  ;;  %v1555_v27 = vperm.slane %v1547_v15, %v2303_v10  ;;  %v1596_v12 = vrot.slane %v1579_v3, 4 }
  0xc3   : > { %v2053_v36 = vpack.i.bf16 %v755_v37, %v867_v0  ;;  %v865_v18 = vsel %vm236_vm0, %v864_v47, %v827_v44  ;;  %v3000_v58 = vperm.slane %v1457_v29, %v2303_v10  ;;  %v1482_v5 = vrot.slane %v2993_v9, 4 }
  0xc4   : > { %v2048_v50 = vpack.i.bf16 %v753_v13, %v865_v18  ;;  %v3230_v23 = vrot.slane %v2837_v19, 4  ;;  %v1580_v1 = vrot.slane %v2893_v21, 4  ;;  %v3231_v16 = vrot.slane %v2875_v11, 4 }
  0xc5   : > { %2054 = vrot.lane.b32.xlu1 %v2053_v36, %s2109_s27  ;;  %v1486_v57 = vrot.slane %v1443_v61, 4  ;;  %v1446_v28 = vrot.slane %v2949_v25, 4  ;;  %v1485_v19 = vsel %vm236_vm0, %v1484_v49, %v1443_v61  ;;  %v1598_v46 = vrot.slane %v1555_v27, 4 }
  0xc6   : > { %v1545_v7 = vsel %vm236_vm0, %v3230_v23, %v2863_v26  ;;  %v1569_v55 = vsel %vm236_vm0, %v3231_v16, %v2692_v63  ;;  %2049 = vrot.lane.b32.xlu2 %v2048_v50, %s2108_s26  ;;  %v1483_v26 = vsel %vm236_vm0, %v3000_v58, %v1482_v5  ;;  %v1445_v63 = vsel %vm236_vm0, %v1444_v59, %v2949_v25 }
  0xc7   : > { %v3010_v56 = vperm.slane %v1545_v7, %v2303_v10  ;;  %v1575_v30 = vperm.slane %v1569_v55, %v2303_v10  ;;  %v1487_v48 = vsel %vm236_vm0, %v1467_v4, %v1486_v57  ;;  %v3232_v11 = vrot.slane %v2847_v60, 4 }
  0xc8   : > { %v1597_v44 = vsel %vm236_vm0, %v1596_v12, %v1555_v27  ;;  %v1451_v8 = vperm.slane %v1445_v63, %v2303_v10  ;;  %v1469_v34 = vsel %vm236_vm0, %v1468_v14, %v2799_v51  ;;  %v1599_v4 = vsel %vm236_vm0, %v1579_v3, %v1598_v46  ;;  %v1955_v46 = vpop.permute.xlu1 %1954 }
  0xc9   : > { %v1594_v62 = vrot.slane %v3010_v56, 4  ;;  %v1557_v33 = vsel %vm236_vm0, %v3232_v11, %v2854_v2  ;;  %v1475_v35 = vperm.slane %v1469_v34, %v2303_v10  ;;  %v1581_v59 = vsel %vm236_vm0, %v1580_v1, %v2721_v20 }
  0xca   : > { %v2063_v25 = vpack.i.bf16 %v1485_v19, %v1597_v44  ;;  %v2068_v17 = vpack.i.bf16 %v1487_v48, %v1599_v4  ;;  %v1587_v15 = vperm.slane %v1581_v59, %v2303_v10  ;;  %v1582_v47 = vrot.slane %v2721_v20, 4  ;;  %v1965_v4 = vpop.permute.xlu0 %1964 }
  0xcb   : > { %v1595_v37 = vsel %vm236_vm0, %v1575_v30, %v1594_v62  ;;  %v1447_v61 = vsel %vm236_vm0, %v2887_v24, %v1446_v28  ;;  %v3233_v14 = vrot.slane %v2799_v51, 4  ;;  %v1563_v3 = vperm.slane %v1557_v33, %v2303_v10 }
  0xcc   : > { %v2058_v39 = vpack.i.bf16 %v1483_v26, %v1595_v37  ;;  %2069 = vrot.lane.b32.xlu0 %v2068_v17, %s2105_s23  ;;  %v1488_v0 = vrot.slane %v1475_v35, 4  ;;  %v1490_v29 = vrot.slane %v1451_v8, 4  ;;  %v1455_v20 = vperm.slane %v1447_v61, %v2303_v10 }
  0xcd   : > { %v1471_v49 = vsel %vm236_vm0, %v2955_v41, %v3233_v14  ;;  %v1583_v24 = vsel %vm236_vm0, %v2893_v21, %v1582_v47  ;;  %v1600_v51 = vrot.slane %v1587_v15, 4  ;;  %v3234_v41 = vrot.slane %v2854_v2, 4 }
  0xce   : > { %v1479_v13 = vperm.slane %v1471_v49, %v2303_v10  ;;  %2059 = vrot.lane.b32.xlu1 %v2058_v39, %s2104_s22  ;;  %2064 = vrot.lane.b32.xlu2 %v2063_v25, %s2106_s24  ;;  %v1591_v27 = vperm.slane %v1583_v24, %v2303_v10  ;;  %v1602_v12 = vrot.slane %v1563_v3, 4  ;;  %v1489_v50 = vsel %vm236_vm0, %v1488_v0, %v1451_v8 }
  0xcf   : > { %v1559_v18 = vsel %vm236_vm0, %v2847_v60, %v3234_v41  ;;  %v1491_v5 = vsel %vm236_vm0, %v1475_v35, %v1490_v29  ;;  %v740_v1 = vrot.slane %v2841_v38, 4  ;;  %v1480_v16 = vrot.slane %v3000_v58, 4 }
  0xd0   : > { %v1492_v36 = vrot.slane %v1479_v13, 4  ;;  %v1567_v21 = vperm.slane %v1559_v18, %v2303_v10  ;;  %v1604_v7 = vrot.slane %v1591_v27, 4  ;;  %v1601_v2 = vsel %vm236_vm0, %v1600_v51, %v1563_v3  ;;  %v1970_v37 = vpop.permute.xlu1 %1969 }
  0xd1   : > { %v1592_v55 = vrot.slane %v1575_v30, 4  ;;  %v1603_v60 = vsel %vm236_vm0, %v1587_v15, %v1602_v12  ;;  %v2073_v57 = vpack.i.bf16 %v1489_v50, %v1601_v2  ;;  %v852_v19 = vrot.slane %v2859_v54, 4 }
  0xd2   : > { %v1493_v23 = vsel %vm236_vm0, %v1492_v36, %v1455_v20  ;;  %v1605_v28 = vsel %vm236_vm0, %v1604_v7, %v1567_v21  ;;  %v2078_v26 = vpack.i.bf16 %v1491_v5, %v1603_v60  ;;  %v1494_v48 = vrot.slane %v1455_v20, 4 }
  0xd3   : > { %v2083_v62 = vpack.i.bf16 %v1493_v23, %v1605_v28  ;;  %v3075_v10 = vsel %vm236_vm0, %v740_v1, %v2817_v53  ;;  %v3079_v38 = vsel %vm236_vm0, %v852_v19, %v2844_v6  ;;  %v3083_v54 = vsel %vm236_vm0, %v1480_v16, %v2993_v9  ;;  %v1960_v9 = vpop.permute.xlu2 %1959 }
  0xd4   : > { %v3087_v58 = vsel %vm236_vm0, %v1592_v55, %v3010_v56  ;;  %v1495_v30 = vsel %vm236_vm0, %v1479_v13, %v1494_v48  ;;  %v1606_v63 = vrot.slane %v1567_v21, 4  ;;  %v332_v11 = vrot.slane %v2345_v40, 4  ;;  %v1980_v13 = vpop.permute.xlu0 %1979 }
  0xd5   : > { %2084 = vrot.lane.b32.xlu0 %v2083_v62, %s2108_s26  ;;  %v444_v53 = vrot.slane %v2349_v43, 4  ;;  %v1957_v6 = vunpack.i.h.bf16 %v1955_v46  ;;  %v1956_v8 = vunpack.i.l.bf16 %v1955_v46  ;;  %v1962_v40 = vunpack.i.h.bf16 %v1960_v9 }
  0xd6   : > { %2074 = vrot.lane.b32.xlu1 %v2073_v57, %s2107_s25  ;;  %2079 = vrot.lane.b32.xlu2 %v2078_v26, %s2110_s28  ;;  %v1607_v33 = vsel %vm236_vm0, %v1591_v27, %v1606_v63  ;;  %v333_v56 = vsel %vm236_vm0, %v332_v11, %v2326_v31  ;;  %v1961_v35 = vunpack.i.l.bf16 %v1960_v9  ;;  %v1967_v25 = vunpack.i.h.bf16 %v1965_v4 }
  0xd7   : > { %v2088_v44 = vpack.i.bf16 %v1495_v30, %v1607_v33  ;;  %v445_v34 = vsel %vm236_vm0, %v444_v53, %v2329_v32  ;;  %v517_v43 = vsel %vm516_vm1, %v333_v56, %v1957_v6  ;;  %v1966_v39 = vunpack.i.l.bf16 %v1965_v4 }
  0xd8   : > { %v518_v59 = vsel %vm516_vm1, %v445_v34, %v1956_v8  ;;  %v520_v17 = vsel %vm519_vm2, %v517_v43, %v1962_v40  ;;  %v1972_v15 = vunpack.i.h.bf16 %v1970_v37  ;;  %v1971_v47 = vunpack.i.l.bf16 %v1970_v37  ;;  %v1985_v49 = vpop.permute.xlu1 %1984 }
  0xd9   : > { %v521_v32 = vsel %vm519_vm2, %v518_v59, %v1961_v35  ;;  %v523_v31 = vsel %vm522_vm3, %v520_v17, %v1967_v25  ;;  %v1982_v24 = vunpack.i.h.bf16 %v1980_v13  ;;  %v1981_v51 = vunpack.i.l.bf16 %v1980_v13  ;;  %v1847_v13 = vld [vmem:[%s3218_s1 + $0x10] sm:$0xff] }
  0xda   : > { %v524_v61 = vsel %vm522_vm3, %v521_v32, %v1966_v39  ;;  %v526_v29 = vsel %vm525_vm4, %v523_v31, %v1972_v15  ;;  %v1987_v36 = vunpack.i.h.bf16 %v1985_v49  ;;  %v1986_v41 = vunpack.i.l.bf16 %v1985_v49  ;;  %v538_v15 = vld [vmem:[%s3218_s1] sm:$0xff] }
  0xdb   : > { %v1975_v14 = vpop.permute.xlu2 %1974  ;;  %v527_v20 = vsel %vm525_vm4, %v524_v61, %v1971_v47  ;;  %v1078_v21 = vrot.slane %v2544_v42, 4  ;;  %v1190_v7 = vrot.slane %v2550_v45, 4 }
  0xdc   : > { %v1977_v3 = vunpack.i.h.bf16 %v1975_v14  ;;  %v1976_v0 = vunpack.i.l.bf16 %v1975_v14  ;;  %v1995_v1 = vpop.permute.xlu0 %1994 }
  0xdd   : > { %v1079_v60 = vsel %vm236_vm0, %v1078_v21, %v2525_v22  ;;  %v1191_v57 = vsel %vm236_vm0, %v1190_v7, %v2547_v52  ;;  %v1997_v28 = vunpack.i.h.bf16 %v1995_v1  ;;  %v1996_v19 = vunpack.i.l.bf16 %v1995_v1 }
  0xde   : > { %2089 = vrot.lane.b32.xlu1 %v2088_v44, %s2109_s27  ;;  %v530_v18 = vsel %vm528_vm5, %v527_v20, %v1976_v0  ;;  %v529_v27 = vsel %vm528_vm5, %v526_v29, %v1977_v3 }
  0xdf   : > { %v533_v12 = vsel %vm531_vm6, %v530_v18, %v1981_v51  ;;  %v532_v50 = vsel %vm531_vm6, %v529_v27, %v1982_v24 }
  0xe0   : > { %v536_v5 = vsel %vm534_vm7, %v533_v12, %v1986_v41  ;;  %v535_v23 = vsel %vm534_vm7, %v532_v50, %v1987_v36  ;;  %v1990_v16 = vpop.permute.xlu1 %1989 }
  0xe1   : > { %556 = vmatpush.msra.mxu0 %v536_v5  ;;  %v1992_v2 = vunpack.i.h.bf16 %v1990_v16  ;;  %v1991_v55 = vunpack.i.l.bf16 %v1990_v16 }
  0xe3   : > { %557 = vmatpush.msra.mxu0 %v535_v23  ;;  %v2000_v26 = vpop.permute.xlu2 %1999  ;;  %v1262_v62 = vsel %vm516_vm1, %v1079_v60, %v1992_v2  ;;  %v1263_v48 = vsel %vm516_vm1, %v1191_v57, %v1991_v55 }
  0xe4   : > { %v2002_v42 = vunpack.i.h.bf16 %v2000_v26  ;;  %v2001_v46 = vunpack.i.l.bf16 %v2000_v26  ;;  %v1264_v45 = vsel %vm519_vm2, %v1262_v62, %v1997_v28  ;;  %v1265_v30 = vsel %vm519_vm2, %v1263_v48, %v1996_v19  ;;  %v2005_v63 = vpop.permute.xlu0 %2004  ;;  %1844 = vmatmul.msk.f32.vlgmr.msra.gmra.mxu0 %vm519_vm2, %v538_v15 }
  0xe5   : > { %v2007_v11 = vunpack.i.h.bf16 %v2005_v63  ;;  %v2006_v53 = vunpack.i.l.bf16 %v2005_v63  ;;  %v2111_v19 = vmov 0.0  }
  0xe6   : > { %v1266_v33 = vsel %vm522_vm3, %v1264_v45, %v2002_v42  ;;  %v1267_v52 = vsel %vm522_vm3, %v1265_v30, %v2001_v46  ;;  %218 = vst.msk [vmem:[%s3157_s10] sm:$0xff] %vm217_vm8, %v2111_v19  ;;  %v1845_v46 = vld [vmem:[%s3218_s1 + $0x8] sm:$0xff] }
  0xe7   : > { %v1268_v8 = vsel %vm525_vm4, %v1266_v33, %v2007_v11  ;;  %v1269_v9 = vsel %vm525_vm4, %v1267_v52, %v2006_v53 }
  0xe8   : > { %v2010_v22 = vpop.permute.xlu1 %2009 }
  0xe9   : > { %v2012_v44 = vunpack.i.h.bf16 %v2010_v22  ;;  %v2011_v6 = vunpack.i.l.bf16 %v2010_v22 }
  0xeb   : > { %v1271_v4 = vsel %vm528_vm5, %v1269_v9, %v2011_v6  ;;  %v1270_v40 = vsel %vm528_vm5, %v1268_v8, %v2012_v44 }
 0x100   : > { %v2015_v34 = vpop.permute.xlu2 %2014 }
 0x101   : > { %v2017_v56 = vunpack.i.h.bf16 %v2015_v34  ;;  %v2016_v37 = vunpack.i.l.bf16 %v2015_v34 }
 0x103   : > { %v1273_v43 = vsel %vm531_vm6, %v1271_v4, %v2016_v37  ;;  %v1272_v59 = vsel %vm531_vm6, %v1270_v40, %v2017_v56 }
 0x108   : > { %v2025_v47 = vpop.permute.xlu2 %2024 }
 0x109   : > { %v2026_v31 = vunpack.i.l.bf16 %v2025_v47  ;;  %v2027_v3 = vunpack.i.h.bf16 %v2025_v47 }
 0x10b   : > { %v925_v20 = vsel %vm516_vm1, %v3079_v38, %v2026_v31  ;;  %v924_v36 = vsel %vm516_vm1, %v3075_v10, %v2027_v3 }
 0x115   : > { %v2040_v61 = vpop.permute.xlu2 %2039 }
 0x116   : > { %v2020_v35 = vpop.permute.xlu0 %2019  ;;  %v2041_v12 = vunpack.i.l.bf16 %v2040_v61  ;;  %v2042_v7 = vunpack.i.h.bf16 %v2040_v61 }
 0x117   : > { %v2022_v25 = vunpack.i.h.bf16 %v2020_v35  ;;  %v2021_v39 = vunpack.i.l.bf16 %v2020_v35 }
 0x119   : > { %v1275_v17 = vsel %vm534_vm7, %v1273_v43, %v2021_v39  ;;  %v1274_v32 = vsel %vm534_vm7, %v1272_v59, %v2022_v25 }
 0x11a   : > { %1296 = vmatpush.msra.mxu2 %v1275_v17 }
 0x11c   : > { %1297 = vmatpush.msra.mxu2 %v1274_v32 }
 0x11d   : > { %1848 = vmatmul.msk.f32.vlgmr.msra.gmra.mxu2 %vm519_vm2, %v1847_v13 }
 0x120   : > { %v2050_v5 = vpop.permute.xlu2 %2049 }
 0x121   : > { %v2051_v16 = vunpack.i.l.bf16 %v2050_v5  ;;  %v2052_v60 = vunpack.i.h.bf16 %v2050_v5 }
 0x127   : > { %v2030_v14 = vpop.permute.xlu0 %2029  ;;  %v2035_v49 = vpop.permute.xlu1 %2034 }
 0x128   : > { %v2031_v0 = vunpack.i.l.bf16 %v2030_v14  ;;  %v2032_v29 = vunpack.i.h.bf16 %v2030_v14  ;;  %v2036_v24 = vunpack.i.l.bf16 %v2035_v49  ;;  %v2037_v41 = vunpack.i.h.bf16 %v2035_v49  ;;  %v2065_v30 = vpop.permute.xlu2 %2064 }
 0x129   : > { %v2066_v52 = vunpack.i.l.bf16 %v2065_v30  ;;  %v2067_v8 = vunpack.i.h.bf16 %v2065_v30 }
 0x12a   : > { %v927_v51 = vsel %vm519_vm2, %v925_v20, %v2031_v0  ;;  %v926_v18 = vsel %vm519_vm2, %v924_v36, %v2032_v29  ;;  %v1849_v29 = vld [vmem:[%s3218_s1 + $0x18] sm:$0xff] }
 0x12b   : > { %v929_v27 = vsel %vm522_vm3, %v927_v51, %v2036_v24  ;;  %v928_v23 = vsel %vm522_vm3, %v926_v18, %v2037_v41  ;;  %v537_v24 = vld [vmem:[%s3157_s10] sm:$0xff] }
 0x12c   : > { %v931_v1 = vsel %vm525_vm4, %v929_v27, %v2041_v12  ;;  %v930_v2 = vsel %vm525_vm4, %v928_v23, %v2042_v7 }
 0x130   : > { %v2045_v50 = vpop.permute.xlu0 %2044  ;;  %v2080_v4 = vpop.permute.xlu2 %2079 }
 0x131   : > { %v2047_v38 = vunpack.i.h.bf16 %v2045_v50  ;;  %v2046_v21 = vunpack.i.l.bf16 %v2045_v50  ;;  %v2081_v25 = vunpack.i.l.bf16 %v2080_v4  ;;  %v2082_v32 = vunpack.i.h.bf16 %v2080_v4 }
 0x133   : > { %v933_v10 = vsel %vm528_vm5, %v931_v1, %v2046_v21  ;;  %v932_v55 = vsel %vm528_vm5, %v930_v2, %v2047_v38 }
 0x134   : > { %v935_v28 = vsel %vm531_vm6, %v933_v10, %v2051_v16  ;;  %v934_v62 = vsel %vm531_vm6, %v932_v55, %v2052_v60 }
 0x137   : > { %v2055_v57 = vpop.permute.xlu1 %2054 }
 0x138   : > { %v2056_v26 = vunpack.i.l.bf16 %v2055_v57  ;;  %v2057_v48 = vunpack.i.h.bf16 %v2055_v57 }
 0x13a   : > { %v937_v42 = vsel %vm534_vm7, %v935_v28, %v2056_v26  ;;  %v936_v45 = vsel %vm534_vm7, %v934_v62, %v2057_v48 }
 0x13b   : > { %958 = vmatpush.msra.mxu1 %v937_v42 }
 0x13d   : > { %959 = vmatpush.msra.mxu1 %v936_v45 }
 0x13e   : > { %1846 = vmatmul.msk.f32.vlgmr.msra.gmra.mxu1 %vm519_vm2, %v1845_v46  ;;  %v2070_v53 = vpop.permute.xlu0 %2069 }
 0x13f   : > { %v2071_v6 = vunpack.i.l.bf16 %v2070_v53  ;;  %v2072_v56 = vunpack.i.h.bf16 %v2070_v53 }
 0x140   : > { %v2060_v63 = vpop.permute.xlu1 %2059 }
 0x141   : > { %v2061_v11 = vunpack.i.l.bf16 %v2060_v63  ;;  %v2062_v22 = vunpack.i.h.bf16 %v2060_v63 }
 0x143   : > { %v1665_v33 = vsel %vm516_vm1, %v3087_v58, %v2061_v11  ;;  %v1664_v44 = vsel %vm516_vm1, %v3083_v54, %v2062_v22 }
 0x144   : > { %v1667_v9 = vsel %vm519_vm2, %v1665_v33, %v2066_v52  ;;  %v1666_v40 = vsel %vm519_vm2, %v1664_v44, %v2067_v8 }
 0x145   : > { %v1669_v43 = vsel %vm522_vm3, %v1667_v9, %v2071_v6  ;;  %v1668_v39 = vsel %vm522_vm3, %v1666_v40, %v2072_v56 }
 0x147   : > { %v2085_v59 = vpop.permute.xlu0 %2084 }
 0x148   : > { %v2075_v34 = vpop.permute.xlu1 %2074  ;;  %v2086_v17 = vunpack.i.l.bf16 %v2085_v59  ;;  %v2087_v47 = vunpack.i.h.bf16 %v2085_v59 }
 0x149   : > { %v2076_v37 = vunpack.i.l.bf16 %v2075_v34  ;;  %v2077_v35 = vunpack.i.h.bf16 %v2075_v34 }
 0x14b   : > { %v1671_v58 = vsel %vm525_vm4, %v1669_v43, %v2076_v37  ;;  %v1670_v54 = vsel %vm525_vm4, %v1668_v39, %v2077_v35 }
 0x14c   : > { %v1673_v15 = vsel %vm528_vm5, %v1671_v58, %v2081_v25  ;;  %v1672_v49 = vsel %vm528_vm5, %v1670_v54, %v2082_v32 }
 0x14d   : > { %v1675_v3 = vsel %vm531_vm6, %v1673_v15, %v2086_v17  ;;  %v1674_v13 = vsel %vm531_vm6, %v1672_v49, %v2087_v47 }
 0x150   : > { %v2090_v31 = vpop.permute.xlu1 %2089 }
 0x151   : > { %v2092_v61 = vunpack.i.h.bf16 %v2090_v31  ;;  %v2091_v14 = vunpack.i.l.bf16 %v2090_v31 }
 0x153   : > { %v1677_v0 = vsel %vm534_vm7, %v1675_v3, %v2091_v14  ;;  %v1676_v20 = vsel %vm534_vm7, %v1674_v13, %v2092_v61 }
 0x154   : > { %1698 = vmatpush.msra.mxu3 %v1677_v0 }
 0x156   : > { %1699 = vmatpush.msra.mxu3 %v1676_v20 }
 0x157   : > { %1850 = vmatmul.msk.f32.vlgmr.msra.gmra.mxu3 %vm519_vm2, %v1849_v29 }
 0x161   : > { %v559_v51 = vpop.f32.mrf.mxu0 }
 0x162   : > { %v562_v36 = vadd.f32 %v559_v51, %v537_v24 }
 0x164   : > { %563 = vst.msk [vmem:[%s3157_s10] sm:$0xff] %vm217_vm8, %v562_v36 }
 0x16b   : > { %v938_v41 = vld [vmem:[%s3157_s10] sm:$0xff] }
 0x1a0   : > { %v1299_v12 = vpop.f32.mrf.mxu2 }
 0x1bb   : > { %v961_v18 = vpop.f32.mrf.mxu1 }
 0x1bc   : > { %v964_v27 = vadd.f32 %v961_v18, %v938_v41 }
 0x1be   : > { %965 = vst.msk [vmem:[%s3157_s10] sm:$0xff] %vm217_vm8, %v964_v27 }
 0x1c5   : > { %v1276_v50 = vld [vmem:[%s3157_s10] sm:$0xff] }
 0x1c6   : > { %v1302_v5 = vadd.f32 %v1299_v12, %v1276_v50 }
 0x1c8   : > { %1303 = vst.msk [vmem:[%s3157_s10] sm:$0xff] %vm217_vm8, %v1302_v5 }
 0x1cf   : > { %v1678_v23 = vld [vmem:[%s3157_s10] sm:$0xff] }
 0x1da   : > { %v1701_v38 = vpop.f32.mrf.mxu3 }
 0x1db   : > { %v1704_v21 = vadd.f32 %v1701_v38, %v1678_v23 }
 0x1dd   : > { %1705 = vst.msk [vmem:[%s3157_s10] sm:$0xff] %vm217_vm8, %v1704_v21 }
 0x1e4   : > { %v1706_v7 = vld [vmem:[%s3157_s10] sm:$0xff] }
 0x1e5   : > { %v1707_v1 = vsel %vm217_vm8, %v1706_v7, 0.0 }
 0x1e6   : > { %1708 = vadd.xlane.f32.xlu2 %v1707_v1 }
 0x259   : > { %v1709_v10 = vpop.xlane.xlu2 %1708 }
 0x25a   : > { %v1710_v16 = vmul.f32 0.015625, %v1709_v10  ;;  %1713 = vst.msk [vmem:[%s212_s18] sm:$0xff] %vm1712_vm9, %v1709_v10 }
 0x25c   : > { %v1711_v2 = vsub.f32 %v1706_v7, %v1710_v16 }
 0x25e   : > { %v1714_v55 = vmul.f32 %v1711_v2, %v1711_v2 }
 0x260   : > { %v1715_v60 = vsel %vm217_vm8, %v1714_v55, 0.0 }
 0x261   : > { %1716 = vadd.xlane.f32.xlu0 %v1715_v60 }
 0x2d4   : > { %v1717_v57 = vpop.xlane.xlu0 %1716 }
 0x2d5   : > { %1718 = vst.msk [vmem:[%s216_s21] sm:$0xff] %vm1712_vm9, %v1717_v57 }
 0x2d6 PF: > { %s15_s15 = sadd.s32 1, %s2099_s15  }
 0x2d7   : > { %p12_p4 = scmp.ge.s32.totalorder %s15_s15, 4  }
 0x2d9   :  { %14 = sbr.rel (!%p12_p4) target bundleno = 1 (0x1), region = 85 }

// kernel: down_forward.5
= control target key start
LH: loop header
LB: loop body
LE: loop exit
PB: predicated region body
PF: predicated region fallthrough
CT: control target
= control target key end

     0   :  { %s287_s12 = smov 0   ;;  %s310_s0 = inlined_call_operand.vmem [shape: f32[2,8,64], index: 0, kind: input, shape index: {}]   ;;  %s311_s1 = inlined_call_operand.vmem [shape: f32[8,1], index: 1, kind: input, shape index: {}]   ;;  %s312_s2 = inlined_call_operand.vmem [shape: f32[8,1], index: 2, kind: input, shape index: {}]   ;;  %s313_s3 = inlined_call_operand.vmem [shape: f32[2,8,64], index: 3, kind: output, shape index: {}]  }
   0x1 LB: > { %s239_s13 = sadd.s32 4294967295, %s264_s12   ;;  %p243_p0 = scmp.ge.s32.totalorder %s264_s12, 1  ;;  %s264_s12 = sphi %s287_s12, %s13_s12  }
   0x2   : > { %p136_p1 = scmp.lt.s32.totalorder %s264_s12, 3 }
   0x4   : > { %p137_p2 = pnand %p243_p0, %p136_p1 }
   0x5   : > { %p158_p3 = scmp.lt.s32.totalorder (!%p137_p2), %s239_s13, 1 }
   0x6   : > { %140 = sbr.rel (%p137_p2) target bundleno = 142 (0x8e), region = 32 }
   0xb   : > { %v167_v0 = vld [vmem:[%s311_s1] sm:$0xff]  ;;  %v266_v1 = vmov 0   ;;  %s315_s13 = smov (!%p158_p3, %s239_s13), 1  ;;  %vm184_vm0 = vcmask 523264  }
   0xc   : > { %257 = vset.pattern.permute.xlu0 %v266_v1  ;;  %v174_v2 = vld [vmem:[%s312_s2] sm:$0xff]  ;;  %s244_s18 = sshll.u32 %s315_s13, 3 }
   0xd   : > { %170 = vperm.xlu0 %257, %v167_v0   ;;  %s161_s21 = scalar_lea.vmem %s310_s0, %s244_s18  ;;  %s165_s24 = scalar_lea.vmem %s313_s3, %s244_s18 }
   0xe   : > { %v166_v4 = vld [vmem:[%s161_s21] sm:$0xff] }
  0x15   : > { %177 = vperm.xlu0 %257, %v174_v2  }
  0x7f   : > { %v171_v3 = vpop.permute.xlu0 %170 }
  0x80   : > { %v173_v5 = vmul.f32 %v171_v3, %v166_v4 }
  0x87   : > { %v178_v6 = vpop.permute.xlu0 %177 }
  0x88   : > { %v180_v7 = vadd.f32 %v178_v6, %v173_v5 }
  0x8a   : > { %vm181_vm1 = vcmp.ge.f32.partialorder %v180_v7, 0.0  ;;  %v182_v8 = vmul.f32 0.1, %v180_v7 }
  0x8c   : > { %v183_v9 = vsel %vm181_vm1, %v180_v7, %v182_v8 }
  0x8d   : > { %185 = vst.msk [vmem:[%s165_s24] sm:$0xff] %vm184_vm0, %v183_v9 }
  0x8e PF: > { %s13_s12 = sadd.s32 1, %s264_s12  }
  0x8f   : > { %p10_p4 = scmp.ge.s32.totalorder %s13_s12, 4  }
  0x91   :  { %12 = sbr.rel (!%p10_p4) target bundleno = 1 (0x1), region = 62 }

// kernel: down_forward.4
= control target key start
LH: loop header
LB: loop body
LE: loop exit
PB: predicated region body
PF: predicated region fallthrough
CT: control target
= control target key end

     0   :  { %s2610_s24 = smov 0   ;;  %s4107_s0 = inlined_call_operand.vmem [shape: f32[2,8,8,8], index: 0, kind: input, shape index: {}]   ;;  %s4108_s1 = inlined_call_operand.vmem [shape: f32[8,1], index: 1, kind: input, shape index: {}]   ;;  %s4109_s2 = inlined_call_operand.vmem [shape: f32[8,1], index: 2, kind: input, shape index: {}]   ;;  %s4110_s3 = inlined_call_operand.vmem [shape: f32[3,8,24], index: 3, kind: input, shape index: {}]   ;;  %s4111_s4 = inlined_call_operand.vmem [shape: f32[8,1], index: 4, kind: input, shape index: {}]   ;;  %s4112_s5 = inlined_call_operand.vmem [shape: f32[2,8,64], index: 5, kind: output, shape index: {0}]   ;;  %s4113_s6 = inlined_call_operand.vmem [shape: f32[2,8,1], index: 6, kind: output, shape index: {1}]   ;;  %s4114_s7 = inlined_call_operand.vmem [shape: f32[2,8,1], index: 7, kind: output, shape index: {2}]  }
   0x1 LB: > { %s2245_s25 = sadd.s32 4294967295, %s2554_s24   ;;  %p2249_p0 = scmp.ge.s32.totalorder %s2554_s24, 1  ;;  %s2554_s24 = sphi %s2610_s24, %s18_s24  }
   0x2   : > { %p242_p1 = scmp.lt.s32.totalorder %s2554_s24, 3 }
   0x4   : > { %p243_p2 = pnand %p2249_p0, %p242_p1 }
   0x6   : > { %246 = sbr.rel (%p243_p2) target bundleno = 1058 (0x422), region = 40 }
   0xb   : > { %v306_v0 = vld [vmem:[%s4108_s1] sm:$0xff]  ;;  %v2556_v1 = vmov 0   ;;  %p281_p3 = scmp.lt.s32.totalorder %s2245_s25, 1  ;;  %s2557_s13 = smov 1   ;;  %vm444_vm4 = vcmask 80896   ;;  %vm446_vm5 = vcmask 74752  }
   0xc   : > { %2285 = vset.pattern.permute.xlu0 %v2556_v1  ;;  %v315_v2 = vperm.slane %v306_v0, 0  ;;  %2287 = vset.pattern.permute.xlu2 %v2556_v1  ;;  %v311_v3 = vrot.slane %v306_v0, 4  ;;  %v309_v4 = vrot.slane %v306_v0, 2  ;;  %v308_v7 = vrot.slane %v306_v0, 1  ;;  %v363_v13 = vld [vmem:[%s4109_s2] sm:$0xff]  ;;  %s2559_s18 = smov 127  }
   0xd   : > { %2286 = vset.pattern.permute.xlu1 %v2556_v1  ;;  %v312_v8 = vrot.slane %v306_v0, 5  ;;  %v310_v9 = vrot.slane %v306_v0, 3  ;;  %v313_v14 = vrot.slane %v306_v0, 6  ;;  %v367_v15 = vrot.slane %v363_v13, 3  ;;  %v503_v33 = vld [vmem:[%s4111_s4] sm:$0xff]  ;;  %s4248_s25 = smov (!%p281_p3, %s2245_s25), 1 }
   0xe   : > { %324 = vperm.xlu0 %2285, %v315_v2   ;;  %v319_v5 = vperm.slane %v311_v3, 0  ;;  %v317_v6 = vperm.slane %v309_v4, 0  ;;  %v316_v10 = vperm.slane %v308_v7, 0  ;;  %v314_v16 = vrot.slane %v306_v0, 7  ;;  %s2262_s9 = sshll.u32 %s4248_s25, 6  ;;  %s2666_s14 = sshll.u32 %s4248_s25, 3 }
   0xf   : > { %v320_v11 = vperm.slane %v312_v8, 0  ;;  %v318_v12 = vperm.slane %v310_v9, 0  ;;  %v321_v17 = vperm.slane %v313_v14, 0  ;;  %v375_v18 = vperm.slane %v367_v15, 0  ;;  %s2637_s12 = scalar_lea.vmem %s4107_s0, %s2262_s9  ;;  %s2676_s17 = scalar_lea.vmem %s4112_s5, %s2666_s14 }
  0x10   : > { %340 = vperm.xlu2 %2287, %v319_v5   ;;  %332 = vperm.xlu1 %2286, %v317_v6   ;;  %v322_v19 = vperm.slane %v314_v16, 0  ;;  %v370_v20 = vrot.slane %v363_v13, 6  ;;  %v366_v21 = vrot.slane %v363_v13, 2  ;;  %v365_v22 = vrot.slane %v363_v13, 1  ;;  %v301_v40 = vld [vmem:[%s2637_s12 + $0x18] sm:$0xff]  ;;  %v300_v41 = vld [vmem:[%s2637_s12 + $0x10] sm:$0xff] }
  0x11   : > { %v371_v26 = vrot.slane %v363_v13, 7  ;;  %v369_v27 = vrot.slane %v363_v13, 5  ;;  %v368_v28 = vrot.slane %v363_v13, 4  ;;  %v372_v32 = vperm.slane %v363_v13, 0  ;;  %v303_v52 = vld [vmem:[%s2637_s12 + $0x28] sm:$0xff]  ;;  %v302_v1 = vld [vmem:[%s2637_s12 + $0x20] sm:$0xff] }
  0x12   : > { %v378_v23 = vperm.slane %v370_v20, 0  ;;  %v374_v24 = vperm.slane %v366_v21, 0  ;;  %v373_v25 = vperm.slane %v365_v22, 0  ;;  %v299_v54 = vld [vmem:[%s2637_s12 + $0x8] sm:$0xff]  ;;  %v2558_v3 = vmov 0.0   ;;  %v298_v9 = vld [vmem:[%s2637_s12] sm:$0xff] }
  0x13   : > { %v379_v29 = vperm.slane %v371_v26, 0  ;;  %v377_v30 = vperm.slane %v369_v27, 0  ;;  %v376_v31 = vperm.slane %v368_v28, 0  ;;  %452 = vst.msk [vmem:[#allocation2 + $0x30] sm:$0xff] %vm444_vm4, %v2558_v3  ;;  %v304_v13 = vld [vmem:[%s2637_s12 + $0x30] sm:$0xff]  ;;  %vm509_vm8 = vcmask 523264  }
  0x14   : > { %453 = vst.msk [vmem:[#allocation2 + $0x38] sm:$0x3] %vm446_vm5, %v2558_v3  ;;  %v305_v20 = vld [vmem:[%s2637_s12 + $0x38] sm:$0xff]  ;;  %vm494_vm11 = vcmask 72712   ;;  %vm576_vm12 = vcmask 1047556   ;;  %s2560_s19 = smov 126  }
  0x15   : > { %445 = vst.msk [vmem:[#allocation2] sm:$0xff] %vm444_vm4, %v2558_v3  ;;  %s2563_s20 = smov 8   ;;  %s2564_s21 = smov 24   ;;  %vm996_vm13 = vcmask 64512   ;;  %vm1000_vm14 = vcmask 130048   ;;  %vm1004_vm15 = vcmask 195584  }
  0x16   : > { %328 = vperm.xlu0 %2285, %v316_v10   ;;  %447 = vst.msk [vmem:[#allocation2 + $0x8] sm:$0x3] %vm446_vm5, %v2558_v3  ;;  %s2565_s22 = smov 16   ;;  %s2566_s23 = smov 32  }
  0x17   : > { %448 = vst.msk [vmem:[#allocation2 + $0x10] sm:$0xff] %vm444_vm4, %v2558_v3  ;;  %s2567_s25 = smov 56   ;;  %s2568_s26 = smov 40  }
  0x18   : > { %344 = vperm.xlu2 %2287, %v320_v11   ;;  %336 = vperm.xlu1 %2286, %v318_v12   ;;  %449 = vst.msk [vmem:[#allocation2 + $0x18] sm:$0x3] %vm446_vm5, %v2558_v3  ;;  %s2569_s27 = smov 48  }
  0x19   : > { %450 = vst.msk [vmem:[#allocation2 + $0x20] sm:$0xff] %vm444_vm4, %v2558_v3 }
  0x1a   : > { %451 = vst.msk [vmem:[#allocation2 + $0x28] sm:$0x3] %vm446_vm5, %v2558_v3 }
  0x1b   : > { %454 = vst.msk [vmem:[#allocation2 + $0x40] sm:$0xff] %vm444_vm4, %v2558_v3 }
  0x1c   : > { %455 = vst.msk [vmem:[#allocation2 + $0x48] sm:$0x3] %vm446_vm5, %v2558_v3 }
  0x1d   : > { %456 = vst.msk [vmem:[#allocation2 + $0x50] sm:$0xff] %vm444_vm4, %v2558_v3 }
  0x1e   : > { %348 = vperm.xlu0 %2285, %v321_v17   ;;  %457 = vst.msk [vmem:[#allocation2 + $0x58] sm:$0x3] %vm446_vm5, %v2558_v3 }
  0x1f   : > { %458 = vst.msk [vmem:[#allocation2 + $0x60] sm:$0xff] %vm444_vm4, %v2558_v3 }
  0x20   : > { %393 = vperm.xlu2 %2287, %v375_v18   ;;  %352 = vperm.xlu1 %2286, %v322_v19   ;;  %459 = vst.msk [vmem:[#allocation2 + $0x68] sm:$0x3] %vm446_vm5, %v2558_v3 }
  0x21   : > { %460 = vst.msk [vmem:[#allocation2 + $0x70] sm:$0xff] %vm444_vm4, %v2558_v3  ;;  %vm2123_vm4 = vcmask 7168  }
  0x22   : > { %461 = vst.msk [vmem:[#allocation2 + $0x78] sm:$0x3] %vm446_vm5, %v2558_v3 }
  0x26   : > { %405 = vperm.xlu0 %2285, %v378_v23  }
  0x28   : > { %389 = vperm.xlu2 %2287, %v374_v24   ;;  %385 = vperm.xlu1 %2286, %v373_v25  }
  0x2e   : > { %409 = vperm.xlu0 %2285, %v379_v29  }
  0x30   : > { %401 = vperm.xlu2 %2287, %v377_v30   ;;  %397 = vperm.xlu1 %2286, %v376_v31  }
  0x36   : > { %381 = vperm.xlu0 %2285, %v372_v32  }
  0x3e   : > { %506 = vperm.xlu0 %2285, %v503_v33  }
  0x6a   : > { %v341_v34 = vpop.permute.xlu2 %340 }
  0x6b   : > { %v359_v5 = vmul.f32 %v341_v34, %v302_v1 }
  0x72   : > { %v345_v35 = vpop.permute.xlu2 %344 }
  0x73   : > { %v360_v56 = vmul.f32 %v345_v35, %v303_v52 }
  0x7a   : > { %v394_v37 = vpop.permute.xlu2 %393 }
  0x80   : > { %v325_v36 = vpop.permute.xlu0 %324 }
  0x81   : > { %v355_v11 = vmul.f32 %v325_v36, %v298_v9 }
  0x82   : > { %v333_v38 = vpop.permute.xlu1 %332  ;;  %v390_v44 = vpop.permute.xlu2 %389 }
  0x83   : > { %v357_v45 = vmul.f32 %v333_v38, %v300_v41 }
  0x85   : > { %v414_v49 = vadd.f32 %v390_v44, %v357_v45 }
  0x87   : > { %v430_v53 = vmul.f32 0.1, %v414_v49  ;;  %vm422_vm1 = vcmp.ge.f32.partialorder %v414_v49, 0.0 }
  0x88   : > { %v329_v39 = vpop.permute.xlu0 %328 }
  0x89   : > { %v356_v58 = vmul.f32 %v329_v39, %v299_v54  ;;  %v438_v60 = vsel %vm422_vm1, %v414_v49, %v430_v53  ;;  %vm1012_vm1 = vcmask 326656  }
  0x8a   : > { %v337_v42 = vpop.permute.xlu1 %336  ;;  %v402_v55 = vpop.permute.xlu2 %401 }
  0x8b   : > { %v358_v43 = vmul.f32 %v337_v42, %v301_v40  ;;  %v417_v59 = vadd.f32 %v402_v55, %v360_v56 }
  0x8d   : > { %v415_v46 = vadd.f32 %v394_v37, %v358_v43  ;;  %v433_v63 = vmul.f32 0.1, %v417_v59  ;;  %vm425_vm3 = vcmp.ge.f32.partialorder %v417_v59, 0.0 }
  0x8f   : > { %vm423_vm0 = vcmp.ge.f32.partialorder %v415_v46, 0.0  ;;  %v431_v47 = vmul.f32 0.1, %v415_v46  ;;  %v441_v6 = vsel %vm425_vm3, %v417_v59, %v433_v63  ;;  %vm1020_vm3 = vcmask 457728  }
  0x90   : > { %v349_v48 = vpop.permute.xlu0 %348 }
  0x91   : > { %v439_v50 = vsel %vm423_vm0, %v415_v46, %v431_v47  ;;  %v361_v16 = vmul.f32 %v349_v48, %v304_v13  ;;  %vm1008_vm0 = vcmask 261120  }
  0x92   : > { %v2641_v51 = vpop.permute.xlu1 %352  ;;  %476 = vrot.lane.b32.xlu1 %v439_v50, %s2557_s13 }
  0x93   : > { %v362_v23 = vmul.f32 %v2641_v51, %v305_v20 }
  0x98   : > { %v406_v57 = vpop.permute.xlu0 %405 }
  0x99   : > { %v418_v18 = vadd.f32 %v406_v57, %v361_v16 }
  0x9a   : > { %v386_v61 = vpop.permute.xlu1 %385  ;;  %474 = vrot.lane.b32.xlu1 %v438_v60, %s2557_s13 }
  0x9b   : > { %v413_v62 = vadd.f32 %v386_v61, %v356_v58  ;;  %v434_v22 = vmul.f32 0.1, %v418_v18  ;;  %vm426_vm9 = vcmp.ge.f32.partialorder %v418_v18, 0.0 }
  0x9d   : > { %v429_v0 = vmul.f32 0.1, %v413_v62  ;;  %vm421_vm2 = vcmp.ge.f32.partialorder %v413_v62, 0.0  ;;  %v442_v25 = vsel %vm426_vm9, %v418_v18, %v434_v22 }
  0x9f   : > { %v437_v2 = vsel %vm421_vm2, %v413_v62, %v429_v0  ;;  %vm1016_vm2 = vcmask 392192  }
  0xa0   : > { %v410_v4 = vpop.permute.xlu0 %409  ;;  %472 = vrot.lane.b32.xlu0 %v437_v2, %s2557_s13 }
  0xa1   : > { %v419_v24 = vadd.f32 %v410_v4, %v362_v23 }
  0xa2   : > { %v398_v7 = vpop.permute.xlu1 %397  ;;  %480 = vrot.lane.b32.xlu1 %v441_v6, %s2557_s13 }
  0xa3   : > { %v416_v8 = vadd.f32 %v398_v7, %v359_v5  ;;  %v435_v26 = vmul.f32 0.1, %v419_v24  ;;  %vm427_vm10 = vcmp.ge.f32.partialorder %v419_v24, 0.0  ;;  %v2561_v5 = vmov 1983009808  }
  0xa4   : > { %v581_v6 = vunpack.c.l.s4 %v2561_v5 }
  0xa5   : > { %v432_v10 = vmul.f32 0.1, %v416_v8  ;;  %vm424_vm6 = vcmp.ge.f32.partialorder %v416_v8, 0.0  ;;  %v443_v27 = vsel %vm427_vm10, %v419_v24, %v435_v26 }
  0xa7   : > { %v440_v12 = vsel %vm424_vm6, %v416_v8, %v432_v10 }
  0xa8   : > { %v382_v14 = vpop.permute.xlu0 %381  ;;  %478 = vrot.lane.b32.xlu0 %v440_v12, %s2557_s13 }
  0xa9   : > { %v412_v15 = vadd.f32 %v382_v14, %v355_v11 }
  0xab   : > { %v428_v17 = vmul.f32 0.1, %v412_v15  ;;  %vm420_vm7 = vcmp.ge.f32.partialorder %v412_v15, 0.0 }
  0xad   : > { %v436_v19 = vsel %vm420_vm7, %v412_v15, %v428_v17 }
  0xae   : > { %470 = vrot.lane.b32.xlu2 %v436_v19, %s2557_s13 }
  0xb0   : > { %v507_v21 = vpop.permute.xlu0 %506 }
  0xb1   : > { %510 = vst.msk [vmem:[%s2676_s17] sm:$0xff] %vm509_vm8, %v507_v21 }
  0xb6   : > { %482 = vrot.lane.b32.xlu2 %v442_v25, %s2557_s13 }
  0xbe   : > { %484 = vrot.lane.b32.xlu2 %v443_v27, %s2557_s13  ;;  %s293_s13 = scalar_lea.vmem %s4113_s6, %s2666_s14 }
 0x104   : > { %v477_v28 = vpop.permute.xlu1 %476 }
 0x105   : > { %498 = vst.msk [vmem:[#allocation2 + $0x31] sm:$0xff] %vm494_vm11, %v477_v28 }
 0x108   : > { %v471_v29 = vpop.permute.xlu2 %470 }
 0x109   : > { %495 = vst.msk [vmem:[#allocation2 + $0x1] sm:$0xff] %vm494_vm11, %v471_v29 }
 0x10c   : > { %v475_v30 = vpop.permute.xlu1 %474  ;;  %v514_v33 = vld [vmem:[#allocation2 + $0x30] sm:$0xff] }
 0x10d   : > { %497 = vst.msk [vmem:[#allocation2 + $0x21] sm:$0xff] %vm494_vm11, %v475_v30  ;;  %v2717_v47 = vld [vmem:[#allocation2 + $0x31] sm:$0xff]  ;;  %v588_v51 = vrot.slane %v514_v33, 4  ;;  %v2787_v30 = vunpack.c.0.s8 %v581_v6 }
 0x10e   : > { %v1127_v55 = vrot.slane %v2717_v47, 4  ;;  %v2748_v1 = vld [vmem:[#allocation2 + $0x32] sm:$0xff] }
 0x10f   : > { %v1660_v13 = vrot.slane %v2748_v1, 4 }
 0x110   : > { %v483_v31 = vpop.permute.xlu2 %482  ;;  %v2688_v32 = vld [vmem:[#allocation2] sm:$0xff] }
 0x111   : > { %v2690_v34 = vld [vmem:[#allocation2 + $0x1] sm:$0xff]  ;;  %501 = vst.msk [vmem:[#allocation2 + $0x61] sm:$0xff] %vm494_vm11, %v483_v31  ;;  %v2288_v35 = vpack.i.bf16 %v514_v33, %v2688_v32  ;;  %v578_v37 = vrot.slane %v2688_v32, 4 }
 0x112   : > { %v473_v36 = vpop.permute.xlu0 %472  ;;  %v1117_v38 = vrot.slane %v2690_v34, 4 }
 0x113   : > { %496 = vst.msk [vmem:[#allocation2 + $0x11] sm:$0xff] %vm494_vm11, %v473_v36  ;;  %2289 = vrot.lane.b32.xlu1 %v2288_v35, %s2559_s18 }
 0x114   : > { %v481_v39 = vpop.permute.xlu1 %480  ;;  %v2698_v40 = vld [vmem:[#allocation2 + $0x20] sm:$0xff] }
 0x115   : > { %v2700_v41 = vld [vmem:[#allocation2 + $0x21] sm:$0xff]  ;;  %500 = vst.msk [vmem:[#allocation2 + $0x51] sm:$0xff] %vm494_vm11, %v481_v39  ;;  %v575_v42 = vrot.slane %v2698_v40, 4  ;;  %v2706_v43 = vsel %vm576_vm12, %v2698_v40, %v578_v37  ;;  %v2562_v39 = vmov 1934713408  }
 0x116   : > { %v1115_v44 = vrot.slane %v2700_v41, 4  ;;  %v2711_v45 = vsel %vm576_vm12, %v2700_v41, %v1117_v38  ;;  %v2751_v4 = vld [vmem:[#allocation2 + $0x22] sm:$0xff] }
 0x117   : > { %v2715_v46 = vsel %vm576_vm12, %v575_v42, %v2688_v32  ;;  %v1648_v21 = vrot.slane %v2751_v4, 4  ;;  %v2800_v37 = vld [vmem:[#allocation2 + $0x2] sm:$0xff]  ;;  %v629_v42 = vunpack.c.l.s4 %v2562_v39 }
 0x118   : > { %v2721_v48 = vsel %vm576_vm12, %v1115_v44, %v2690_v34  ;;  %v485_v49 = vpop.permute.xlu2 %484  ;;  %v517_v50 = vld [vmem:[#allocation2 + $0x60] sm:$0xff] }
 0x119   : > { %502 = vst.msk [vmem:[#allocation2 + $0x71] sm:$0xff] %vm494_vm11, %v485_v49  ;;  %v2293_v52 = vpack.i.bf16 %v517_v50, %v514_v33  ;;  %v1057_v3 = vld [vmem:[#allocation2 + $0x61] sm:$0xff]  ;;  %v600_v10 = vrot.slane %v517_v50, 4  ;;  %v2833_v5 = vunpack.c.0.s8 %v629_v42 }
 0x11a   : > { %v479_v53 = vpop.permute.xlu0 %478  ;;  %v512_v54 = vld [vmem:[#allocation2 + $0x10] sm:$0xff]  ;;  %v1139_v17 = vrot.slane %v1057_v3, 4  ;;  %v2771_v20 = vld [vmem:[#allocation2 + $0x62] sm:$0xff] }
 0x11b   : > { %v2725_v56 = vld [vmem:[#allocation2 + $0x11] sm:$0xff]  ;;  %499 = vst.msk [vmem:[#allocation2 + $0x41] sm:$0xff] %vm494_vm11, %v479_v53  ;;  %2294 = vrot.lane.b32.xlu2 %v2293_v52, %s2560_s19  ;;  %v2298_v57 = vpack.i.bf16 %v2698_v40, %v512_v54  ;;  %v2731_v58 = vsel %vm576_vm12, %v588_v51, %v512_v54  ;;  %v590_v59 = vrot.slane %v512_v54, 4  ;;  %v2308_v11 = vpack.i.bf16 %v512_v54, %v517_v50 }
 0x11c   : > { %v2733_v60 = vld [vmem:[#allocation2 + $0x50] sm:$0xff]  ;;  %v2737_v61 = vsel %vm576_vm12, %v1127_v55, %v2725_v56  ;;  %v1129_v62 = vrot.slane %v2725_v56, 4  ;;  %v1649_v51 = vsel %vm576_vm12, %v1648_v21, %v2800_v37  ;;  %v2818_v53 = vperm.slane %v2706_v43, %v2787_v30 }
 0x11d   : > { %2299 = vrot.lane.b32.xlu0 %v2298_v57, %s2560_s19  ;;  %v2742_v63 = vsel %vm576_vm12, %v514_v33, %v590_v59  ;;  %v614_v2 = vrot.slane %v2733_v60, 4  ;;  %v2764_v14 = vld [vmem:[#allocation2 + $0x12] sm:$0xff]  ;;  %v2313_v15 = vpack.i.bf16 %v2688_v32, %v2733_v60  ;;  %v1672_v33 = vrot.slane %v2771_v20, 4 }
 0x11e   : > { %v2746_v0 = vsel %vm576_vm12, %v2717_v47, %v1129_v62  ;;  %v1661_v29 = vsel %vm576_vm12, %v1660_v13, %v2764_v14  ;;  %v2792_v32 = vld [vmem:[#allocation2 + $0x51] sm:$0xff]  ;;  %v2823_v57 = vperm.slane %v1649_v51, %v2787_v30  ;;  %v2837_v6 = vperm.slane %v2731_v58, %v2787_v30 }
 0x11f   : > { %v2802_v38 = vld [vmem:[#allocation2 + $0x52] sm:$0xff]  ;;  %v2854_v58 = vperm.slane %v2737_v61, %v2787_v30 }
 0x120   : > { %v2753_v7 = vld [vmem:[#allocation2 + $0x70] sm:$0xff]  ;;  %v624_v21 = vrot.slane %v2837_v6, 4 }
 0x121   : > { %v2755_v8 = vld [vmem:[#allocation2 + $0x71] sm:$0xff]  ;;  %v2761_v12 = vsel %vm576_vm12, %v2753_v7, %v614_v2  ;;  %v2328_v2 = vpack.i.bf16 %v1057_v3, %v2717_v47  ;;  %v2318_v43 = vpack.i.bf16 %v2753_v7, %v2698_v40  ;;  %v583_v47 = vperm.slane %v2715_v46, %v2787_v30 }
 0x122   : > { %v2757_v9 = vld [vmem:[#allocation2 + $0x72] sm:$0xff]  ;;  %v515_v16 = vld [vmem:[#allocation2 + $0x40] sm:$0xff]  ;;  %v1151_v19 = vrot.slane %v2755_v8, 4  ;;  %v638_v40 = vrot.slane %v2818_v53, 4 }
 0x123   : > { %v2768_v18 = vld [vmem:[#allocation2 + $0x41] sm:$0xff]  ;;  %2309 = vrot.lane.b32.xlu2 %v2308_v11, %s2559_s18  ;;  %v601_v22 = vsel %vm576_vm12, %v600_v10, %v515_v16  ;;  %v602_v23 = vrot.slane %v515_v16, 4  ;;  %v2303_v24 = vpack.i.bf16 %v515_v16, %v2753_v7  ;;  %v1684_v25 = vrot.slane %v2757_v9, 4 }
 0x124   : > { %v2780_v26 = vsel %vm576_vm12, %v1139_v17, %v2768_v18  ;;  %v1141_v27 = vrot.slane %v2768_v18, 4  ;;  %v2783_v28 = vld [vmem:[#allocation2 + $0x42] sm:$0xff]  ;;  %v2798_v36 = vsel %vm576_vm12, %v1151_v19, %v2792_v32  ;;  %v2323_v54 = vpack.i.bf16 %v2733_v60, %v515_v16 }
 0x125   : > { %2314 = vrot.lane.b32.xlu0 %v2313_v15, %s2560_s19  ;;  %v603_v31 = vsel %vm576_vm12, %v517_v50, %v602_v23  ;;  %2304 = vrot.lane.b32.xlu1 %v2303_v24, %s2560_s19  ;;  %v1673_v44 = vsel %vm576_vm12, %v1672_v33, %v2783_v28  ;;  %v1685_v49 = vsel %vm576_vm12, %v1684_v25, %v2802_v38  ;;  %v612_v16 = vrot.slane %v2753_v7, 4 }
 0x126   : > { %v1142_v35 = vsel %vm576_vm12, %v1057_v3, %v1141_v27  ;;  %v2809_v50 = vperm.slane %v1661_v29, %v2787_v30  ;;  %v2814_v52 = vperm.slane %v1685_v49, %v2787_v30  ;;  %v2826_v59 = vperm.slane %v1673_v44, %v2787_v30 }
 0x127   : > { %v2841_v10 = vperm.slane %v2711_v45, %v2787_v30  ;;  %v1153_v3 = vrot.slane %v2792_v32, 4  ;;  %v2862_v15 = vperm.slane %v2721_v48, %v2787_v30  ;;  %v2865_v46 = vperm.slane %v1142_v35, %v2787_v30 }
 0x128   : > { %v1696_v55 = vrot.slane %v2809_v50, 4  ;;  %v1720_v62 = vrot.slane %v2814_v52, 4  ;;  %v2874_v19 = vperm.slane %v2746_v0, %v2787_v30  ;;  %v2338_v48 = vpack.i.bf16 %v2700_v41, %v2725_v56 }
 0x129   : > { %v1154_v23 = vsel %vm576_vm12, %v2755_v8, %v1153_v3  ;;  %v623_v7 = vperm.slane %v2761_v12, %v2787_v30  ;;  %v1163_v24 = vrot.slane %v2854_v58, 4  ;;  %v1177_v0 = vrot.slane %v2841_v10, 4 }
 0x12a   : > { %v1697_v11 = vsel %vm576_vm12, %v1696_v55, %v2823_v57  ;;  %v1721_v13 = vsel %vm576_vm12, %v1720_v62, %v2826_v59  ;;  %v607_v27 = vperm.slane %v601_v22, %v2787_v30  ;;  %v2891_v29 = vperm.slane %v1154_v23, %v2787_v30 }
 0x12b   : > { %2324 = vrot.lane.b32.xlu2 %v2323_v54, %s2559_s18  ;;  %v2857_v45 = vperm.slane %v1721_v13, %v2833_v5  ;;  %v2869_v17 = vperm.slane %v1697_v11, %v2833_v5  ;;  %v1201_v41 = vrot.slane %v2865_v46, 4  ;;  %v599_v56 = vperm.slane %v2742_v63, %v2787_v30 }
 0x12c   : > { %v2343_v12 = vpack.i.bf16 %v2768_v18, %v2755_v8  ;;  %v1178_v33 = vsel %vm576_vm12, %v2874_v19, %v1177_v0  ;;  %v611_v35 = vperm.slane %v603_v31, %v2787_v30  ;;  %v613_v22 = vsel %vm576_vm12, %v612_v16, %v2733_v60 }
 0x12d   : > { %2329 = vrot.lane.b32.xlu0 %v2328_v2, %s2560_s19  ;;  %2319 = vrot.lane.b32.xlu1 %v2318_v43, %s2559_s18  ;;  %v1744_v61 = vrot.slane %v2857_v45, 4  ;;  %v2905_v39 = vperm.slane %v1178_v33, %v2833_v5  ;;  %v1202_v42 = vsel %vm576_vm12, %v2891_v29, %v1201_v41  ;;  %v639_v63 = vsel %vm576_vm12, %v599_v56, %v638_v40 }
 0x12e   : > { %v626_v44 = vrot.slane %v583_v47, 4  ;;  %v2913_v8 = vperm.slane %v1202_v42, %v2833_v5  ;;  %v2916_v18 = vperm.slane %v639_v63, %v2833_v5  ;;  %v662_v60 = vrot.slane %v611_v35, 4 }
 0x12f   : > { %v2886_v25 = vsel %vm576_vm12, %v1744_v61, %v2869_v17  ;;  %v619_v31 = vperm.slane %v613_v22, %v2787_v30  ;;  %v1225_v49 = vrot.slane %v2905_v39, 4  ;;  %v650_v54 = vrot.slane %v607_v27, 4 }
 0x130   : > { %v627_v51 = vsel %vm576_vm12, %v2837_v6, %v626_v44  ;;  %v636_v55 = vrot.slane %v599_v56, 4  ;;  %v663_v62 = vsel %vm576_vm12, %v623_v7, %v662_v60  ;;  %v660_v11 = vrot.slane %v623_v7, 4 }
 0x131   : > { %v2925_v43 = vperm.slane %v627_v51, %v2833_v5  ;;  %v2929_v13 = vsel %vm576_vm12, %v2913_v8, %v1225_v49  ;;  %v2932_v40 = vperm.slane %v663_v62, %v2833_v5  ;;  %v651_v3 = vsel %vm576_vm12, %v619_v31, %v650_v54 }
 0x132   : > { %v637_v6 = vsel %vm576_vm12, %v636_v55, %v2818_v53  ;;  %v2938_v16 = vperm.slane %v651_v3, %v2833_v5  ;;  %v661_v7 = vsel %vm576_vm12, %v660_v11, %v611_v35  ;;  %v1164_v53 = vsel %vm576_vm12, %v1163_v24, %v2862_v15 }
 0x133   : > { %2339 = vrot.lane.b32.xlu2 %v2338_v48, %s2560_s19  ;;  %v678_v61 = vrot.slane %v2925_v43, 4  ;;  %v2942_v23 = vperm.slane %v637_v6, %v2833_v5  ;;  %v2950_v41 = vperm.slane %v661_v7, %v2833_v5  ;;  %v625_v56 = vsel %vm576_vm12, %v624_v21, %v583_v47 }
 0x134   : > { %v2348_v33 = vpack.i.bf16 %v2690_v34, %v2792_v32  ;;  %v2965_v42 = vperm.slane %v2798_v36, %v2787_v30  ;;  %v2974_v34 = vperm.slane %v1164_v53, %v2833_v5  ;;  %v2977_v32 = vperm.slane %v625_v56, %v2833_v5 }
 0x135   : > { %2344 = vrot.lane.b32.xlu0 %v2343_v12, %s2560_s19  ;;  %2334 = vrot.lane.b32.xlu1 %v2328_v2, %s2559_s18  ;;  %v686_v2 = vrot.slane %v2916_v18, 4  ;;  %v2960_v35 = vsel %vm576_vm12, %v2938_v16, %v678_v61  ;;  %v682_v22 = vrot.slane %v2942_v23, 4  ;;  %v2981_v21 = vperm.slane %v2780_v26, %v2787_v30 }
 0x136   : > { %v1187_v36 = vrot.slane %v2965_v42, 4  ;;  %v2373_v24 = vpack.i.bf16 %v2771_v20, %v2748_v1  ;;  %v1662_v63 = vrot.slane %v2764_v14, 4  ;;  %v1213_v49 = vrot.slane %v2974_v34, 4 }
 0x137   : > { %v2947_v0 = vsel %vm576_vm12, %v2932_v40, %v686_v2  ;;  %v2971_v47 = vsel %vm576_vm12, %v2950_v41, %v682_v22  ;;  %v674_v51 = vrot.slane %v2977_v32, 4  ;;  %v1175_v54 = vrot.slane %v2874_v19, 4 }
 0x138   : > { %v1188_v44 = vsel %vm576_vm12, %v1187_v36, %v2981_v21  ;;  %v1663_v2 = vsel %vm576_vm12, %v2748_v1, %v1662_v63  ;;  %v1674_v11 = vrot.slane %v2783_v28, 4  ;;  %v1686_v3 = vrot.slane %v2802_v38, 4 }
 0x139   : > { %v2993_v26 = vperm.slane %v1188_v44, %v2833_v5  ;;  %v1176_v19 = vsel %vm576_vm12, %v1175_v54, %v2841_v10  ;;  %v2383_v61 = vpack.i.bf16 %v2783_v28, %v2757_v9  ;;  %v1671_v53 = vperm.slane %v1663_v2, %v2787_v30 }
 0x13a   : > { %v1687_v7 = vsel %vm576_vm12, %v2757_v9, %v1686_v3  ;;  %v3026_v56 = vperm.slane %v1176_v19, %v2833_v5  ;;  %v1165_v1 = vrot.slane %v2862_v15, 4  ;;  %v1199_v10 = vrot.slane %v2891_v29, 4 }
 0x13b   : > { %2354 = vrot.lane.b32.xlu2 %v2338_v48, %s2559_s18  ;;  %v648_v48 = vrot.slane %v619_v31, 4  ;;  %v3007_v55 = vsel %vm576_vm12, %v2993_v26, %v1213_v49  ;;  %v2378_v28 = vpack.i.bf16 %v2751_v4, %v2764_v14  ;;  %v1722_v22 = vrot.slane %v2826_v59, 4 }
 0x13c   : > { %v1675_v9 = vsel %vm576_vm12, %v2771_v20, %v1674_v11  ;;  %v1695_v36 = vperm.slane %v1687_v7, %v2787_v30  ;;  %v1200_v15 = vsel %vm576_vm12, %v1199_v10, %v2865_v46  ;;  %v1166_v29 = vsel %vm576_vm12, %v2854_v58, %v1165_v1 }
 0x13d   : > { %2359 = vrot.lane.b32.xlu0 %v2343_v12, %s2559_s18  ;;  %2349 = vrot.lane.b32.xlu1 %v2348_v33, %s2560_s19  ;;  %v1650_v12 = vrot.slane %v2800_v37, 4  ;;  %v649_v60 = vsel %vm576_vm12, %v648_v48, %v607_v27  ;;  %v1221_v14 = vrot.slane %v3026_v56, 4  ;;  %v1698_v20 = vrot.slane %v2823_v57, 4 }
 0x13e   : > { %v2997_v31 = vperm.slane %v649_v60, %v2833_v5  ;;  %v1683_v59 = vperm.slane %v1675_v9, %v2787_v30  ;;  %v1723_v46 = vsel %vm576_vm12, %v2814_v52, %v1722_v22  ;;  %v680_v58 = vrot.slane %v2950_v41, 4 }
 0x13f   : > { %v1651_v27 = vsel %vm576_vm12, %v2751_v4, %v1650_v12  ;;  %v1206_v4 = vperm.slane %v1200_v15, %v2833_v5  ;;  %v1699_v12 = vsel %vm576_vm12, %v2809_v50, %v1698_v20  ;;  %v1732_v44 = vrot.slane %v1695_v36, 4 }
 0x140   : > { %v3011_v62 = vsel %vm576_vm12, %v2997_v31, %v674_v51  ;;  %v1659_v6 = vperm.slane %v1651_v27, %v2787_v30  ;;  %v3061_v57 = vsel %vm576_vm12, %v680_v58, %v2942_v23  ;;  %v1731_v60 = vperm.slane %v1723_v46, %v2833_v5 }
 0x141   : > { %v3052_v48 = vsel %vm576_vm12, %v1206_v4, %v1221_v14  ;;  %4141 = vst [vmem:[#allocation4_spill] sm:$0xff] %v3061_v57  ;;  %v1733_v52 = vsel %vm576_vm12, %v1732_v44, %v1683_v59  ;;  %v1174_v41 = vperm.slane %v1166_v29, %v2833_v5  ;;  %v1707_v49 = vperm.slane %v1699_v12, %v2833_v5 }
 0x142   : > { %4140 = vst [vmem:[#allocation3_spill] sm:$0xff] %v3052_v48  ;;  %v1189_v50 = vrot.slane %v2981_v21, 4  ;;  %v1746_v23 = vrot.slane %v2869_v17, 4  ;;  %v1748_v54 = vrot.slane %v1731_v60, 4  ;;  %v1739_v27 = vperm.slane %v1733_v52, %v2833_v5 }
 0x143   : > { %2369 = vrot.lane.b32.xlu2 %v2348_v33, %s2559_s18  ;;  %v2388_v33 = vpack.i.bf16 %v2800_v37, %v2802_v38  ;;  %v1708_v37 = vrot.slane %v1671_v53, 4  ;;  %v1710_v38 = vrot.slane %v1659_v6, 4  ;;  %v1217_v11 = vrot.slane %v1174_v41, 4 }
 0x144   : > { %v1190_v2 = vsel %vm576_vm12, %v2965_v42, %v1189_v50  ;;  %v1747_v21 = vsel %vm576_vm12, %v2857_v45, %v1746_v23  ;;  %v672_v17 = vrot.slane %v2997_v31, 4  ;;  %v676_v10 = vrot.slane %v2938_v16, 4 }
 0x145   : > { %2374 = vrot.lane.b32.xlu0 %v2373_v24, %s2559_s18  ;;  %2364 = vrot.lane.b32.xlu1 %v2373_v24, %s2560_s19  ;;  %v1711_v24 = vsel %vm576_vm12, %v1671_v53, %v1710_v38  ;;  %v1709_v63 = vsel %vm576_vm12, %v1708_v37, %v1659_v6  ;;  %v1198_v19 = vperm.slane %v1190_v2, %v2833_v5  ;;  %v1734_v6 = vrot.slane %v1683_v59, 4 }
 0x146   : > { %v1715_v51 = vperm.slane %v1709_v63, %v2833_v5  ;;  %v1719_v3 = vperm.slane %v1711_v24, %v2833_v5  ;;  %v1211_v53 = vrot.slane %v2993_v26, 4  ;;  %v1749_v26 = vsel %vm576_vm12, %v1748_v54, %v1707_v49 }
 0x147   : > { %v3083_v1 = vsel %vm576_vm12, %v1198_v19, %v1217_v11  ;;  %v1735_v42 = vsel %vm576_vm12, %v1695_v36, %v1734_v6  ;;  %v1219_v9 = vrot.slane %v1206_v4, 4  ;;  %v3096_v36 = vsel %vm576_vm12, %v676_v10, %v2925_v43 }
 0x148   : > { %v1754_v7 = vrot.slane %v1715_v51, 4  ;;  %4142 = vst [vmem:[#allocation5_spill] sm:$0xff] %v3083_v1  ;;  %v1743_v22 = vperm.slane %v1735_v42, %v2833_v5  ;;  %v1758_v31 = vrot.slane %v1719_v3, 4  ;;  %v1223_v16 = vrot.slane %v2913_v8, 4 }
 0x149   : > { %4144 = vst [vmem:[#allocation7_spill] sm:$0xff] %v3096_v36  ;;  %v684_v15 = vrot.slane %v2932_v40, 4  ;;  %v3110_v43 = vsel %vm576_vm12, %v1219_v9, %v3026_v56  ;;  %v3114_v8 = vsel %vm576_vm12, %v672_v17, %v2977_v32  ;;  %v1752_v40 = vrot.slane %v1739_v27, 4 }
 0x14a   : > { %v3106_v37 = vsel %vm576_vm12, %v1743_v22, %v1758_v31  ;;  %4147 = vst [vmem:[#allocation10_spill] sm:$0xff] %v3110_v43  ;;  %v1756_v4 = vrot.slane %v1743_v22, 4  ;;  %v3118_v14 = vsel %vm576_vm12, %v1223_v16, %v2905_v39  ;;  %v3126_v20 = vsel %vm576_vm12, %v1211_v53, %v2974_v34 }
 0x14b   : > { %2384 = vrot.lane.b32.xlu2 %v2383_v61, %s2560_s19  ;;  %4146 = vst [vmem:[#allocation9_spill] sm:$0xff] %v3106_v37  ;;  %v3122_v38 = vsel %vm576_vm12, %v684_v15, %v2916_v18  ;;  %v1753_v59 = vsel %vm576_vm12, %v1752_v40, %v1715_v51 }
 0x14c   : > { %4148 = vst [vmem:[#allocation11_spill] sm:$0xff] %v3114_v8  ;;  %v3129_v56 = vsel %vm576_vm12, %v1756_v4, %v1719_v3 }
 0x14d   : > { %2389 = vrot.lane.b32.xlu0 %v2388_v33, %s2560_s19  ;;  %2379 = vrot.lane.b32.xlu1 %v2378_v28, %s2560_s19  ;;  %4149 = vst [vmem:[#allocation12_spill] sm:$0xff] %v3118_v14 }
 0x14e   : > { %4150 = vst [vmem:[#allocation13_spill] sm:$0xff] %v3122_v38 }
 0x14f   : > { %4151 = vst [vmem:[#allocation14_spill] sm:$0xff] %v3126_v20 }
 0x150   : > { %4152 = vst [vmem:[#allocation15_spill] sm:$0xff] %v3129_v56 }
 0x153   : > { %2399 = vrot.lane.b32.xlu2 %v2383_v61, %s2559_s18  ;;  %v1750_v61 = vrot.slane %v1707_v49, 4 }
 0x155   : > { %2404 = vrot.lane.b32.xlu0 %v2388_v33, %s2559_s18  ;;  %2394 = vrot.lane.b32.xlu1 %v2378_v28, %s2559_s18  ;;  %v3088_v33 = vsel %vm576_vm12, %v1739_v27, %v1754_v7  ;;  %v1215_v28 = vrot.slane %v1198_v19, 4  ;;  %v1751_v45 = vsel %vm576_vm12, %v1731_v60, %v1750_v61 }
 0x156   : > { %4143 = vst [vmem:[#allocation6_spill] sm:$0xff] %v3088_v33 }
 0x157   : > { %v3101_v29 = vsel %vm576_vm12, %v1215_v28, %v1174_v41 }
 0x158   : > { %4145 = vst [vmem:[#allocation8_spill] sm:$0xff] %v3101_v29 }
 0x15b   : > { %1987 = vrot.lane.b32.xlu2 %v1747_v21, %s2563_s20 }
 0x15d   : > { %2011 = vrot.lane.b32.xlu0 %v1751_v45, %s2564_s21  ;;  %1999 = vrot.lane.b32.xlu1 %v1749_v26, %s2565_s22 }
 0x163   : > { %2023 = vrot.lane.b32.xlu2 %v1753_v59, %s2566_s23 }
 0x175   : > { %v3133_v32 = vpop.permute.xlu2 %2294 }
 0x176   : > { %v2296_v52 = vunpack.i.l.bf16 %v3133_v32  ;;  %v2297_v27 = vunpack.i.h.bf16 %v3133_v32 }
 0x178   : > { %v812_v21 = vrot.slane %v2296_v52, 4  ;;  %v824_v22 = vrot.slane %v2297_v27, 4 }
 0x17d   : > { %v2310_v39 = vpop.permute.xlu2 %2309 }
 0x17e   : > { %v2312_v24 = vunpack.i.h.bf16 %v2310_v39  ;;  %v2311_v12 = vunpack.i.l.bf16 %v2310_v39 }
 0x180   : > { %v702_v60 = vrot.slane %v2312_v24, 4  ;;  %v712_v41 = vrot.slane %v2311_v12, 4 }
 0x185   : > { %v3135_v46 = vpop.permute.xlu2 %2324  ;;  %v3139_v18 = vpop.permute.xlu1 %2289 }
 0x186   : > { %v2326_v63 = vunpack.i.l.bf16 %v3135_v46  ;;  %v2292_v44 = vunpack.i.h.bf16 %v3139_v18  ;;  %v4117_v2 = vunpack.i.l.bf16 %v3139_v18  ;;  %v4116_v11 = vunpack.i.h.bf16 %v3135_v46 }
 0x188   : > { %v714_v49 = vrot.slane %v2326_v63, 4  ;;  %v700_v51 = vrot.slane %v2292_v44, 4  ;;  %v703_v50 = vsel %vm576_vm12, %v2292_v44, %v702_v60  ;;  %v713_v19 = vsel %vm576_vm12, %v712_v41, %v2326_v63 }
 0x189   : > { %v3152_v61 = vperm.slane %v703_v50, %v2787_v30  ;;  %v3157_v42 = vperm.slane %v713_v19, %v2787_v30  ;;  %v690_v45 = vrot.slane %v4117_v2, 4  ;;  %v3163_v31 = vrot.slane %v4116_v11, 4 }
 0x18a   : > { %v715_v7 = vsel %vm576_vm12, %v2311_v12, %v714_v49  ;;  %v701_v17 = vsel %vm576_vm12, %v700_v51, %v2312_v24 }
 0x18b   : > { %4153 = vst [vmem:[#allocation16_spill] sm:$0xff] %v3157_v42  ;;  %v3166_v9 = vperm.slane %v715_v7, %v2787_v30  ;;  %v3170_v4 = vperm.slane %v701_v17, %v2787_v30 }
 0x18d   : > { %v3137_v58 = vpop.permute.xlu2 %2339  ;;  %4154 = vst [vmem:[#allocation17_spill] sm:$0xff] %v3170_v4 }
 0x18e   : > { %v4115_v59 = vunpack.i.h.bf16 %v3137_v58  ;;  %v2341_v44 = vunpack.i.l.bf16 %v3137_v58 }
 0x18f   : > { %v2300_v34 = vpop.permute.xlu0 %2299 }
 0x190   : > { %v2301_v23 = vunpack.i.l.bf16 %v2300_v34  ;;  %v2302_v53 = vunpack.i.h.bf16 %v2300_v34 }
 0x192   : > { %v814_v10 = vrot.slane %v2301_v23, 4  ;;  %v813_v16 = vsel %vm576_vm12, %v812_v21, %v2301_v23  ;;  %v800_v32 = vrot.slane %v2302_v53, 4 }
 0x193   : > { %v3180_v60 = vperm.slane %v813_v16, %v2787_v30  ;;  %v1353_v16 = vrot.slane %v2341_v44, 4 }
 0x194   : > { %v815_v24 = vsel %vm576_vm12, %v2296_v52, %v814_v10 }
 0x195   : > { %v3145_v54 = vpop.permute.xlu2 %2354  ;;  %4155 = vst [vmem:[#allocation18_spill] sm:$0xff] %v3180_v60  ;;  %v3193_v21 = vperm.slane %v815_v24, %v2787_v30 }
 0x196   : > { %v2357_v7 = vunpack.i.h.bf16 %v3145_v54  ;;  %v4118_v10 = vunpack.i.l.bf16 %v3145_v54 }
 0x197   : > { %v2315_v3 = vpop.permute.xlu0 %2314  ;;  %v2305_v6 = vpop.permute.xlu1 %2304 }
 0x198   : > { %v2317_v28 = vunpack.i.h.bf16 %v2315_v3  ;;  %v2307_v26 = vunpack.i.h.bf16 %v2305_v6  ;;  %v2316_v15 = vunpack.i.l.bf16 %v2315_v3  ;;  %v2306_v12 = vunpack.i.l.bf16 %v2305_v6 }
 0x199   : > { %v3190_v6 = vrot.slane %v4115_v59, 4 }
 0x19a   : > { %v802_v34 = vrot.slane %v2317_v28, 4  ;;  %v801_v41 = vsel %vm576_vm12, %v800_v32, %v2317_v28  ;;  %v826_v49 = vrot.slane %v2307_v26, 4  ;;  %v838_v50 = vrot.slane %v2316_v15, 4 }
 0x19b   : > { %v825_v23 = vsel %vm576_vm12, %v824_v22, %v2307_v26  ;;  %v3200_v22 = vperm.slane %v801_v41, %v2787_v30  ;;  %v836_v26 = vrot.slane %v2306_v12, 4  ;;  %v1241_v32 = vrot.slane %v4118_v10, 4 }
 0x19c   : > { %v803_v28 = vsel %vm576_vm12, %v2302_v53, %v802_v34  ;;  %v827_v59 = vsel %vm576_vm12, %v2297_v27, %v826_v49  ;;  %v3205_v24 = vperm.slane %v825_v23, %v2787_v30  ;;  %v839_v39 = vsel %vm576_vm12, %v2306_v12, %v838_v50 }
 0x19d   : > { %v3176_v63 = vpop.permute.xlu2 %2369  ;;  %4156 = vst [vmem:[#allocation19_spill] sm:$0xff] %v3200_v22  ;;  %v1227_v53 = vrot.slane %v2357_v7, 4  ;;  %v3210_v34 = vperm.slane %v803_v28, %v2787_v30  ;;  %v3216_v49 = vperm.slane %v827_v59, %v2787_v30  ;;  %v837_v12 = vsel %vm576_vm12, %v836_v26, %v2316_v15 }
 0x19e   : > { %v2372_v19 = vunpack.i.h.bf16 %v3176_v63  ;;  %4157 = vst [vmem:[#allocation20_spill] sm:$0xff] %v3205_v24  ;;  %v3220_v50 = vperm.slane %v839_v39, %v2787_v30  ;;  %v3234_v39 = vperm.slane %v837_v12, %v2787_v30 }
 0x19f   : > { %v3186_v52 = vpop.permute.xlu0 %2329  ;;  %v2320_v3 = vpop.permute.xlu1 %2319  ;;  %v862_v15 = vrot.slane %v3210_v34, 4 }
 0x1a0   : > { %v2331_v17 = vunpack.i.l.bf16 %v3186_v52  ;;  %v1229_v51 = vrot.slane %v2372_v19, 4  ;;  %v2321_v11 = vunpack.i.l.bf16 %v2320_v3  ;;  %v2322_v41 = vunpack.i.h.bf16 %v2320_v3  ;;  %4158 = vst [vmem:[#allocation21_spill] sm:$0xff] %v3234_v39 }
 0x1a1   : > { %v4119_v3 = vunpack.i.l.bf16 %v3176_v63 }
 0x1a2   : > { %v1351_v40 = vrot.slane %v2331_v17, 4  ;;  %v1354_v2 = vsel %vm576_vm12, %v2331_v17, %v1353_v16  ;;  %v691_v28 = vsel %vm576_vm12, %v2321_v11, %v690_v45  ;;  %v1230_v10 = vsel %vm576_vm12, %v2357_v7, %v1229_v51 }
 0x1a3   : > { %v688_v20 = vrot.slane %v2321_v11, 4  ;;  %v2332_v17 = vunpack.i.h.bf16 %v3186_v52  ;;  %v724_v26 = vrot.slane %v2322_v41, 4  ;;  %v1228_v16 = vsel %vm576_vm12, %v1227_v53, %v2372_v19 }
 0x1a4   : > { %v1352_v27 = vsel %vm576_vm12, %v1351_v40, %v2341_v44  ;;  %v3241_v51 = vperm.slane %v1354_v2, %v2787_v30  ;;  %v699_v11 = vperm.slane %v691_v28, %v2787_v30  ;;  %v3248_v12 = vperm.slane %v1230_v10, %v2787_v30 }
 0x1a5   : > { %v3228_v59 = vpop.permute.xlu2 %2384  ;;  %v3251_v52 = vperm.slane %v1352_v27, %v2787_v30  ;;  %v1265_v19 = vrot.slane %v4119_v3, 4  ;;  %v4159_v2 = vunpack.i.l.bf16 %v3139_v18  ;;  %v727_v28 = vsel %vm576_vm12, %v2322_v41, %v3163_v31 }
 0x1a6   : > { %v4120_v44 = vunpack.i.h.bf16 %v3228_v59  ;;  %v3262_v23 = vperm.slane %v1228_v16, %v2787_v30  ;;  %v4160_v10 = vunpack.i.h.bf16 %v3135_v46  ;;  %v1363_v3 = vrot.slane %v2332_v17, 4 }
 0x1a7   : > { %v3230_v8 = vpop.permute.xlu0 %2344  ;;  %v3237_v45 = vpop.permute.xlu1 %2334  ;;  %v689_v53 = vsel %vm576_vm12, %v688_v20, %v4159_v2  ;;  %v750_v37 = vrot.slane %v699_v11, 4  ;;  %v863_v20 = vsel %vm576_vm12, %v3193_v21, %v862_v15  ;;  %v1289_v31 = vrot.slane %v3248_v12, 4 }
 0x1a8   : > { %v2347_v40 = vunpack.i.h.bf16 %v3230_v8  ;;  %v725_v27 = vsel %vm576_vm12, %v724_v26, %v4160_v10  ;;  %v2336_v56 = vunpack.i.l.bf16 %v3237_v45  ;;  %v3274_v16 = vperm.slane %v689_v53, %v2787_v30 }
 0x1a9   : > { %v3277_v46 = vperm.slane %v727_v28, %v2787_v30  ;;  %v3280_v26 = vperm.slane %v725_v27, %v2787_v30  ;;  %v3284_v2 = vrot.slane %v4120_v44, 4  ;;  %v2337_v27 = vunpack.i.h.bf16 %v3237_v45 }
 0x1aa   : > { %v1365_v7 = vrot.slane %v2347_v40, 4  ;;  %4161 = vst [vmem:[#allocation22_spill] sm:$0xff] %v3274_v16  ;;  %v1364_v15 = vsel %vm576_vm12, %v1363_v3, %v2347_v40  ;;  %v1239_v43 = vrot.slane %v2336_v56, 4  ;;  %v1242_v53 = vsel %vm576_vm12, %v2336_v56, %v1241_v32 }
 0x1ab   : > { %v751_v44 = vsel %vm576_vm12, %v3152_v61, %v750_v37  ;;  %v738_v10 = vrot.slane %v3274_v16, 4  ;;  %v4162_v3 = vrot.slane %v3152_v61, 4  ;;  %v3304_v32 = vperm.slane %v1364_v15, %v2787_v30 }
 0x1ac   : > { %v1366_v41 = vsel %vm576_vm12, %v2332_v17, %v1365_v7  ;;  %v3310_v7 = vperm.slane %v1242_v53, %v2787_v30  ;;  %v4167_v53 = vunpack.i.l.bf16 %v3228_v59  ;;  %v4168_v36 = vunpack.i.l.bf16 %v3230_v8 }
 0x1ad   : > { %v3292_v33 = vpop.permute.xlu2 %2399  ;;  %v3300_v17 = vsel %vm576_vm12, %v4162_v3, %v699_v11  ;;  %v3307_v45 = vperm.slane %v1366_v41, %v2787_v30  ;;  %v4165_v11 = vunpack.i.l.bf16 %v3145_v54  ;;  %v3322_v41 = vperm.slane %v751_v44, %v2833_v5 }
 0x1ae   : > { %4163 = vst [vmem:[#allocation23_spill] sm:$0xff] %v3310_v7  ;;  %v3326_v28 = vrot.slane %v4167_v53, 4  ;;  %v1375_v1 = vrot.slane %v4168_v36, 4  ;;  %v1251_v14 = vrot.slane %v2337_v27, 4  ;;  %v3342_v36 = vsel %vm576_vm12, %v3310_v7, %v1289_v31 }
 0x1af   : > { %v2360_v18 = vpop.permute.xlu0 %2359  ;;  %v2350_v40 = vpop.permute.xlu1 %2349  ;;  %v1240_v3 = vsel %vm576_vm12, %v1239_v43, %v4165_v11  ;;  %4166 = vst [vmem:[#allocation24_spill] sm:$0xff] %v3322_v41  ;;  %v4169_v54 = vunpack.i.h.bf16 %v3292_v33  ;;  %v798_v56 = vrot.slane %v3322_v41, 4  ;;  %v4171_v16 = vunpack.i.l.bf16 %v3176_v63 }
 0x1b0   : > { %v2362_v29 = vunpack.i.h.bf16 %v2360_v18  ;;  %v2361_v38 = vunpack.i.l.bf16 %v2360_v18  ;;  %v4164_v18 = vrot.slane %v3166_v9, 4  ;;  %v2352_v57 = vunpack.i.h.bf16 %v2350_v40 }
 0x1b1   : > { %v2351_v43 = vunpack.i.l.bf16 %v2350_v40  ;;  %v3336_v44 = vperm.slane %v1240_v3, %v2787_v30  ;;  %v1786_v48 = vrot.slane %v4169_v54, 4  ;;  %v4170_v40 = vunpack.i.l.bf16 %v3292_v33 }
 0x1b2   : > { %v1253_v37 = vrot.slane %v2362_v29, 4  ;;  %v775_v61 = vsel %vm576_vm12, %v3277_v46, %v4164_v18  ;;  %v1263_v18 = vrot.slane %v2361_v38, 4  ;;  %v1252_v3 = vsel %vm576_vm12, %v1251_v14, %v2362_v29 }
 0x1b3   : > { %v3332_v11 = vperm.slane %v775_v61, %v2833_v5  ;;  %v3348_v61 = vrot.slane %v4170_v40, 4  ;;  %v3357_v31 = vperm.slane %v863_v20, %v2833_v5  ;;  %v1341_v54 = vrot.slane %v2352_v57, 4 }
 0x1b4   : > { %v1254_v15 = vsel %vm576_vm12, %v2337_v27, %v1253_v37  ;;  %v1264_v53 = vsel %vm576_vm12, %v1263_v18, %v4171_v16  ;;  %v1266_v27 = vsel %vm576_vm12, %v2361_v38, %v1265_v19  ;;  %v1377_v7 = vrot.slane %v2351_v43, 4 }
 0x1b5   : > { %4172 = vst [vmem:[#allocation25_spill] sm:$0xff] %v3357_v31  ;;  %v3360_v37 = vperm.slane %v1254_v15, %v2787_v30  ;;  %v4174_v40 = vrot.slane %v3216_v49, 4  ;;  %v799_v14 = vsel %vm576_vm12, %v3332_v11, %v798_v56  ;;  %v910_v63 = vrot.slane %v3357_v31, 4  ;;  %v1988_v31 = vpop.permute.xlu2 %1987 }
 0x1b6   : > { %v739_v19 = vsel %vm576_vm12, %v3170_v4, %v738_v10  ;;  %v4176_v16 = vrot.slane %v3157_v42, 4  ;;  %v4177_v18 = vrot.slane %v3200_v22, 4  ;;  %v1340_v42 = vsel %vm576_vm12, %v3190_v6, %v2352_v57 }
 0x1b7   : > { %4173 = vst [vmem:[#allocation26_spill] sm:$0xff] %v3360_v37  ;;  %v887_v41 = vsel %vm576_vm12, %v3220_v50, %v4174_v40  ;;  %v3366_v29 = vpop.permute.xlu0 %2374  ;;  %v3377_v20 = vperm.slane %v739_v19, %v2833_v5  ;;  %v3391_v10 = vpop.permute.xlu1 %2364  ;;  %v3394_v19 = vperm.slane %v1264_v53, %v2787_v30  ;;  %v3414_v6 = vsel %vm996_vm13, %v2886_v25, %v1988_v31 }
 0x1b8   : > { %v3371_v38 = vperm.slane %v887_v41, %v2833_v5  ;;  %v763_v15 = vsel %vm576_vm12, %v3280_v26, %v4176_v16  ;;  %v851_v56 = vsel %vm576_vm12, %v3180_v60, %v4177_v18  ;;  %v4178_v41 = vrot.slane %v3205_v24, 4  ;;  %4179 = vst [vmem:[#allocation28_spill] sm:$0xff] %v3414_v6 }
 0x1b9   : > { %v3401_v4 = vperm.slane %v851_v56, %v2833_v5  ;;  %v3404_v24 = vperm.slane %v763_v15, %v2833_v5  ;;  %v3420_v15 = vperm.slane %v1340_v42, %v2787_v30  ;;  %v4181_v56 = vunpack.i.l.bf16 %v3230_v8 }
 0x1ba   : > { %4175 = vst [vmem:[#allocation27_spill] sm:$0xff] %v3371_v38  ;;  %v875_v40 = vsel %vm576_vm12, %v3234_v39, %v4178_v41  ;;  %v911_v16 = vsel %vm576_vm12, %v3371_v38, %v910_v63  ;;  %v790_v41 = vrot.slane %v3377_v20, 4  ;;  %v1376_v39 = vsel %vm576_vm12, %v1375_v1, %v2351_v43 }
 0x1bb   : > { %v2408_v18 = vpack.i.bf16 %v799_v14, %v911_v16  ;;  %v3409_v53 = vperm.slane %v875_v40, %v2833_v5  ;;  %v902_v57 = vrot.slane %v3401_v4, 4  ;;  %v4180_v63 = vunpack.i.h.bf16 %v3137_v58 }
 0x1bc   : > { %v1378_v1 = vsel %vm576_vm12, %v4181_v56, %v1377_v7  ;;  %v791_v43 = vsel %vm576_vm12, %v3404_v24, %v790_v41  ;;  %v3430_v31 = vperm.slane %v1252_v3, %v2787_v30  ;;  %v2377_v42 = vunpack.i.h.bf16 %v3366_v29 }
 0x1bd   : > { %v1342_v14 = vsel %vm576_vm12, %v4180_v63, %v1341_v54  ;;  %2409 = vrot.lane.b32.xlu1 %v2408_v18, %s2567_s25  ;;  %v903_v58 = vsel %vm576_vm12, %v3409_v53, %v902_v57  ;;  %v3436_v8 = vperm.slane %v1266_v27, %v2787_v30  ;;  %v2367_v40 = vunpack.i.h.bf16 %v3391_v10 }
 0x1be   : > { %v2438_v54 = vpack.i.bf16 %v791_v43, %v903_v58  ;;  %v1313_v16 = vrot.slane %v3360_v37, 4  ;;  %v3442_v18 = vperm.slane %v1342_v14, %v2787_v30  ;;  %v3445_v3 = vperm.slane %v1376_v39, %v2787_v30 }
 0x1bf   : > { %v3448_v41 = vperm.slane %v1378_v1, %v2787_v30  ;;  %v4182_v27 = vrot.slane %v3251_v52, 4  ;;  %v3459_v63 = vperm.slane %v3300_v17, %v2833_v5  ;;  %v4184_v14 = vrot.slane %v3277_v46, 4  ;;  %v3469_v43 = vpop.permute.xlu0 %2389 }
 0x1c0   : > { %2439 = vrot.lane.b32.xlu0 %v2438_v54, %s2564_s21  ;;  %v4185_v56 = vrot.slane %v3193_v21, 4  ;;  %v1784_v58 = vrot.slane %v2377_v42, 4  ;;  %v1389_v46 = vrot.slane %v3420_v15, 4  ;;  %v1896_v7 = vrot.slane %v2367_v40, 4 }
 0x1c1   : > { %v3454_v57 = vsel %vm576_vm12, %v4182_v27, %v3420_v15  ;;  %4183 = vst [vmem:[#allocation29_spill] sm:$0xff] %v3459_v63  ;;  %v773_v39 = vsel %vm576_vm12, %v4184_v14, %v3166_v9  ;;  %v1787_v27 = vsel %vm576_vm12, %v2377_v42, %v1786_v48  ;;  %v1899_v9 = vsel %vm576_vm12, %v2367_v40, %v3284_v2 }
 0x1c2   : > { %v861_v1 = vsel %vm576_vm12, %v4185_v56, %v3210_v34  ;;  %v3473_v54 = vperm.slane %v773_v39, %v2833_v5  ;;  %v794_v21 = vrot.slane %v3459_v63, 4  ;;  %v4188_v34 = vrot.slane %v3220_v50, 4  ;;  %v3486_v56 = vpop.permute.xlu1 %2379 }
 0x1c3   : > { %v3476_v17 = vperm.slane %v861_v1, %v2833_v5  ;;  %v2391_v15 = vunpack.i.l.bf16 %v3469_v43  ;;  %v3496_v1 = vperm.slane %v1787_v27, %v2787_v30  ;;  %v3505_v25 = vperm.slane %v1899_v9, %v2787_v30 }
 0x1c4   : > { %4186 = vst [vmem:[#allocation30_spill] sm:$0xff] %v3473_v54  ;;  %v885_v14 = vsel %vm576_vm12, %v4188_v34, %v3216_v49  ;;  %v795_v49 = vsel %vm576_vm12, %v3473_v54, %v794_v21  ;;  %v4190_v34 = vunpack.i.h.bf16 %v3292_v33  ;;  %v1401_v2 = vrot.slane %v3442_v18, 4 }
 0x1c5   : > { %4187 = vst [vmem:[#allocation31_spill] sm:$0xff] %v3476_v17  ;;  %v3489_v48 = vperm.slane %v885_v14, %v2833_v5  ;;  %v906_v42 = vrot.slane %v3476_v17, 4  ;;  %v2382_v50 = vunpack.i.h.bf16 %v3486_v56  ;;  %v4191_v17 = vunpack.i.h.bf16 %v3469_v43 }
 0x1c6   : > { %v1785_v14 = vsel %vm576_vm12, %v1784_v58, %v4190_v34  ;;  %v1909_v40 = vsel %vm576_vm12, %v3326_v28, %v2391_v15  ;;  %v3519_v58 = vperm.slane %v3342_v36, %v2833_v5  ;;  %v4193_v9 = vunpack.i.l.bf16 %v3366_v29 }
 0x1c7   : > { %4189 = vst [vmem:[#allocation32_spill] sm:$0xff] %v3489_v48  ;;  %v907_v39 = vsel %vm576_vm12, %v3489_v48, %v906_v42  ;;  %v1874_v63 = vrot.slane %v4191_v17, 4  ;;  %v3524_v34 = vperm.slane %v1785_v14, %v2787_v30  ;;  %v2381_v17 = vunpack.i.l.bf16 %v3486_v56  ;;  %v2405_v56 = vpop.permute.xlu0 %2404 }
 0x1c8   : > { %v2453_v6 = vpack.i.bf16 %v795_v49, %v907_v39  ;;  %4192 = vst [vmem:[#allocation33_spill] sm:$0xff] %v3519_v58  ;;  %v1772_v42 = vrot.slane %v4193_v9, 4  ;;  %v4194_v39 = vunpack.i.l.bf16 %v3391_v10  ;;  %v4195_v27 = vunpack.i.h.bf16 %v3228_v59 }
 0x1c9   : > { %v1314_v14 = vsel %vm576_vm12, %v3436_v8, %v1313_v16  ;;  %v1910_v21 = vrot.slane %v2391_v15, 4  ;;  %v1872_v48 = vrot.slane %v2382_v50, 4  ;;  %v1875_v28 = vsel %vm576_vm12, %v2382_v50, %v1874_v63 }
 0x1ca   : > { %v1884_v49 = vrot.slane %v4194_v39, 4  ;;  %2454 = vrot.lane.b32.xlu0 %v2453_v6, %s2568_s26  ;;  %v3534_v36 = vsel %vm576_vm12, %v1896_v7, %v4195_v27  ;;  %v3540_v39 = vperm.slane %v1909_v40, %v2787_v30  ;;  %v3543_v6 = vperm.slane %v1314_v14, %v2833_v5  ;;  %v2395_v50 = vpop.permute.xlu1 %2394 }
 0x1cb   : > { %v1337_v54 = vrot.slane %v3519_v58, 4  ;;  %v1402_v7 = vsel %vm576_vm12, %v3241_v51, %v1401_v2  ;;  %v4197_v27 = vrot.slane %v3307_v45, 4  ;;  %v1886_v15 = vrot.slane %v2381_v17, 4 }
 0x1cc   : > { %4196 = vst [vmem:[#allocation34_spill] sm:$0xff] %v3543_v6  ;;  %v3554_v40 = vperm.slane %v1402_v7, %v2833_v5  ;;  %v1390_v63 = vsel %vm576_vm12, %v3251_v52, %v1389_v46  ;;  %v4199_v58 = vrot.slane %v3304_v32, 4  ;;  %v2407_v7 = vunpack.i.h.bf16 %v2405_v56 }
 0x1cd   : > { %v1426_v16 = vsel %vm576_vm12, %v3448_v41, %v4197_v27  ;;  %v1338_v9 = vsel %vm576_vm12, %v3543_v6, %v1337_v54  ;;  %v3564_v2 = vperm.slane %v1390_v63, %v2833_v5  ;;  %v2406_v52 = vunpack.i.l.bf16 %v2405_v56 }
 0x1ce   : > { %4198 = vst [vmem:[#allocation35_spill] sm:$0xff] %v3554_v40  ;;  %v3557_v14 = vperm.slane %v1426_v16, %v2833_v5  ;;  %v1414_v27 = vsel %vm576_vm12, %v3445_v3, %v4199_v58  ;;  %v2418_v37 = vpack.i.bf16 %v2929_v13, %v1338_v9  ;;  %v1449_v16 = vrot.slane %v3554_v40, 4 }
 0x1cf   : > { %v3573_v38 = vperm.slane %v1414_v27, %v2833_v5  ;;  %v1441_v46 = vrot.slane %v3564_v2, 4  ;;  %v1762_v54 = vrot.slane %v2407_v7, 4  ;;  %v2397_v6 = vunpack.i.h.bf16 %v2395_v50 }
 0x1d0   : > { %v2396_v63 = vunpack.i.l.bf16 %v2395_v50  ;;  %v4200_v60 = vunpack.i.l.bf16 %v3228_v59  ;;  %v3580_v58 = vperm.slane %v1875_v28, %v2787_v30  ;;  %2419 = vrot.lane.b32.xlu1 %v2418_v37, %s2567_s25  ;;  %v1450_v13 = vsel %vm576_vm12, %v3557_v14, %v1449_v16 }
 0x1d1   : > { %v1798_v9 = vrot.slane %v2406_v52, 4  ;;  %v1885_v56 = vsel %vm576_vm12, %v1884_v49, %v2381_v17  ;;  %v2413_v27 = vpack.i.bf16 %v1450_v13, %v2947_v0  ;;  %v1442_v50 = vsel %vm576_vm12, %v3573_v38, %v1441_v46 }
 0x1d2   : > { %v1911_v22 = vsel %vm576_vm12, %v4200_v60, %v1910_v21  ;;  %v4201_v59 = vrot.slane %v3241_v51, 4  ;;  %v2468_v21 = vpack.i.bf16 %v1442_v50, %v2960_v35  ;;  %v1760_v28 = vrot.slane %v2397_v6, 4 }
 0x1d3   : > { %v1763_v37 = vsel %vm576_vm12, %v2397_v6, %v1762_v54  ;;  %v1773_v16 = vsel %vm576_vm12, %v1772_v42, %v2396_v63  ;;  %v3597_v40 = vperm.slane %v1911_v22, %v2787_v30  ;;  %v4202_v0 = vunpack.i.h.bf16 %v3469_v43  ;;  %2414 = vrot.lane.b32.xlu2 %v2413_v27, %s2567_s25 }
 0x1d4   : > { %v1400_v60 = vsel %vm576_vm12, %v4201_v59, %v3442_v18  ;;  %v4203_v17 = vunpack.i.l.bf16 %v3391_v10  ;;  %v1797_v35 = vsel %vm576_vm12, %v3348_v61, %v2406_v52  ;;  %v1934_v18 = vrot.slane %v3580_v58, 4  ;;  %2469 = vrot.lane.b32.xlu0 %v2468_v21, %s2564_s21 }
 0x1d5   : > { %v1873_v49 = vsel %vm576_vm12, %v1872_v48, %v4202_v0  ;;  %v4204_v22 = vunpack.i.l.bf16 %v3292_v33  ;;  %v3614_v43 = vperm.slane %v1763_v37, %v2787_v30  ;;  %v1774_v48 = vrot.slane %v2396_v63, 4 }
 0x1d6   : > { %v1887_v51 = vsel %vm576_vm12, %v4203_v17, %v1886_v15  ;;  %v3617_v10 = vperm.slane %v1773_v16, %v2787_v30  ;;  %v3620_v6 = vperm.slane %v1400_v60, %v2833_v5  ;;  %v4205_v61 = vrot.slane %v3448_v41, 4 }
 0x1d7   : > { %v1799_v42 = vsel %vm576_vm12, %v4204_v22, %v1798_v9  ;;  %v788_v52 = vrot.slane %v3404_v24, 4  ;;  %v3628_v33 = vperm.slane %v1885_v56, %v2787_v30  ;;  %v3631_v46 = vperm.slane %v1887_v51, %v2787_v30 }
 0x1d8   : > { %v1424_v15 = vsel %vm576_vm12, %v4205_v61, %v3307_v45  ;;  %v3634_v54 = vperm.slane %v1797_v35, %v2787_v30  ;;  %v1761_v63 = vsel %vm576_vm12, %v1760_v28, %v2407_v7  ;;  %v3638_v13 = vperm.slane %v1799_v42, %v2787_v30 }
 0x1d9   : > { %v4206_v41 = vunpack.i.l.bf16 %v3366_v29  ;;  %v3644_v24 = vperm.slane %v1424_v15, %v2833_v5  ;;  %v1445_v9 = vrot.slane %v3620_v6, 4  ;;  %v1822_v56 = vrot.slane %v3614_v43, 4 }
 0x1da   : > { %v789_v27 = vsel %vm576_vm12, %v788_v52, %v3377_v20  ;;  %v900_v50 = vrot.slane %v3409_v53, 4  ;;  %v4207_v7 = vrot.slane %v3336_v44, 4  ;;  %v3656_v29 = vperm.slane %v1761_v63, %v2787_v30 }
 0x1db   : > { %v1775_v45 = vsel %vm576_vm12, %v4206_v41, %v1774_v48  ;;  %v1808_v60 = vrot.slane %v3617_v10, 4  ;;  %v1446_v21 = vsel %vm576_vm12, %v3644_v24, %v1445_v9  ;;  %v4208_v16 = vrot.slane %v3394_v19, 4 }
 0x1dc   : > { %v1276_v59 = vsel %vm576_vm12, %v4207_v7, %v3262_v23  ;;  %v3665_v20 = vperm.slane %v1775_v45, %v2787_v30  ;;  %v2478_v53 = vpack.i.bf16 %v1446_v21, %v2971_v47  ;;  %v901_v37 = vsel %vm576_vm12, %v900_v50, %v3401_v4 }
 0x1dd   : > { %v3662_v28 = vperm.slane %v1276_v59, %v2833_v5  ;;  %v1300_v0 = vsel %vm576_vm12, %v4208_v16, %v3430_v31  ;;  %v2433_v17 = vpack.i.bf16 %v789_v27, %v901_v37  ;;  %v3680_v22 = vperm.slane %v3454_v57, %v2833_v5 }
 0x1de   : > { %v3675_v51 = vperm.slane %v1300_v0, %v2833_v5  ;;  %2479 = vrot.lane.b32.xlu0 %v2478_v53, %s2568_s26  ;;  %v4209_v47 = vrot.slane %v3445_v3, 4  ;;  %v1823_v42 = vsel %vm576_vm12, %v3665_v20, %v1822_v56  ;;  %v4210_v48 = vrot.slane %v3496_v1, 4 }
 0x1df   : > { %v1325_v35 = vrot.slane %v3662_v28, 4  ;;  %v1935_v15 = vsel %vm576_vm12, %v3631_v46, %v1934_v18  ;;  %v3696_v57 = vperm.slane %v1873_v49, %v2787_v30  ;;  %v1920_v52 = vrot.slane %v3628_v33, 4  ;;  %2434 = vrot.lane.b32.xlu2 %v2433_v17, %s2565_s22 }
 0x1e0   : > { %v1412_v4 = vsel %vm576_vm12, %v4209_v47, %v3304_v32  ;;  %v1847_v61 = vsel %vm576_vm12, %v3638_v13, %v4210_v48  ;;  %v1437_v3 = vrot.slane %v3680_v22, 4  ;;  %v1832_v63 = vrot.slane %v3634_v54, 4 }
 0x1e1   : > { %v3701_v32 = vperm.slane %v1412_v4, %v2833_v5  ;;  %v1326_v41 = vsel %vm576_vm12, %v3675_v51, %v1325_v35  ;;  %v3708_v45 = vperm.slane %v1823_v42, %v2833_v5  ;;  %v3711_v49 = vperm.slane %v1935_v15, %v2833_v5 }
 0x1e2   : > { %v1944_v18 = vrot.slane %v3540_v39, 4  ;;  %v3715_v9 = vperm.slane %v1847_v61, %v2833_v5  ;;  %v4211_v56 = vrot.slane %v3505_v25, 4  ;;  %v1809_v50 = vsel %vm576_vm12, %v1808_v60, %v3656_v29 }
 0x1e3   : > { %v1438_v7 = vsel %vm576_vm12, %v3701_v32, %v1437_v3  ;;  %v1870_v59 = vrot.slane %v3708_v45, 4  ;;  %v1982_v53 = vrot.slane %v3711_v49, 4  ;;  %v3732_v37 = vperm.slane %v3534_v36, %v2787_v30 }
 0x1e4   : > { %v1959_v27 = vsel %vm576_vm12, %v3597_v40, %v4211_v56  ;;  %v2488_v16 = vpack.i.bf16 %v3007_v55, %v1326_v41  ;;  %v3736_v0 = vperm.slane %v1809_v50, %v2833_v5  ;;  %v1921_v60 = vsel %vm576_vm12, %v1920_v52, %v3696_v57  ;;  %v4212_v52 = vld [vmem:[#allocation23_spill] sm:$0xff]  ;;  %v4215_v41 = vld [vmem:[#allocation18_spill] sm:$0xff]  ;;  %v4218_v50 = vld [vmem:[#allocation17_spill] sm:$0xff] }
 0x1e5   : > { %v3727_v21 = vperm.slane %v1959_v27, %v2833_v5  ;;  %v1871_v17 = vsel %vm576_vm12, %v3715_v9, %v1870_v59  ;;  %v1833_v47 = vsel %vm576_vm12, %v1832_v63, %v3524_v34  ;;  %v3747_v30 = vperm.slane %v1921_v60, %v2833_v5  ;;  %v4219_v59 = vld [vmem:[#allocation21_spill] sm:$0xff] }
 0x1e6   : > { %v2448_v55 = vpack.i.bf16 %v1438_v7, %v3011_v62  ;;  %v1858_v4 = vrot.slane %v3736_v0, 4  ;;  %v796_v42 = vrot.slane %v3332_v11, 4  ;;  %v760_v48 = vrot.slane %v3280_v26, 4  ;;  %2489 = vrot.lane.b32.xlu0 %v2488_v16, %s2563_s20  ;;  %v4214_v62 = vld [vmem:[#allocation19_spill] sm:$0xff] }
 0x1e7   : > { %v1983_v35 = vsel %vm576_vm12, %v3727_v21, %v1982_v53  ;;  %v1311_v61 = vrot.slane %v3436_v8, 4  ;;  %v1945_v15 = vsel %vm576_vm12, %v1944_v18, %v3732_v37  ;;  %v4213_v3 = vrot.slane %v4212_v52, 4  ;;  %v4217_v8 = vld [vmem:[#allocation27_spill] sm:$0xff]  ;;  %v4222_v52 = vld [vmem:[#allocation22_spill] sm:$0xff] }
 0x1e8   : > { %v2423_v36 = vpack.i.bf16 %v1871_v17, %v1983_v35  ;;  %v4216_v56 = vrot.slane %v4215_v41, 4  ;;  %2449 = vrot.lane.b32.xlu2 %v2448_v55, %s2563_s20  ;;  %v3768_v26 = vperm.slane %v1833_v47, %v2833_v5  ;;  %v1970_v11 = vrot.slane %v3747_v30, 4  ;;  %v4220_v17 = vld [vmem:[#allocation24_spill] sm:$0xff]  ;;  %v4221_v55 = vld [vmem:[#allocation26_spill] sm:$0xff]  ;;  %v4224_v41 = vld [vmem:[#allocation25_spill] sm:$0xff] }
 0x1e9   : > { %v1288_v63 = vsel %vm576_vm12, %v4213_v3, %v3248_v12  ;;  %v908_v18 = vrot.slane %v4217_v8, 4  ;;  %v736_v7 = vrot.slane %v4218_v50, 4  ;;  %v872_v12 = vrot.slane %v4219_v59, 4 }
 0x1ea   : > { %v849_v27 = vsel %vm576_vm12, %v4216_v56, %v4214_v62  ;;  %2424 = vrot.lane.b32.xlu1 %v2423_v36, %s2567_s25  ;;  %v1844_v53 = vrot.slane %v3638_v13, 4  ;;  %v1859_v16 = vsel %vm576_vm12, %v3768_v26, %v1858_v4  ;;  %v3778_v60 = vperm.slane %v1945_v15, %v2833_v5  ;;  %v4223_v62 = vld [vmem:[#allocation16_spill] sm:$0xff] }
 0x1eb   : > { %v797_v35 = vsel %vm576_vm12, %v796_v42, %v4220_v17  ;;  %v3783_v47 = vperm.slane %v1288_v63, %v2833_v5  ;;  %v1312_v36 = vsel %vm576_vm12, %v1311_v61, %v4221_v55  ;;  %v737_v3 = vsel %vm576_vm12, %v736_v7, %v4222_v52 }
 0x1ec   : > { %v761_v13 = vsel %vm576_vm12, %v760_v48, %v4223_v62  ;;  %v3792_v4 = vperm.slane %v849_v27, %v2833_v5  ;;  %v1971_v15 = vsel %vm576_vm12, %v3778_v60, %v1970_v11  ;;  %v909_v42 = vsel %vm576_vm12, %v908_v18, %v4224_v41  ;;  %v4225_v48 = vld [vmem:[#allocation20_spill] sm:$0xff] }
 0x1ed   : > { %v3799_v63 = vperm.slane %v737_v3, %v2833_v5  ;;  %v3802_v61 = vperm.slane %v761_v13, %v2833_v5  ;;  %v1956_v56 = vrot.slane %v3597_v40, 4  ;;  %v2503_v8 = vpack.i.bf16 %v1859_v16, %v1971_v15  ;;  %v4226_v3 = vld [vmem:[#allocation30_spill] sm:$0xff] }
 0x1ee   : > { %v2463_v50 = vpack.i.bf16 %v797_v35, %v909_v42  ;;  %v873_v27 = vsel %vm576_vm12, %v872_v12, %v4225_v48  ;;  %v3808_v7 = vperm.slane %v1312_v36, %v2833_v5  ;;  %v898_v59 = vrot.slane %v3792_v4, 4  ;;  %v4227_v42 = vld [vmem:[#allocation32_spill] sm:$0xff] }
 0x1ef   : > { %v786_v11 = vrot.slane %v3799_v63, 4  ;;  %v3812_v18 = vperm.slane %v873_v27, %v2833_v5  ;;  %v1277_v17 = vrot.slane %v3262_v23, 4  ;;  %v1301_v55 = vrot.slane %v3430_v31, 4  ;;  %2504 = vrot.lane.b32.xlu0 %v2503_v8, %s2563_s20  ;;  %v4228_v8 = vld [vmem:[#allocation3_spill] sm:$0xff] }
 0x1f0   : > { %v1443_v40 = vrot.slane %v3644_v24, 4  ;;  %v1845_v12 = vsel %vm576_vm12, %v1844_v53, %v3496_v1  ;;  %v1820_v16 = vrot.slane %v3665_v20, 4  ;;  %2464 = vrot.lane.b32.xlu2 %v2463_v50, %s2569_s27  ;;  %v1333_v35 = vrot.slane %v3783_v47, 4 }
 0x1f1   : > { %v787_v36 = vsel %vm576_vm12, %v3802_v61, %v786_v11  ;;  %v899_v23 = vsel %vm576_vm12, %v3812_v18, %v898_v59  ;;  %v3829_v52 = vperm.slane %v1845_v12, %v2833_v5  ;;  %v1957_v1 = vsel %vm576_vm12, %v1956_v56, %v3505_v25  ;;  %v4230_v59 = vld [vmem:[#allocation29_spill] sm:$0xff] }
 0x1f2   : > { %v2428_v31 = vpack.i.bf16 %v787_v36, %v899_v23  ;;  %v1278_v24 = vsel %vm576_vm12, %v3336_v44, %v1277_v17  ;;  %v1932_v20 = vrot.slane %v3631_v46, 4  ;;  %v1334_v53 = vsel %vm576_vm12, %v3808_v7, %v1333_v35  ;;  %v4232_v36 = vld [vmem:[#allocation34_spill] sm:$0xff] }
 0x1f3   : > { %v792_v62 = vrot.slane %v4226_v3, 4  ;;  %v1834_v13 = vrot.slane %v3524_v34, 4  ;;  %v1444_v15 = vsel %vm576_vm12, %v1443_v40, %v3620_v6  ;;  %v1302_v25 = vsel %vm576_vm12, %v3394_v19, %v1301_v55  ;;  %v4229_v19 = vld [vmem:[#allocation4_spill] sm:$0xff] }
 0x1f4   : > { %2429 = vrot.lane.b32.xlu1 %v2428_v31, %s2563_s20  ;;  %v1821_v44 = vsel %vm576_vm12, %v1820_v16, %v3614_v43  ;;  %v3848_v46 = vperm.slane %v1957_v1, %v2833_v5  ;;  %v3851_v41 = vperm.slane %v1278_v24, %v2833_v5  ;;  %v904_v56 = vrot.slane %v4227_v42, 4  ;;  %v4231_v16 = vld [vmem:[#allocation31_spill] sm:$0xff] }
 0x1f5   : > { %v1946_v34 = vrot.slane %v3732_v37, 4  ;;  %v1810_v6 = vrot.slane %v3656_v29, 4  ;;  %v2518_v50 = vpack.i.bf16 %v4228_v8, %v1334_v53  ;;  %v1864_v48 = vrot.slane %v3829_v52, 4  ;;  %v4233_v53 = vld [vmem:[#allocation33_spill] sm:$0xff] }
 0x1f6   : > { %v2473_v27 = vpack.i.bf16 %v1444_v15, %v4229_v19  ;;  %v1933_v43 = vsel %vm576_vm12, %v1932_v20, %v3580_v58  ;;  %v3862_v11 = vperm.slane %v1302_v25, %v2833_v5  ;;  %v793_v17 = vsel %vm576_vm12, %v792_v62, %v4230_v59  ;;  %v4234_v15 = vld [vmem:[#allocation12_spill] sm:$0xff]  ;;  %v2000_v59 = vpop.permute.xlu1 %1999 }
 0x1f7   : > { %v1922_v55 = vrot.slane %v3696_v57, 4  ;;  %v1835_v29 = vsel %vm576_vm12, %v3634_v54, %v1834_v13  ;;  %v1323_v37 = vrot.slane %v3675_v51, 4  ;;  %2519 = vrot.lane.b32.xlu0 %v2518_v50, %s2568_s26  ;;  %v1827_v40 = vperm.slane %v1821_v44, %v2833_v5 }
 0x1f8   : > { %2474 = vrot.lane.b32.xlu2 %v2473_v27, %s2566_s23  ;;  %v1976_v58 = vrot.slane %v3848_v46, 4  ;;  %v1329_v12 = vrot.slane %v3851_v41, 4  ;;  %v905_v35 = vsel %vm576_vm12, %v904_v56, %v4231_v16  ;;  %v1335_v57 = vrot.slane %v4232_v36, 4  ;;  %v4236_v27 = vld [vmem:[#allocation7_spill] sm:$0xff]  ;;  %v2024_v36 = vpop.permute.xlu2 %2023 }
 0x1f9   : > { %v1435_v23 = vrot.slane %v3701_v32, 4  ;;  %v1865_v54 = vsel %vm576_vm12, %v1864_v48, %v1827_v40  ;;  %v1939_v51 = vperm.slane %v1933_v43, %v2833_v5  ;;  %v2443_v31 = vpack.i.bf16 %v793_v17, %v905_v35  ;;  %v4239_v35 = vld [vmem:[#allocation13_spill] sm:$0xff] }
 0x1fa   : > { %v1330_v1 = vsel %vm576_vm12, %v3862_v11, %v1329_v12  ;;  %v1811_v24 = vsel %vm576_vm12, %v3617_v10, %v1810_v6  ;;  %v1439_v20 = vrot.slane %v3573_v38, 4  ;;  %v1336_v3 = vsel %vm576_vm12, %v1335_v57, %v4233_v53  ;;  %v4235_v6 = vld [vmem:[#allocation5_spill] sm:$0xff]  ;;  %v4238_v12 = vld [vmem:[#allocation35_spill] sm:$0xff] }
 0x1fb   : > { %v1968_v62 = vrot.slane %v3778_v60, 4  ;;  %v784_v32 = vrot.slane %v3802_v61, 4  ;;  %v896_v13 = vrot.slane %v3812_v18, 4  ;;  %v2528_v25 = vpack.i.bf16 %v4234_v15, %v1336_v3 }
 0x1fc   : > { %2444 = vrot.lane.b32.xlu1 %v2443_v31, %s2566_s23  ;;  %v1947_v44 = vsel %vm576_vm12, %v3540_v39, %v1946_v34  ;;  %v1856_v10 = vrot.slane %v3768_v26, 4  ;;  %v1977_v38 = vsel %vm576_vm12, %v1976_v58, %v1939_v51  ;;  %v1866_v42 = vrot.slane %v1827_v40, 4 }
 0x1fd   : > { %v2533_v56 = vpack.i.bf16 %v1865_v54, %v1977_v38  ;;  %v2498_v8 = vpack.i.bf16 %v4235_v6, %v1330_v1  ;;  %v1819_v60 = vperm.slane %v1811_v24, %v2833_v5  ;;  %v1843_v61 = vperm.slane %v1835_v29, %v2833_v5  ;;  %v2012_v29 = vpop.permute.xlu0 %2011  ;;  %v4241_v24 = vld [vmem:[#allocation8_spill] sm:$0xff] }
 0x1fe   : > { %v1923_v18 = vsel %vm576_vm12, %v3628_v33, %v1922_v55  ;;  %v1440_v50 = vsel %vm576_vm12, %v1439_v20, %v3564_v2  ;;  %v3906_v39 = vsel %vm576_vm12, %v1435_v23, %v3680_v22  ;;  %v3910_v26 = vsel %vm576_vm12, %v1323_v37, %v3662_v28  ;;  %v4237_v37 = vld [vmem:[#allocation28_spill] sm:$0xff] }
 0x1ff   : > { %2534 = vrot.lane.b32.xlu0 %v2533_v56, %s2566_s23  ;;  %v1955_v34 = vperm.slane %v1947_v44, %v2833_v5  ;;  %v3916_v48 = vsel %vm576_vm12, %v1968_v62, %v3747_v30  ;;  %v3920_v33 = vsel %vm576_vm12, %v784_v32, %v3799_v63  ;;  %v3924_v2 = vsel %vm576_vm12, %v896_v13, %v3792_v4  ;;  %v4242_v62 = vld [vmem:[#allocation10_spill] sm:$0xff] }
 0x200   : > { %2499 = vrot.lane.b32.xlu2 %v2498_v8, %s2564_s21  ;;  %v1978_v28 = vrot.slane %v1939_v51, 4  ;;  %v1860_v22 = vrot.slane %v1843_v61, 4  ;;  %v1931_v19 = vperm.slane %v1923_v18, %v2833_v5  ;;  %v2458_v43 = vpack.i.bf16 %v1440_v50, %v4236_v27  ;;  %v4240_v51 = vld [vmem:[#allocation6_spill] sm:$0xff] }
 0x201   : > { %v1867_v30 = vsel %vm576_vm12, %v3829_v52, %v1866_v42  ;;  %v1447_v63 = vrot.slane %v3557_v14, 4  ;;  %v3934_v17 = vsel %vm576_vm12, %v1856_v10, %v3736_v0  ;;  %v1972_v55 = vrot.slane %v1955_v34, 4 }
 0x202   : > { %v1861_v4 = vsel %vm576_vm12, %v1860_v22, %v1819_v60  ;;  %v1979_v5 = vsel %vm576_vm12, %v3848_v46, %v1978_v28  ;;  %v2071_v40 = vsel %vm1000_vm14, %v4237_v37, %v2000_v59  ;;  %v1327_v57 = vrot.slane %v3862_v11, 4 }
 0x203   : > { %v2538_v52 = vpack.i.bf16 %v1867_v30, %v1979_v5  ;;  %v1973_v14 = vsel %vm576_vm12, %v1972_v55, %v1931_v19  ;;  %v1448_v0 = vsel %vm576_vm12, %v1447_v63, %v4238_v12  ;;  %v2074_v16 = vsel %vm1004_vm15, %v2071_v40, %v2012_v29 }
 0x204   : > { %2459 = vrot.lane.b32.xlu1 %v2458_v43, %s2565_s22  ;;  %v2513_v58 = vpack.i.bf16 %v1861_v4, %v1973_v14  ;;  %v2483_v46 = vpack.i.bf16 %v1448_v0, %v4239_v35  ;;  %v3952_v23 = vsel %vm1008_vm0, %v2074_v16, %v2024_v36  ;;  %v1328_v54 = vsel %vm576_vm12, %v1327_v57, %v3851_v41 }
 0x205   : > { %v1868_v31 = vrot.slane %v3715_v9, 4  ;;  %v1980_v1 = vrot.slane %v3727_v21, 4  ;;  %v2493_v11 = vpack.i.bf16 %v4241_v24, %v1328_v54  ;;  %v1331_v20 = vrot.slane %v3808_v7, 4 }
 0x206   : > { %v1862_v32 = vrot.slane %v1819_v60, 4  ;;  %v1974_v7 = vrot.slane %v1931_v19, 4 }
 0x207   : > { %2539 = vrot.lane.b32.xlu0 %v2538_v52, %s2568_s26  ;;  %v1869_v53 = vsel %vm576_vm12, %v1868_v31, %v3708_v45  ;;  %v1981_v41 = vsel %vm576_vm12, %v1980_v1, %v3711_v49  ;;  %v1332_v9 = vsel %vm576_vm12, %v1331_v20, %v3783_v47  ;;  %v4243_v45 = vld [vmem:[#allocation9_spill] sm:$0xff]  ;;  %v4244_v47 = vld [vmem:[#allocation15_spill] sm:$0xff] }
 0x208   : > { %2514 = vrot.lane.b32.xlu2 %v2513_v58, %s2565_s22  ;;  %v2543_v3 = vpack.i.bf16 %v1869_v53, %v1981_v41  ;;  %v2508_v21 = vpack.i.bf16 %v4242_v62, %v1332_v9  ;;  %v1863_v13 = vsel %vm576_vm12, %v1843_v61, %v1862_v32  ;;  %v1975_v15 = vsel %vm576_vm12, %v1955_v34, %v1974_v7 }
 0x209   : > { %v2523_v49 = vpack.i.bf16 %v1863_v13, %v1975_v15 }
 0x20c   : > { %2484 = vrot.lane.b32.xlu1 %v2483_v46, %s2569_s27 }
 0x20f   : > { %2035 = vrot.lane.b32.xlu0 %v4240_v51, %s2568_s26 }
 0x210   : > { %2529 = vrot.lane.b32.xlu2 %v2528_v25, %s2569_s27 }
 0x214   : > { %2494 = vrot.lane.b32.xlu1 %v2493_v11, %s2565_s22 }
 0x218   : > { %2544 = vrot.lane.b32.xlu2 %v2543_v3, %s2569_s27 }
 0x21c   : > { %2509 = vrot.lane.b32.xlu1 %v2508_v21, %s2566_s23  ;;  %v4245_v21 = vld [vmem:[#allocation11_spill] sm:$0xff] }
 0x220   : > { %2059 = vrot.lane.b32.xlu2 %v4243_v45, %s2567_s25 }
 0x224   : > { %2524 = vrot.lane.b32.xlu1 %v2523_v49, %s2564_s21 }
 0x22c   : > { %2047 = vrot.lane.b32.xlu1 %v4244_v47, %s2569_s27 }
 0x22d   : > { %v3980_v44 = vpop.permute.xlu2 %2414 }
 0x22f   : > { %v2410_v38 = vpop.permute.xlu1 %2409 }
 0x230   : > { %v2411_v35 = vunpack.i.l.bf16 %v2410_v38  ;;  %v2412_v31 = vunpack.i.h.bf16 %v2410_v38 }
 0x232   : > { %v2440_v25 = vpop.permute.xlu0 %2439 }
 0x233   : > { %v2442_v55 = vunpack.i.h.bf16 %v2440_v25  ;;  %v2441_v5 = vunpack.i.l.bf16 %v2440_v25 }
 0x239   : > { %v2435_v42 = vpop.permute.xlu2 %2434 }
 0x23a   : > { %v2437_v43 = vunpack.i.h.bf16 %v2435_v42  ;;  %v2436_v59 = vunpack.i.l.bf16 %v2435_v42 }
 0x23c   : > { %v2455_v10 = vpop.permute.xlu0 %2454 }
 0x23d   : > { %v2457_v29 = vunpack.i.h.bf16 %v2455_v10  ;;  %v2456_v40 = vunpack.i.l.bf16 %v2455_v10 }
 0x242   : > { %v3982_v56 = vpop.permute.xlu1 %2419  ;;  %v2450_v8 = vpop.permute.xlu2 %2449 }
 0x243   : > { %v2452_v1 = vunpack.i.h.bf16 %v2450_v8  ;;  %v2451_v24 = vunpack.i.l.bf16 %v2450_v8 }
 0x245   : > { %v1537_v62 = vsel %vm996_vm13, %v3906_v39, %v2452_v1  ;;  %v997_v32 = vsel %vm996_vm13, %v4245_v21, %v2451_v24 }
 0x246   : > { %v2470_v6 = vpop.permute.xlu0 %2469 }
 0x247   : > { %v2472_v7 = vunpack.i.h.bf16 %v2470_v6  ;;  %v2471_v13 = vunpack.i.l.bf16 %v2470_v6 }
 0x24a   : > { %v2465_v18 = vpop.permute.xlu2 %2464 }
 0x24b   : > { %v2467_v58 = vunpack.i.h.bf16 %v2465_v18  ;;  %v2466_v12 = vunpack.i.l.bf16 %v2465_v18 }
 0x250   : > { %v3986_v61 = vpop.permute.xlu0 %2479 }
 0x251   : > { %v2482_v8 = vunpack.i.h.bf16 %v3986_v61  ;;  %v2481_v18 = vunpack.i.l.bf16 %v3986_v61  ;;  %v1025_v61 = vld [vmem:[%s4110_s3] sm:$0xff] }
 0x252   : > { %v2475_v30 = vpop.permute.xlu2 %2474 }
 0x253   : > { %v2477_v25 = vunpack.i.h.bf16 %v2475_v30  ;;  %v2476_v10 = vunpack.i.l.bf16 %v2475_v30 }
 0x258   : > { %v3988_v22 = vpop.permute.xlu0 %2489 }
 0x25a   : > { %v2500_v41 = vpop.permute.xlu2 %2499 }
 0x25c   : > { %v3984_v60 = vpop.permute.xlu1 %2424 }
 0x261   : > { %v4002_v57 = vpop.permute.xlu0 %2504 }
 0x266   : > { %v2430_v50 = vpop.permute.xlu1 %2429 }
 0x267   : > { %v2432_v34 = vunpack.i.h.bf16 %v2430_v50  ;;  %v2431_v28 = vunpack.i.l.bf16 %v2430_v50 }
 0x269   : > { %v998_v19 = vsel %vm996_vm13, %v3920_v33, %v2432_v34  ;;  %v999_v27 = vsel %vm996_vm13, %v3924_v2, %v2431_v28  ;;  %v2520_v38 = vpop.permute.xlu0 %2519  ;;  %v2417_v28 = vunpack.i.h.bf16 %v3980_v44 }
 0x26a   : > { %v1002_v63 = vsel %vm1000_vm14, %v998_v19, %v2437_v43  ;;  %v1003_v4 = vsel %vm1000_vm14, %v999_v27, %v2436_v59  ;;  %v2416_v19 = vunpack.i.l.bf16 %v3980_v44  ;;  %v2515_v59 = vpop.permute.xlu2 %2514  ;;  %v2521_v1 = vunpack.i.l.bf16 %v2520_v38 }
 0x26b   : > { %v1006_v33 = vsel %vm1004_vm15, %v1002_v63, %v2442_v55  ;;  %v1007_v2 = vsel %vm1004_vm15, %v1003_v4, %v2441_v5 }
 0x26e   : > { %v2445_v37 = vpop.permute.xlu1 %2444 }
 0x26f   : > { %v2447_v52 = vunpack.i.h.bf16 %v2445_v37  ;;  %v2446_v14 = vunpack.i.l.bf16 %v2445_v37  ;;  %v2491_v37 = vunpack.i.l.bf16 %v3988_v22 }
 0x271   : > { %v1010_v0 = vsel %vm1008_vm0, %v1006_v33, %v2447_v52  ;;  %v1011_v16 = vsel %vm1008_vm0, %v1007_v2, %v2446_v14  ;;  %v2535_v5 = vpop.permute.xlu0 %2534  ;;  %v1536_v2 = vsel %vm996_vm13, %v3910_v26, %v2491_v37 }
 0x272   : > { %v1015_v46 = vsel %vm1012_vm1, %v1011_v16, %v2456_v40  ;;  %v1014_v36 = vsel %vm1012_vm1, %v1010_v0, %v2457_v29  ;;  %v2492_v29 = vunpack.i.h.bf16 %v3988_v22  ;;  %v2530_v14 = vpop.permute.xlu2 %2529  ;;  %v2502_v16 = vunpack.i.h.bf16 %v2500_v41 }
 0x273   : > { %v1019_v54 = vsel %vm1016_vm2, %v1015_v46, %v2466_v12  ;;  %v1018_v51 = vsel %vm1016_vm2, %v1014_v36, %v2467_v58  ;;  %v4246_v58 = vld [vmem:[#allocation14_spill] sm:$0xff]  ;;  %v2507_v36 = vunpack.i.h.bf16 %v4002_v57  ;;  %v2506_v22 = vunpack.i.l.bf16 %v4002_v57 }
 0x274   : > { %v1023_v11 = vsel %vm1020_vm3, %v1019_v54, %v2411_v35  ;;  %v1022_v53 = vsel %vm1020_vm3, %v1018_v51, %v2412_v31  ;;  %v1535_v33 = vsel %vm996_vm13, %v4246_v58, %v2492_v29  ;;  %v2501_v35 = vunpack.i.l.bf16 %v2500_v41 }
 0x275   : > { %1042 = vmatpush.msra.mxu0 %v1023_v11  ;;  %v2522_v31 = vunpack.i.h.bf16 %v2520_v38  ;;  %v2532_v26 = vunpack.i.h.bf16 %v2530_v14 }
 0x276   : > { %v2460_v20 = vpop.permute.xlu1 %2459 }
 0x277   : > { %v2462_v3 = vunpack.i.h.bf16 %v2460_v20  ;;  %v2461_v9 = vunpack.i.l.bf16 %v2460_v20  ;;  %1043 = vmatpush.msra.mxu0 %v1022_v53  ;;  %v2531_v20 = vunpack.i.l.bf16 %v2530_v14 }
 0x279   : > { %v1540_v45 = vsel %vm1000_vm14, %v1537_v62, %v2462_v3  ;;  %v1001_v15 = vsel %vm1000_vm14, %v997_v32, %v2461_v9  ;;  %v2540_v53 = vpop.permute.xlu0 %2539  ;;  %v2421_v9 = vunpack.i.l.bf16 %v3982_v56 }
 0x27a   : > { %v1543_v49 = vsel %vm1004_vm15, %v1540_v45, %v2472_v7  ;;  %v1005_v47 = vsel %vm1004_vm15, %v1001_v15, %v2471_v13  ;;  %v2422_v7 = vunpack.i.h.bf16 %v3982_v56  ;;  %v2517_v13 = vunpack.i.h.bf16 %v2515_v59 }
 0x27b   : > { %v1009_v42 = vsel %vm1008_vm0, %v1005_v47, %v2476_v10  ;;  %v1546_v39 = vsel %vm1008_vm0, %v1543_v49, %v2477_v25  ;;  %v2516_v45 = vunpack.i.l.bf16 %v2515_v59  ;;  %v2069_v49 = vsel %vm996_vm13, %v3934_v17, %v2507_v36  ;;  %v2545_v25 = vpop.permute.xlu2 %2544  ;;  %v2256_v10 = vld [vmem:[%s4110_s3 + $0x8] sm:$0xff] }
 0x27c   : > { %v1013_v27 = vsel %vm1012_vm1, %v1009_v42, %v2481_v18  ;;  %v1549_v43 = vsel %vm1012_vm1, %v1546_v39, %v2482_v8  ;;  %v2070_v47 = vsel %vm996_vm13, %v3916_v48, %v2506_v22  ;;  %v2072_v8 = vsel %vm1000_vm14, %v2069_v49, %v2517_v13 }
 0x27d   : > { %v2073_v18 = vsel %vm1000_vm14, %v2070_v47, %v2516_v45  ;;  %v2537_v17 = vunpack.i.h.bf16 %v2535_v5  ;;  %v2542_v48 = vunpack.i.h.bf16 %v2540_v53 }
 0x27e   : > { %v2485_v6 = vpop.permute.xlu1 %2484 }
 0x27f   : > { %v2487_v50 = vunpack.i.h.bf16 %v2485_v6  ;;  %v2486_v34 = vunpack.i.l.bf16 %v2485_v6  ;;  %v2536_v6 = vunpack.i.l.bf16 %v2535_v5  ;;  %v2427_v5 = vunpack.i.h.bf16 %v3984_v60 }
 0x281   : > { %v1017_v30 = vsel %vm1016_vm2, %v1013_v27, %v2486_v34  ;;  %v1552_v63 = vsel %vm1016_vm2, %v1549_v43, %v2487_v50  ;;  %v2541_v50 = vunpack.i.l.bf16 %v2540_v53  ;;  %v2546_v27 = vunpack.i.l.bf16 %v2545_v25 }
 0x282   : > { %v1021_v4 = vsel %vm1020_vm3, %v1017_v30, %v2416_v19  ;;  %v1555_v55 = vsel %vm1020_vm3, %v1552_v63, %v2417_v28  ;;  %v2547_v19 = vunpack.i.h.bf16 %v2545_v25  ;;  %v2426_v30 = vunpack.i.l.bf16 %v3984_v60  ;;  %v2036_v63 = vpop.permute.xlu0 %2035 }
 0x283   : > { %1044 = vmatpush.msra.mxu0 %v1021_v4  ;;  %1575 = vmatpush.msra.mxu1 %v1555_v55  ;;  %v2080_v37 = vsel %vm1012_vm1, %v3952_v23, %v2036_v63  ;;  %v1024_v23 = vld [vmem:[%s2676_s17] sm:$0xff] }
 0x284   : > { %2255 = vmatmul.msk.f32.vlgmr.msra.gmra.mxu0 %vm1004_vm15, %v1025_v61 }
 0x286   : > { %v2495_v44 = vpop.permute.xlu1 %2494 }
 0x287   : > { %v2497_v40 = vunpack.i.h.bf16 %v2495_v44  ;;  %v2496_v52 = vunpack.i.l.bf16 %v2495_v44 }
 0x289   : > { %v1538_v12 = vsel %vm1000_vm14, %v1535_v33, %v2497_v40  ;;  %v1539_v0 = vsel %vm1000_vm14, %v1536_v2, %v2496_v52  ;;  %v2060_v52 = vpop.permute.xlu2 %2059  ;;  %v2258_v33 = vld [vmem:[%s4110_s3 + $0x10] sm:$0xff] }
 0x28a   : > { %v1541_v24 = vsel %vm1004_vm15, %v1538_v12, %v2502_v16  ;;  %v1542_v11 = vsel %vm1004_vm15, %v1539_v0, %v2501_v35 }
 0x28e   : > { %v2510_v46 = vpop.permute.xlu1 %2509 }
 0x28f   : > { %v2512_v54 = vunpack.i.h.bf16 %v2510_v46  ;;  %v2511_v51 = vunpack.i.l.bf16 %v2510_v46 }
 0x291   : > { %v1544_v3 = vsel %vm1008_vm0, %v1541_v24, %v2512_v54  ;;  %v1545_v41 = vsel %vm1008_vm0, %v1542_v11, %v2511_v51 }
 0x292   : > { %v1548_v62 = vsel %vm1012_vm1, %v1545_v41, %v2521_v1  ;;  %v1547_v57 = vsel %vm1012_vm1, %v1544_v3, %v2522_v31 }
 0x293   : > { %v1551_v21 = vsel %vm1016_vm2, %v1548_v62, %v2531_v20  ;;  %v1550_v32 = vsel %vm1016_vm2, %v1547_v57, %v2532_v26 }
 0x294   : > { %v1554_v15 = vsel %vm1020_vm3, %v1551_v21, %v2421_v9  ;;  %v1553_v42 = vsel %vm1020_vm3, %v1550_v32, %v2422_v7 }
 0x295   : > { %1576 = vmatpush.msra.mxu1 %v1554_v15 }
 0x296   : > { %v2525_v38 = vpop.permute.xlu1 %2524 }
 0x297   : > { %v2527_v56 = vunpack.i.h.bf16 %v2525_v38  ;;  %v2526_v39 = vunpack.i.l.bf16 %v2525_v38  ;;  %1577 = vmatpush.msra.mxu1 %v1553_v42 }
 0x298   : > { %2257 = vmatmul.msk.f32.vlgmr.msra.gmra.mxu1 %vm1004_vm15, %v2256_v10 }
 0x299   : > { %v2075_v34 = vsel %vm1004_vm15, %v2072_v8, %v2527_v56  ;;  %v2076_v28 = vsel %vm1004_vm15, %v2073_v18, %v2526_v39 }
 0x29a   : > { %v2079_v43 = vsel %vm1008_vm0, %v2076_v28, %v2536_v6  ;;  %v2078_v59 = vsel %vm1008_vm0, %v2075_v34, %v2537_v17 }
 0x29b   : > { %v2082_v61 = vsel %vm1012_vm1, %v2079_v43, %v2541_v50  ;;  %v2081_v4 = vsel %vm1012_vm1, %v2078_v59, %v2542_v48 }
 0x29c   : > { %v2085_v55 = vsel %vm1016_vm2, %v2082_v61, %v2546_v27  ;;  %v2084_v44 = vsel %vm1016_vm2, %v2081_v4, %v2547_v19 }
 0x29d   : > { %v2088_v29 = vsel %vm1020_vm3, %v2085_v55, %v2426_v30  ;;  %v2087_v58 = vsel %vm1020_vm3, %v2084_v44, %v2427_v5 }
 0x29e   : > { %v2048_v40 = vpop.permute.xlu1 %2047  ;;  %2108 = vmatpush.msra.mxu2 %v2088_v29 }
 0x29f   : > { %v2083_v14 = vsel %vm1016_vm2, %v2080_v37, %v2048_v40 }
 0x2a0   : > { %2109 = vmatpush.msra.mxu2 %v2087_v58  ;;  %v2086_v60 = vsel %vm1020_vm3, %v2083_v14, %v2060_v52 }
 0x2a2   : > { %2110 = vmatpush.msra.mxu2 %v2086_v60 }
 0x2a3   : > { %2259 = vmatmul.msk.f32.vlgmr.msra.gmra.mxu2 %vm1004_vm15, %v2258_v33 }
 0x301   : > { %v1046_v2 = vpop.f32.mrf.mxu0 }
 0x302   : > { %v1049_v12 = vadd.f32 %v1046_v2, %v1024_v23 }
 0x304   : > { %1050 = vst.msk [vmem:[%s2676_s17] sm:$0xff] %vm509_vm8, %v1049_v12 }
 0x30b   : > { %v1556_v0 = vld [vmem:[%s2676_s17] sm:$0xff] }
 0x315   : > { %v1579_v16 = vpop.f32.mrf.mxu1 }
 0x316   : > { %v1582_v35 = vadd.f32 %v1579_v16, %v1556_v0 }
 0x318   : > { %1583 = vst.msk [vmem:[%s2676_s17] sm:$0xff] %vm509_vm8, %v1582_v35 }
 0x31f   : > { %v2089_v46 = vld [vmem:[%s2676_s17] sm:$0xff] }
 0x326   : > { %v2112_v36 = vpop.f32.mrf.mxu2 }
 0x327   : > { %v2115_v22 = vadd.f32 %v2112_v36, %v2089_v46 }
 0x329   : > { %2116 = vst.msk [vmem:[%s2676_s17] sm:$0xff] %vm509_vm8, %v2115_v22 }
 0x330   : > { %v2117_v54 = vld [vmem:[%s2676_s17] sm:$0xff]  ;;  %s297_s17 = scalar_lea.vmem %s4114_s7, %s2666_s14 }
 0x331   : > { %v2118_v51 = vsel %vm509_vm8, %v2117_v54, 0.0 }
 0x332   : > { %2119 = vadd.xlane.f32.xlu0 %v2118_v51 }
 0x3a5   : > { %v2120_v31 = vpop.xlane.xlu0 %2119 }
 0x3a6   : > { %v2121_v1 = vmul.f32 0.015625, %v2120_v31  ;;  %2124 = vst.msk [vmem:[%s293_s13] sm:$0xff] %vm2123_vm4, %v2120_v31 }
 0x3a8   : > { %v2122_v24 = vsub.f32 %v2117_v54, %v2121_v1 }
 0x3aa   : > { %v2125_v11 = vmul.f32 %v2122_v24, %v2122_v24 }
 0x3ac   : > { %v2126_v26 = vsel %vm509_vm8, %v2125_v11, 0.0 }
 0x3ad   : > { %2127 = vadd.xlane.f32.xlu1 %v2126_v26 }
 0x420   : > { %v2128_v20 = vpop.xlane.xlu1 %2127 }
 0x421   : > { %2129 = vst.msk [vmem:[%s297_s17] sm:$0xff] %vm2123_vm4, %v2128_v20 }
 0x422 PF: > { %s18_s24 = sadd.s32 1, %s2554_s24  }
 0x423   : > { %p15_p4 = scmp.ge.s32.totalorder %s18_s24, 4  }
 0x425   :  { %17 = sbr.rel (!%p15_p4) target bundleno = 1 (0x1), region = 96 }

</bundles_post_ra>
